<compile_context>
chip_gen: v6e
topology: v6e:2x2x1
jax: 0.10.0
libtpu: 0.0.40
codegen_flags: <defaults>
</compile_context>

<pallas_src>
import functools

import jax
import jax.numpy as jnp
from jax.experimental import pallas as pl
from jax.experimental.pallas import tpu as pltpu


def _round_up(x, m):
    return (x + m - 1) // m * m


# --------------------------- fused matmul kernel -----------------------------

def _matmul_kernel(*refs, nk, act, mode):
    if mode == "plain":
        a_ref, b_ref, bias_ref, o_ref, acc_ref = refs
    elif mode == "residual":
        a_ref, b_ref, bias_ref, r_ref, o_ref, acc_ref = refs
    else:  # "spade": y = normalized * (1 + gamma) + (a @ b + bias)
        a_ref, b_ref, bias_ref, n_ref, g_ref, o_ref, acc_ref = refs

    @pl.when(pl.program_id(2) == 0)
    def _():
        acc_ref[...] = jnp.zeros(acc_ref.shape, acc_ref.dtype)

    acc_ref[...] += jnp.dot(a_ref[...], b_ref[...],
                            preferred_element_type=jnp.float32)

    @pl.when(pl.program_id(2) == nk - 1)
    def _():
        y = acc_ref[...] + bias_ref[...]
        if mode == "residual":
            y = y + r_ref[...]
        elif mode == "spade":
            y = n_ref[...] * (1.0 + g_ref[...]) + y
        if act == "relu":
            y = jnp.maximum(y, 0.0)
        elif act == "leaky":
            y = jnp.where(y > 0, y, 0.2 * y)
        elif act == "sigmoid":
            y = jax.nn.sigmoid(y)
        o_ref[...] = y


def pallas_matmul(a, b, bias, act="none", mode="plain", extras=(),
                  keep_pad_cols=False):
    """act(epilogue(a @ b + bias)); bf16 MXU inputs, f32 accumulation.

    mode="plain"    : y = a @ b + bias
    mode="residual" : y = a @ b + bias + extras[0]
    mode="spade"    : y = extras[0] * (1 + extras[1]) + (a @ b + bias)
    extras are f32 (M, <=Np) row-aligned arrays; they are zero-padded here.
    """
    M, K = a.shape
    K2, N = b.shape
    assert K == K2

    # ---- tile selection (kept small enough for v7x's 64 MiB VMEM) ----
    if K <= 1024:
        Kp = _round_up(K, 8)          # full-K block: exempt from 128-lane rule
        tk = Kp
    else:
        Kp = _round_up(K, 128)
        tk = next(t for t in (512, 384, 256, 128) if Kp % t == 0)
    Np = _round_up(N, 128)
    tn = 256 if (Np > 128 and Np % 256 == 0) else 128
    Mp = _round_up(M, 8)
    if Mp >= 256:
        tm = 256
        Mp = _round_up(Mp, 256)
    else:
        tm = Mp
    gm, gn, gk = Mp // tm, Np // tn, Kp // tk

    a_p = jnp.pad(a, ((0, Mp - M), (0, Kp - K))).astype(jnp.bfloat16)
    b_p = jnp.pad(b, ((0, Kp - K), (0, Np - N))).astype(jnp.bfloat16)
    bias_p = jnp.pad(bias, (0, Np - N)).reshape(1, Np).astype(jnp.float32)
    extra_p = tuple(
        jnp.pad(e, ((0, Mp - e.shape[0]), (0, Np - e.shape[1])))
        .astype(jnp.float32) for e in extras)

    in_specs = [
        pl.BlockSpec((tm, tk), lambda i, j, k: (i, k)),
        pl.BlockSpec((tk, tn), lambda i, j, k: (k, j)),
        pl.BlockSpec((1, tn), lambda i, j, k: (0, j)),
    ] + [pl.BlockSpec((tm, tn), lambda i, j, k: (i, j)) for _ in extra_p]

    out = pl.pallas_call(
        functools.partial(_matmul_kernel, nk=gk, act=act, mode=mode),
        grid=(gm, gn, gk),
        in_specs=in_specs,
        out_specs=pl.BlockSpec((tm, tn), lambda i, j, k: (i, j)),
        out_shape=jax.ShapeDtypeStruct((Mp, Np), jnp.float32),
        scratch_shapes=[pltpu.VMEM((tm, tn), jnp.float32)],
        compiler_params=pltpu.CompilerParams(
            dimension_semantics=("parallel", "parallel", "arbitrary")),
    )(a_p, b_p, bias_p, *extra_p)
    if keep_pad_cols:
        return out[:M, :]
    return out[:M, :N]


# --------------------------- instance norm (NHWC) ----------------------------

def _instance_norm_kernel(x_ref, o_ref, *, eps, act):
    x = x_ref[0]                                   # (H*W, C), channels on lanes
    mean = jnp.mean(x, axis=0, keepdims=True)
    xc = x - mean
    var = jnp.mean(xc * xc, axis=0, keepdims=True)  # mean-subtracted variance
    y = xc * jax.lax.rsqrt(var + eps)
    if act == "relu":
        y = jnp.maximum(y, 0.0)
    o_ref[0] = y


def instance_norm(x, act="none", eps=1e-5):
    # x: NHWC.  Matches nn.InstanceNorm2d(affine=False): per-(n,c) biased var.
    # TODO(synk): two-pass tiled statistics for images whose (H*W, C) slab
    # exceeds scoped VMEM (not hit at these shapes).
    N, H, W, C = x.shape
    x2 = x.reshape(N, H * W, C)
    y = pl.pallas_call(
        functools.partial(_instance_norm_kernel, eps=eps, act=act),
        grid=(N,),
        in_specs=[pl.BlockSpec((1, H * W, C), lambda n: (n, 0, 0))],
        out_specs=pl.BlockSpec((1, H * W, C), lambda n: (n, 0, 0)),
        out_shape=jax.ShapeDtypeStruct((N, H * W, C), x.dtype),
        compiler_params=pltpu.CompilerParams(
            dimension_semantics=("parallel",)),
    )(x2)
    return y.reshape(N, H, W, C)


# --------------------------- conv wrappers (NHWC im2col) ---------------------

def _im2col(x, kh, kw, stride=1, padding=0):
    # x: NHWC -> patches (N*OH*OW, kh*kw*C) with K ordered (kh, kw, C).
    N, H, W, C = x.shape
    if padding > 0:
        x = jnp.pad(x, ((0, 0), (padding, padding), (padding, padding), (0, 0)))
    Hp, Wp = x.shape[1], x.shape[2]
    OH = (Hp - kh) // stride + 1
    OW = (Wp - kw) // stride + 1
    cols = [x[:, i:i + stride * OH:stride, j:j + stride * OW:stride, :]
            for i in range(kh) for j in range(kw)]
    A = jnp.concatenate(cols, axis=-1).reshape(N * OH * OW, kh * kw * C)
    return A, OH, OW


def conv2d(x, w, b, stride=1, padding=0, act="none", mode="plain", extras=()):
    # x: NHWC, w: (Cout, Cin, kh, kw) (PyTorch layout), b: (Cout,)
    N = x.shape[0]
    Cout, Cin, kh, kw = w.shape
    A, OH, OW = _im2col(x, kh, kw, stride, padding)
    B = w.transpose(2, 3, 1, 0).reshape(kh * kw * Cin, Cout)
    Y = pallas_matmul(A, B, b, act=act, mode=mode, extras=extras)
    return Y.reshape(N, OH, OW, Cout)


def conv_transpose2d(x, w, b):
    # PyTorch ConvTranspose2d(k=3, stride=2, padding=1, output_padding=1),
    # rewritten as a dense 2x2 stride-1 conv producing 4*Cout channels
    # (one group per output-pixel parity class) followed by depth-to-space.
    N, H, W, _ = x.shape
    Cin, Cout, _, _ = w.shape
    t = lambda i, j: w[:, :, i, j].T                 # (Cout, Cin)
    z = jnp.zeros((Cout, Cin), w.dtype)
    taps = [
        [[t(1, 1), z], [z, z]],                      # output parity (0, 0)
        [[t(1, 2), t(1, 0)], [z, z]],                # (0, 1)
        [[t(2, 1), z], [t(0, 1), z]],                # (1, 0)
        [[t(2, 2), t(2, 0)], [t(0, 2), t(0, 0)]],    # (1, 1)
    ]
    w_sub = jnp.stack([jnp.stack([jnp.stack(r, 0) for r in cls], 0)
                       for cls in taps], 0)          # (4, 2, 2, Cout, Cin)
    w_sub = w_sub.transpose(0, 3, 4, 1, 2).reshape(4 * Cout, Cin, 2, 2)
    b_sub = jnp.tile(b, 4)
    xp = jnp.pad(x, ((0, 0), (0, 1), (0, 1), (0, 0)))       # bottom/right zeros
    y = conv2d(xp, w_sub, b_sub, stride=1, padding=0)       # (N, H, W, 4*Cout)
    y = y.reshape(N, H, W, 2, 2, Cout).transpose(0, 1, 3, 2, 4, 5)
    return y.reshape(N, 2 * H, 2 * W, Cout)


# --------------------------- self-attention ----------------------------------

def _attention_kernel(gamma_ref, q_ref, k_ref, v_ref, x_ref, o_ref,
                      m_sc, l_sc, acc_sc, *, nkv):
    kv = pl.program_id(1)

    @pl.when(kv == 0)
    def _():
        m_sc[...] = jnp.full(m_sc.shape, -jnp.inf, m_sc.dtype)
        l_sc[...] = jnp.zeros(l_sc.shape, l_sc.dtype)
        acc_sc[...] = jnp.zeros(acc_sc.shape, acc_sc.dtype)

    q = q_ref[0]                                      # (HW, C8)
    k = k_ref[0]                                      # (tkv, C8)
    v = v_ref[0]                                      # (tkv, C)
    s = jax.lax.dot_general(q, k, (((1,), (1,)), ((), ())),
                            preferred_element_type=jnp.float32)  # (HW, tkv)
    m_new = jnp.maximum(m_sc[...], jnp.max(s, axis=-1, keepdims=True))
    alpha = jnp.exp(m_sc[...] - m_new)
    p = jnp.exp(s - m_new)
    l_sc[...] = alpha * l_sc[...] + jnp.sum(p, axis=-1, keepdims=True)
    acc_sc[...] = alpha * acc_sc[...] + jnp.dot(
        p, v, preferred_element_type=jnp.float32)
    m_sc[...] = m_new

    @pl.when(kv == nkv - 1)
    def _():
        out = acc_sc[...] / l_sc[...]
        o_ref[0] = gamma_ref[0, 0] * out + x_ref[0]   # fused gamma*out + x


def self_attention(x, ap):
    # x: NHWC.  SAGAN attention with fused qkv projection and a batched
    # flash-style kernel (the (HW, HW) energy stays in VMEM).
    N, H, W, C = x.shape
    C8 = C // 8
    HW = H * W
    xf = x.reshape(N * HW, C)
    w_qkv = jnp.concatenate([ap["q"]["w"].reshape(C8, C).T,
                             ap["k"]["w"].reshape(C8, C).T,
                             ap["v"]["w"].reshape(C, C).T], axis=1)
    b_qkv = jnp.concatenate([ap["q"]["b"], ap["k"]["b"], ap["v"]["b"]])
    qkv = pallas_matmul(xf, w_qkv, b_qkv)             # (N*HW, 2*C8 + C)
    q = qkv[:, :C8].reshape(N, HW, C8)
    k = qkv[:, C8:2 * C8].reshape(N, HW, C8)
    v = qkv[:, 2 * C8:].reshape(N, HW, C)
    xr = x.reshape(N, HW, C)

    tkv = HW if HW <= 512 else next(
        t for t in (512, 256, 128, 64, 32, 16, 8) if HW % t == 0)
    nkv = HW // tkv
    # TODO(synk): also tile the q/rows axis for very large HW bottlenecks.
    out = pl.pallas_call(
        functools.partial(_attention_kernel, nkv=nkv),
        grid=(N, nkv),
        in_specs=[
            pl.BlockSpec(memory_space=pltpu.MemorySpace.SMEM),        # gamma
            pl.BlockSpec((1, HW, C8), lambda n, j: (n, 0, 0)),        # q
            pl.BlockSpec((1, tkv, C8), lambda n, j: (n, j, 0)),       # k
            pl.BlockSpec((1, tkv, C), lambda n, j: (n, j, 0)),        # v
            pl.BlockSpec((1, HW, C), lambda n, j: (n, 0, 0)),         # residual
        ],
        out_specs=pl.BlockSpec((1, HW, C), lambda n, j: (n, 0, 0)),
        out_shape=jax.ShapeDtypeStruct((N, HW, C), jnp.float32),
        scratch_shapes=[pltpu.VMEM((HW, 1), jnp.float32),
                        pltpu.VMEM((HW, 1), jnp.float32),
                        pltpu.VMEM((HW, C), jnp.float32)],
        compiler_params=pltpu.CompilerParams(
            dimension_semantics=("parallel", "arbitrary")),
    )(ap["gamma"].reshape(1, 1), q, k, v, xr)
    return out.reshape(N, H, W, C)


# --------------------------- model blocks ------------------------------------

def spade_norm(x, seg_cols, sp, act="none"):
    # x: NHWC; seg_cols: shared im2col patches of the nearest-resized segmap.
    N, H, W, C = x.shape
    M = N * H * W
    normalized = instance_norm(x).reshape(M, C)
    B_sh = sp["shared"]["w"].transpose(2, 3, 1, 0).reshape(-1, 128)
    actv = pallas_matmul(seg_cols, B_sh, sp["shared"]["b"], act="relu")  # (M,128)
    A_gb, _, _ = _im2col(actv.reshape(N, H, W, 128), 3, 3, 1, 1)
    B_g = sp["gamma"]["w"].transpose(2, 3, 1, 0).reshape(-1, C)
    B_b = sp["beta"]["w"].transpose(2, 3, 1, 0).reshape(-1, C)
    gamma = pallas_matmul(A_gb, B_g, sp["gamma"]["b"], keep_pad_cols=True)
    # beta conv with the SPADE combine (+ optional leaky) fused into its
    # epilogue: out = normalized * (1 + gamma) + beta
    out = pallas_matmul(A_gb, B_b, sp["beta"]["b"], act=act, mode="spade",
                        extras=(normalized, gamma))
    return out.reshape(N, H, W, C)


def spade_resblock(x, seg_cols, rp):
    # fin == fout -> identity shortcut; residual add fused into conv_1 epilogue.
    N, H, W, C = x.shape
    h = spade_norm(x, seg_cols, rp["norm0"], act="leaky")
    dx = conv2d(h, rp["conv0"]["w"], rp["conv0"]["b"], 1, 1)
    h = spade_norm(dx, seg_cols, rp["norm1"], act="leaky")
    return conv2d(h, rp["conv1"]["w"], rp["conv1"]["b"], 1, 1,
                  mode="residual", extras=(x.reshape(N * H * W, C),))


def spade_generator_forward(params, x, segmap):
    # Interface in NCHW (PyTorch convention); compute internally in NHWC.
    x = x.transpose(0, 2, 3, 1)
    segmap = segmap.transpose(0, 2, 3, 1)

    y = jnp.pad(x, ((0, 0), (3, 3), (3, 3), (0, 0)), mode="reflect")
    y = conv2d(y, params["initial"]["w"], params["initial"]["b"], 1, 0)
    y = instance_norm(y, act="relu")
    for dp in params["down"]:
        y = conv2d(y, dp["w"], dp["b"], stride=2, padding=1)
        y = instance_norm(y, act="relu")

    y = self_attention(y, params["attn"])

    # Nearest-resize + im2col of the segmap once; reused by every SPADE layer.
    N, H, W, _ = y.shape
    sh, sw = segmap.shape[1], segmap.shape[2]
    hi = (jnp.arange(H) * sh) // H
    wi = (jnp.arange(W) * sw) // W
    seg = segmap[:, hi][:, :, wi]
    seg_cols, _, _ = _im2col(seg, 3, 3, 1, 1)
    for rp in params["res"]:
        y = spade_resblock(y, seg_cols, rp)

    for up in params["up"]:
        y = conv_transpose2d(y, up["w"], up["b"])
        y = instance_norm(y, act="relu")

    y = jnp.pad(y, ((0, 0), (3, 3), (3, 3), (0, 0)), mode="reflect")
    y = conv2d(y, params["final"]["w"], params["final"]["b"], 1, 0,
               act="sigmoid")
    return y.transpose(0, 3, 1, 2)


# --------------------------- parameter init ----------------------------------

def init_params(key, input_nc=3, output_nc=3, ngf=8, n_downsampling=2,
                n_blocks=2, label_nc=1):
    keys = iter(jax.random.split(key, 512))

    def conv_init(cout, cin, k):
        w = jax.random.normal(next(keys), (cout, cin, k, k), jnp.float32) * 0.05
        b = jax.random.normal(next(keys), (cout,), jnp.float32) * 0.05
        return {"w": w, "b": b}

    def spade_init(norm_nc):
        return {"shared": conv_init(128, label_nc, 3),
                "gamma": conv_init(norm_nc, 128, 3),
                "beta": conv_init(norm_nc, 128, 3)}

    p = {"initial": conv_init(ngf, input_nc, 7), "down": [], "res": [], "up": []}
    for i in range(n_downsampling):
        mult = 2 ** i
        p["down"].append(conv_init(ngf * mult * 2, ngf * mult, 3))
    c_attn = ngf * 2 ** n_downsampling
    p["attn"] = {"q": conv_init(c_attn // 8, c_attn, 1),
                 "k": conv_init(c_attn // 8, c_attn, 1),
                 "v": conv_init(c_attn, c_attn, 1),
                 "gamma": jnp.zeros((1,), jnp.float32)}  # zero-init as in module
    fdim = ngf * 2 ** n_downsampling
    for _ in range(n_blocks):
        p["res"].append({"conv0": conv_init(fdim, fdim, 3),
                         "conv1": conv_init(fdim, fdim, 3),
                         "norm0": spade_init(fdim),
                         "norm1": spade_init(fdim)})
    for i in range(n_downsampling):
        mult = 2 ** (n_downsampling - i)
        # PyTorch ConvTranspose2d weight layout: (Cin, Cout, kh, kw)
        w = jax.random.normal(next(keys), (ngf * mult, ngf * mult // 2, 3, 3),
                              jnp.float32) * 0.05
        b = jax.random.normal(next(keys), (ngf * mult // 2,), jnp.float32) * 0.05
        p["up"].append({"w": w, "b": b})
    p["final"] = conv_init(output_nc, ngf, 7)
    return p


if __name__ == "__main__":
    key = jax.random.PRNGKey(0)
    kp, kx, ks = jax.random.split(key, 3)
    params = init_params(kp, input_nc=3, output_nc=3, ngf=8,
                         n_downsampling=2, n_blocks=2, label_nc=1)
    x = jax.random.normal(kx, (2, 3, 16, 16), jnp.float32)
    segmap = jax.random.normal(ks, (2, 1, 16, 16), jnp.float32)

    fwd = jax.jit(spade_generator_forward)
    out = jax.block_until_ready(fwd(params, x, segmap))
    assert out.shape == (2, 3, 16, 16), out.shape
    assert bool(jnp.all(jnp.isfinite(out)))
    print("KERNEL_OK")
</pallas_src>

<mosaic_0001>
module attributes {stable_mosaic.version = 11 : i64} {
  func.func @_matmul_kernel(%arg0: i32, %arg1: i32, %arg2: i32, %arg3: memref<256x152xbf16, #tpu.memory_space<vmem>>, %arg4: memref<152x128xbf16, #tpu.memory_space<vmem>>, %arg5: memref<1x128xf32, #tpu.memory_space<vmem>>, %arg6: memref<256x128xf32, #tpu.memory_space<vmem>>, %arg7: memref<256x128xf32, #tpu.memory_space<vmem>>) attributes {dimension_semantics = [#tpu.dimension_semantics<parallel>, #tpu.dimension_semantics<parallel>, #tpu.dimension_semantics<arbitrary>], iteration_bounds = array<i64: 2, 1, 1>, scalar_prefetch = 0 : i64, scratch_operands = 1 : i64, tpu.core_type = #tpu.core_type<tc>, window_params = [{transform_indices = @transform_0, window_bounds = array<i64: 256, 152>}, {transform_indices = @transform_1, window_bounds = array<i64: 152, 128>}, {transform_indices = @transform_2, window_bounds = array<i64: 1, 128>}, {transform_indices = @transform_3, window_bounds = array<i64: 256, 128>}]} {
    %c0_i32 = arith.constant 0 : i32
    %0 = arith.cmpi eq, %arg2, %c0_i32 : i32
    %1 = arith.extui %0 : i1 to i32
    %c0_i32_0 = arith.constant 0 : i32
    %2 = arith.cmpi ne, %1, %c0_i32_0 : i32
    scf.if %2 {
      %cst_10 = arith.constant 0.000000e+00 : f32
      %12 = vector.broadcast %cst_10 : f32 to vector<256x128xf32>
      %c0_11 = arith.constant 0 : index
      %c0_12 = arith.constant 0 : index
      %13 = vector.load %arg7[%c0_11, %c0_12] : memref<256x128xf32, #tpu.memory_space<vmem>>, vector<256x128xf32>
      tpu.vector_store %arg7[%c0_11, %c0_12], %12 {strides = array<i32>} : memref<256x128xf32, #tpu.memory_space<vmem>>, vector<256x128xf32>,
    } else {
    }
    %c0 = arith.constant 0 : index
    %c0_1 = arith.constant 0 : index
    %3 = vector.load %arg7[%c0, %c0_1] : memref<256x128xf32, #tpu.memory_space<vmem>>, vector<256x128xf32>
    %c0_2 = arith.constant 0 : index
    %c0_3 = arith.constant 0 : index
    %4 = vector.load %arg3[%c0_2, %c0_3] : memref<256x152xbf16, #tpu.memory_space<vmem>>, vector<256x152xbf16>
    %c0_4 = arith.constant 0 : index
    %c0_5 = arith.constant 0 : index
    %5 = vector.load %arg4[%c0_4, %c0_5] : memref<152x128xbf16, #tpu.memory_space<vmem>>, vector<152x128xbf16>
    %cst = arith.constant dense<0.000000e+00> : vector<256x128xf32>
    %6 = tpu.matmul %4, %5, %cst {dimension_numbers = #tpu.dot_dimension_numbers<[1], [0], [0], [1], [0, 0, 1, 1], [], []>} : vector<256x152xbf16>, vector<152x128xbf16>, vector<256x128xf32> -> vector<256x128xf32>
    %7 = arith.addf %3, %6 : vector<256x128xf32>
    %c0_6 = arith.constant 0 : index
    %c0_7 = arith.constant 0 : index
    %8 = vector.load %arg7[%c0_6, %c0_7] : memref<256x128xf32, #tpu.memory_space<vmem>>, vector<256x128xf32>
    tpu.vector_store %arg7[%c0_6, %c0_7], %7 {strides = array<i32>} : memref<256x128xf32, #tpu.memory_space<vmem>>, vector<256x128xf32>,
    %c0_i32_8 = arith.constant 0 : i32
    %9 = arith.cmpi eq, %arg2, %c0_i32_8 : i32
    %10 = arith.extui %9 : i1 to i32
    %c0_i32_9 = arith.constant 0 : i32
    %11 = arith.cmpi ne, %10, %c0_i32_9 : i32
    scf.if %11 {
      %c0_10 = arith.constant 0 : index
      %c0_11 = arith.constant 0 : index
      %12 = vector.load %arg7[%c0_10, %c0_11] : memref<256x128xf32, #tpu.memory_space<vmem>>, vector<256x128xf32>
      %c0_12 = arith.constant 0 : index
      %c0_13 = arith.constant 0 : index
      %13 = vector.load %arg5[%c0_12, %c0_13] : memref<1x128xf32, #tpu.memory_space<vmem>>, vector<1x128xf32>
      %14 = vector.broadcast %13 : vector<1x128xf32> to vector<256x128xf32>
      %15 = arith.addf %12, %14 : vector<256x128xf32>
      %c0_14 = arith.constant 0 : index
      %c0_15 = arith.constant 0 : index
      %16 = vector.load %arg6[%c0_14, %c0_15] : memref<256x128xf32, #tpu.memory_space<vmem>>, vector<256x128xf32>
      tpu.vector_store %arg6[%c0_14, %c0_15], %15 {strides = array<i32>} : memref<256x128xf32, #tpu.memory_space<vmem>>, vector<256x128xf32>,
    } else {
    }
    return
  }
  func.func @transform_0(%arg0: i32, %arg1: i32, %arg2: i32) -> (i32, i32) {
    %c0_i32 = arith.constant 0 : i32
    return %arg0, %arg2 : i32, i32
  }
  func.func @transform_1(%arg0: i32, %arg1: i32, %arg2: i32) -> (i32, i32) {
    %c0_i32 = arith.constant 0 : i32
    return %arg2, %arg1 : i32, i32
  }
  func.func @transform_2(%arg0: i32, %arg1: i32, %arg2: i32) -> (i32, i32) {
    %c0_i32 = arith.constant 0 : i32
    %c0_i32_0 = arith.constant 0 : i32
    return %c0_i32, %arg1 : i32, i32
  }
  func.func @transform_3(%arg0: i32, %arg1: i32, %arg2: i32) -> (i32, i32) {
    %c0_i32 = arith.constant 0 : i32
    return %arg0, %arg1 : i32, i32
  }
}

module attributes {stable_mosaic.version = 11 : i64} {
  func.func @_instance_norm_kernel(%arg0: i32, %arg1: memref<1x256x8xf32, #tpu.memory_space<vmem>>, %arg2: memref<1x256x8xf32, #tpu.memory_space<vmem>>) attributes {dimension_semantics = [#tpu.dimension_semantics<parallel>], iteration_bounds = array<i64: 2>, scalar_prefetch = 0 : i64, scratch_operands = 0 : i64, tpu.core_type = #tpu.core_type<tc>, window_params = [{transform_indices = @transform_0, window_bounds = array<i64: 1, 256, 8>}, {transform_indices = @transform_1, window_bounds = array<i64: 1, 256, 8>}]} {
    %c0 = arith.constant 0 : index
    %c0_0 = arith.constant 0 : index
    %c0_1 = arith.constant 0 : index
    %0 = vector.load %arg1[%c0, %c0_0, %c0_1] : memref<1x256x8xf32, #tpu.memory_space<vmem>>, vector<1x256x8xf32>
    %1 = vector.shape_cast %0 : vector<1x256x8xf32> to vector<256x8xf32>
    %cst = arith.constant dense<0.000000e+00> : vector<8xf32>
    %2 = vector.multi_reduction <add>, %1, %cst [0] : vector<256x8xf32> to vector<8xf32>
    %3 = vector.shape_cast %2 : vector<8xf32> to vector<1x8xf32>
    %cst_2 = arith.constant 2.560000e+02 : f32
    %4 = vector.broadcast %cst_2 : f32 to vector<1x8xf32>
    %5 = arith.divf %3, %4 : vector<1x8xf32>
    %6 = vector.broadcast %5 : vector<1x8xf32> to vector<256x8xf32>
    %7 = arith.subf %1, %6 : vector<256x8xf32>
    %8 = arith.mulf %7, %7 : vector<256x8xf32>
    %cst_3 = arith.constant dense<0.000000e+00> : vector<8xf32>
    %9 = vector.multi_reduction <add>, %8, %cst_3 [0] : vector<256x8xf32> to vector<8xf32>
    %10 = vector.shape_cast %9 : vector<8xf32> to vector<1x8xf32>
    %cst_4 = arith.constant 2.560000e+02 : f32
    %11 = vector.broadcast %cst_4 : f32 to vector<1x8xf32>
    %12 = arith.divf %10, %11 : vector<1x8xf32>
    %cst_5 = arith.constant 9.99999974E-6 : f32
    %13 = vector.broadcast %cst_5 : f32 to vector<1x8xf32>
    %14 = arith.addf %12, %13 : vector<1x8xf32>
    %15 = math.rsqrt %14 : vector<1x8xf32>
    %16 = vector.broadcast %15 : vector<1x8xf32> to vector<256x8xf32>
    %17 = arith.mulf %7, %16 : vector<256x8xf32>
    %cst_6 = arith.constant 0.000000e+00 : f32
    %18 = vector.broadcast %cst_6 : f32 to vector<256x8xf32>
    %19 = arith.maximumf %17, %18 : vector<256x8xf32>
    %c0_7 = arith.constant 0 : index
    %c0_8 = arith.constant 0 : index
    %c0_9 = arith.constant 0 : index
    %20 = vector.load %arg2[%c0_7, %c0_8, %c0_9] : memref<1x256x8xf32, #tpu.memory_space<vmem>>, vector<1x256x8xf32>
    %21 = vector.shape_cast %20 : vector<1x256x8xf32> to vector<256x8xf32>
    %22 = vector.shape_cast %19 : vector<256x8xf32> to vector<1x256x8xf32>
    tpu.vector_store %arg2[%c0_7, %c0_8, %c0_9], %22 {strides = array<i32>} : memref<1x256x8xf32, #tpu.memory_space<vmem>>, vector<1x256x8xf32>,
    return
  }
  func.func @transform_0(%arg0: i32) -> (i32, i32, i32) {
    %c0_i32 = arith.constant 0 : i32
    %c0_i32_0 = arith.constant 0 : i32
    %c0_i32_1 = arith.constant 0 : i32
    return %arg0, %c0_i32, %c0_i32_0 : i32, i32, i32
  }
  func.func @transform_1(%arg0: i32) -> (i32, i32, i32) {
    %c0_i32 = arith.constant 0 : i32
    %c0_i32_0 = arith.constant 0 : i32
    %c0_i32_1 = arith.constant 0 : i32
    return %arg0, %c0_i32, %c0_i32_0 : i32, i32, i32
  }
}

module attributes {stable_mosaic.version = 11 : i64} {
  func.func @_instance_norm_kernel(%arg0: i32, %arg1: memref<1x64x16xf32, #tpu.memory_space<vmem>>, %arg2: memref<1x64x16xf32, #tpu.memory_space<vmem>>) attributes {dimension_semantics = [#tpu.dimension_semantics<parallel>], iteration_bounds = array<i64: 2>, scalar_prefetch = 0 : i64, scratch_operands = 0 : i64, tpu.core_type = #tpu.core_type<tc>, window_params = [{transform_indices = @transform_0, window_bounds = array<i64: 1, 64, 16>}, {transform_indices = @transform_1, window_bounds = array<i64: 1, 64, 16>}]} {
    %c0 = arith.constant 0 : index
    %c0_0 = arith.constant 0 : index
    %c0_1 = arith.constant 0 : index
    %0 = vector.load %arg1[%c0, %c0_0, %c0_1] : memref<1x64x16xf32, #tpu.memory_space<vmem>>, vector<1x64x16xf32>
    %1 = vector.shape_cast %0 : vector<1x64x16xf32> to vector<64x16xf32>
    %cst = arith.constant dense<0.000000e+00> : vector<16xf32>
    %2 = vector.multi_reduction <add>, %1, %cst [0] : vector<64x16xf32> to vector<16xf32>
    %3 = vector.shape_cast %2 : vector<16xf32> to vector<1x16xf32>
    %cst_2 = arith.constant 6.400000e+01 : f32
    %4 = vector.broadcast %cst_2 : f32 to vector<1x16xf32>
    %5 = arith.divf %3, %4 : vector<1x16xf32>
    %6 = vector.broadcast %5 : vector<1x16xf32> to vector<64x16xf32>
    %7 = arith.subf %1, %6 : vector<64x16xf32>
    %8 = arith.mulf %7, %7 : vector<64x16xf32>
    %cst_3 = arith.constant dense<0.000000e+00> : vector<16xf32>
    %9 = vector.multi_reduction <add>, %8, %cst_3 [0] : vector<64x16xf32> to vector<16xf32>
    %10 = vector.shape_cast %9 : vector<16xf32> to vector<1x16xf32>
    %cst_4 = arith.constant 6.400000e+01 : f32
    %11 = vector.broadcast %cst_4 : f32 to vector<1x16xf32>
    %12 = arith.divf %10, %11 : vector<1x16xf32>
    %cst_5 = arith.constant 9.99999974E-6 : f32
    %13 = vector.broadcast %cst_5 : f32 to vector<1x16xf32>
    %14 = arith.addf %12, %13 : vector<1x16xf32>
    %15 = math.rsqrt %14 : vector<1x16xf32>
    %16 = vector.broadcast %15 : vector<1x16xf32> to vector<64x16xf32>
    %17 = arith.mulf %7, %16 : vector<64x16xf32>
    %cst_6 = arith.constant 0.000000e+00 : f32
    %18 = vector.broadcast %cst_6 : f32 to vector<64x16xf32>
    %19 = arith.maximumf %17, %18 : vector<64x16xf32>
    %c0_7 = arith.constant 0 : index
    %c0_8 = arith.constant 0 : index
    %c0_9 = arith.constant 0 : index
    %20 = vector.load %arg2[%c0_7, %c0_8, %c0_9] : memref<1x64x16xf32, #tpu.memory_space<vmem>>, vector<1x64x16xf32>
    %21 = vector.shape_cast %20 : vector<1x64x16xf32> to vector<64x16xf32>
    %22 = vector.shape_cast %19 : vector<64x16xf32> to vector<1x64x16xf32>
    tpu.vector_store %arg2[%c0_7, %c0_8, %c0_9], %22 {strides = array<i32>} : memref<1x64x16xf32, #tpu.memory_space<vmem>>, vector<1x64x16xf32>,
    return
  }
  func.func @transform_0(%arg0: i32) -> (i32, i32, i32) {
    %c0_i32 = arith.constant 0 : i32
    %c0_i32_0 = arith.constant 0 : i32
    %c0_i32_1 = arith.constant 0 : i32
    return %arg0, %c0_i32, %c0_i32_0 : i32, i32, i32
  }
  func.func @transform_1(%arg0: i32) -> (i32, i32, i32) {
    %c0_i32 = arith.constant 0 : i32
    %c0_i32_0 = arith.constant 0 : i32
    %c0_i32_1 = arith.constant 0 : i32
    return %arg0, %c0_i32, %c0_i32_0 : i32, i32, i32
  }
}

module attributes {stable_mosaic.version = 11 : i64} {
  func.func @_matmul_kernel(%arg0: i32, %arg1: i32, %arg2: i32, %arg3: memref<128x72xbf16, #tpu.memory_space<vmem>>, %arg4: memref<72x128xbf16, #tpu.memory_space<vmem>>, %arg5: memref<1x128xf32, #tpu.memory_space<vmem>>, %arg6: memref<128x128xf32, #tpu.memory_space<vmem>>, %arg7: memref<128x128xf32, #tpu.memory_space<vmem>>) attributes {dimension_semantics = [#tpu.dimension_semantics<parallel>, #tpu.dimension_semantics<parallel>, #tpu.dimension_semantics<arbitrary>], iteration_bounds = array<i64: 1, 1, 1>, scalar_prefetch = 0 : i64, scratch_operands = 1 : i64, tpu.core_type = #tpu.core_type<tc>, window_params = [{transform_indices = @transform_0, window_bounds = array<i64: 128, 72>}, {transform_indices = @transform_1, window_bounds = array<i64: 72, 128>}, {transform_indices = @transform_2, window_bounds = array<i64: 1, 128>}, {transform_indices = @transform_3, window_bounds = array<i64: 128, 128>}]} {
    %c0_i32 = arith.constant 0 : i32
    %0 = arith.cmpi eq, %arg2, %c0_i32 : i32
    %1 = arith.extui %0 : i1 to i32
    %c0_i32_0 = arith.constant 0 : i32
    %2 = arith.cmpi ne, %1, %c0_i32_0 : i32
    scf.if %2 {
      %cst_10 = arith.constant 0.000000e+00 : f32
      %12 = vector.broadcast %cst_10 : f32 to vector<128x128xf32>
      %c0_11 = arith.constant 0 : index
      %c0_12 = arith.constant 0 : index
      %13 = vector.load %arg7[%c0_11, %c0_12] : memref<128x128xf32, #tpu.memory_space<vmem>>, vector<128x128xf32>
      tpu.vector_store %arg7[%c0_11, %c0_12], %12 {strides = array<i32>} : memref<128x128xf32, #tpu.memory_space<vmem>>, vector<128x128xf32>,
    } else {
    }
    %c0 = arith.constant 0 : index
    %c0_1 = arith.constant 0 : index
    %3 = vector.load %arg7[%c0, %c0_1] : memref<128x128xf32, #tpu.memory_space<vmem>>, vector<128x128xf32>
    %c0_2 = arith.constant 0 : index
    %c0_3 = arith.constant 0 : index
    %4 = vector.load %arg3[%c0_2, %c0_3] : memref<128x72xbf16, #tpu.memory_space<vmem>>, vector<128x72xbf16>
    %c0_4 = arith.constant 0 : index
    %c0_5 = arith.constant 0 : index
    %5 = vector.load %arg4[%c0_4, %c0_5] : memref<72x128xbf16, #tpu.memory_space<vmem>>, vector<72x128xbf16>
    %cst = arith.constant dense<0.000000e+00> : vector<128x128xf32>
    %6 = tpu.matmul %4, %5, %cst {dimension_numbers = #tpu.dot_dimension_numbers<[1], [0], [0], [1], [0, 0, 1, 1], [], []>} : vector<128x72xbf16>, vector<72x128xbf16>, vector<128x128xf32> -> vector<128x128xf32>
    %7 = arith.addf %3, %6 : vector<128x128xf32>
    %c0_6 = arith.constant 0 : index
    %c0_7 = arith.constant 0 : index
    %8 = vector.load %arg7[%c0_6, %c0_7] : memref<128x128xf32, #tpu.memory_space<vmem>>, vector<128x128xf32>
    tpu.vector_store %arg7[%c0_6, %c0_7], %7 {strides = array<i32>} : memref<128x128xf32, #tpu.memory_space<vmem>>, vector<128x128xf32>,
    %c0_i32_8 = arith.constant 0 : i32
    %9 = arith.cmpi eq, %arg2, %c0_i32_8 : i32
    %10 = arith.extui %9 : i1 to i32
    %c0_i32_9 = arith.constant 0 : i32
    %11 = arith.cmpi ne, %10, %c0_i32_9 : i32
    scf.if %11 {
      %c0_10 = arith.constant 0 : index
      %c0_11 = arith.constant 0 : index
      %12 = vector.load %arg7[%c0_10, %c0_11] : memref<128x128xf32, #tpu.memory_space<vmem>>, vector<128x128xf32>
      %c0_12 = arith.constant 0 : index
      %c0_13 = arith.constant 0 : index
      %13 = vector.load %arg5[%c0_12, %c0_13] : memref<1x128xf32, #tpu.memory_space<vmem>>, vector<1x128xf32>
      %14 = vector.broadcast %13 : vector<1x128xf32> to vector<128x128xf32>
      %15 = arith.addf %12, %14 : vector<128x128xf32>
      %c0_14 = arith.constant 0 : index
      %c0_15 = arith.constant 0 : index
      %16 = vector.load %arg6[%c0_14, %c0_15] : memref<128x128xf32, #tpu.memory_space<vmem>>, vector<128x128xf32>
      tpu.vector_store %arg6[%c0_14, %c0_15], %15 {strides = array<i32>} : memref<128x128xf32, #tpu.memory_space<vmem>>, vector<128x128xf32>,
    } else {
    }
    return
  }
  func.func @transform_0(%arg0: i32, %arg1: i32, %arg2: i32) -> (i32, i32) {
    %c0_i32 = arith.constant 0 : i32
    return %arg0, %arg2 : i32, i32
  }
  func.func @transform_1(%arg0: i32, %arg1: i32, %arg2: i32) -> (i32, i32) {
    %c0_i32 = arith.constant 0 : i32
    return %arg2, %arg1 : i32, i32
  }
  func.func @transform_2(%arg0: i32, %arg1: i32, %arg2: i32) -> (i32, i32) {
    %c0_i32 = arith.constant 0 : i32
    %c0_i32_0 = arith.constant 0 : i32
    return %c0_i32, %arg1 : i32, i32
  }
  func.func @transform_3(%arg0: i32, %arg1: i32, %arg2: i32) -> (i32, i32) {
    %c0_i32 = arith.constant 0 : i32
    return %arg0, %arg1 : i32, i32
  }
}

module attributes {stable_mosaic.version = 11 : i64} {
  func.func @_matmul_kernel(%arg0: i32, %arg1: i32, %arg2: i32, %arg3: memref<32x144xbf16, #tpu.memory_space<vmem>>, %arg4: memref<144x128xbf16, #tpu.memory_space<vmem>>, %arg5: memref<1x128xf32, #tpu.memory_space<vmem>>, %arg6: memref<32x128xf32, #tpu.memory_space<vmem>>, %arg7: memref<32x128xf32, #tpu.memory_space<vmem>>) attributes {dimension_semantics = [#tpu.dimension_semantics<parallel>, #tpu.dimension_semantics<parallel>, #tpu.dimension_semantics<arbitrary>], iteration_bounds = array<i64: 1, 1, 1>, scalar_prefetch = 0 : i64, scratch_operands = 1 : i64, tpu.core_type = #tpu.core_type<tc>, window_params = [{transform_indices = @transform_0, window_bounds = array<i64: 32, 144>}, {transform_indices = @transform_1, window_bounds = array<i64: 144, 128>}, {transform_indices = @transform_2, window_bounds = array<i64: 1, 128>}, {transform_indices = @transform_3, window_bounds = array<i64: 32, 128>}]} {
    %c0_i32 = arith.constant 0 : i32
    %0 = arith.cmpi eq, %arg2, %c0_i32 : i32
    %1 = arith.extui %0 : i1 to i32
    %c0_i32_0 = arith.constant 0 : i32
    %2 = arith.cmpi ne, %1, %c0_i32_0 : i32
    scf.if %2 {
      %cst_10 = arith.constant 0.000000e+00 : f32
      %12 = vector.broadcast %cst_10 : f32 to vector<32x128xf32>
      %c0_11 = arith.constant 0 : index
      %c0_12 = arith.constant 0 : index
      %13 = vector.load %arg7[%c0_11, %c0_12] : memref<32x128xf32, #tpu.memory_space<vmem>>, vector<32x128xf32>
      tpu.vector_store %arg7[%c0_11, %c0_12], %12 {strides = array<i32>} : memref<32x128xf32, #tpu.memory_space<vmem>>, vector<32x128xf32>,
    } else {
    }
    %c0 = arith.constant 0 : index
    %c0_1 = arith.constant 0 : index
    %3 = vector.load %arg7[%c0, %c0_1] : memref<32x128xf32, #tpu.memory_space<vmem>>, vector<32x128xf32>
    %c0_2 = arith.constant 0 : index
    %c0_3 = arith.constant 0 : index
    %4 = vector.load %arg3[%c0_2, %c0_3] : memref<32x144xbf16, #tpu.memory_space<vmem>>, vector<32x144xbf16>
    %c0_4 = arith.constant 0 : index
    %c0_5 = arith.constant 0 : index
    %5 = vector.load %arg4[%c0_4, %c0_5] : memref<144x128xbf16, #tpu.memory_space<vmem>>, vector<144x128xbf16>
    %cst = arith.constant dense<0.000000e+00> : vector<32x128xf32>
    %6 = tpu.matmul %4, %5, %cst {dimension_numbers = #tpu.dot_dimension_numbers<[1], [0], [0], [1], [0, 0, 1, 1], [], []>} : vector<32x144xbf16>, vector<144x128xbf16>, vector<32x128xf32> -> vector<32x128xf32>
    %7 = arith.addf %3, %6 : vector<32x128xf32>
    %c0_6 = arith.constant 0 : index
    %c0_7 = arith.constant 0 : index
    %8 = vector.load %arg7[%c0_6, %c0_7] : memref<32x128xf32, #tpu.memory_space<vmem>>, vector<32x128xf32>
    tpu.vector_store %arg7[%c0_6, %c0_7], %7 {strides = array<i32>} : memref<32x128xf32, #tpu.memory_space<vmem>>, vector<32x128xf32>,
    %c0_i32_8 = arith.constant 0 : i32
    %9 = arith.cmpi eq, %arg2, %c0_i32_8 : i32
    %10 = arith.extui %9 : i1 to i32
    %c0_i32_9 = arith.constant 0 : i32
    %11 = arith.cmpi ne, %10, %c0_i32_9 : i32
    scf.if %11 {
      %c0_10 = arith.constant 0 : index
      %c0_11 = arith.constant 0 : index
      %12 = vector.load %arg7[%c0_10, %c0_11] : memref<32x128xf32, #tpu.memory_space<vmem>>, vector<32x128xf32>
      %c0_12 = arith.constant 0 : index
      %c0_13 = arith.constant 0 : index
      %13 = vector.load %arg5[%c0_12, %c0_13] : memref<1x128xf32, #tpu.memory_space<vmem>>, vector<1x128xf32>
      %14 = vector.broadcast %13 : vector<1x128xf32> to vector<32x128xf32>
      %15 = arith.addf %12, %14 : vector<32x128xf32>
      %c0_14 = arith.constant 0 : index
      %c0_15 = arith.constant 0 : index
      %16 = vector.load %arg6[%c0_14, %c0_15] : memref<32x128xf32, #tpu.memory_space<vmem>>, vector<32x128xf32>
      tpu.vector_store %arg6[%c0_14, %c0_15], %15 {strides = array<i32>} : memref<32x128xf32, #tpu.memory_space<vmem>>, vector<32x128xf32>,
    } else {
    }
    return
  }
  func.func @transform_0(%arg0: i32, %arg1: i32, %arg2: i32) -> (i32, i32) {
    %c0_i32 = arith.constant 0 : i32
    return %arg0, %arg2 : i32, i32
  }
  func.func @transform_1(%arg0: i32, %arg1: i32, %arg2: i32) -> (i32, i32) {
    %c0_i32 = arith.constant 0 : i32
    return %arg2, %arg1 : i32, i32
  }
  func.func @transform_2(%arg0: i32, %arg1: i32, %arg2: i32) -> (i32, i32) {
    %c0_i32 = arith.constant 0 : i32
    %c0_i32_0 = arith.constant 0 : i32
    return %c0_i32, %arg1 : i32, i32
  }
  func.func @transform_3(%arg0: i32, %arg1: i32, %arg2: i32) -> (i32, i32) {
    %c0_i32 = arith.constant 0 : i32
    return %arg0, %arg1 : i32, i32
  }
}

module attributes {stable_mosaic.version = 11 : i64} {
  func.func @_instance_norm_kernel(%arg0: i32, %arg1: memref<1x16x32xf32, #tpu.memory_space<vmem>>, %arg2: memref<1x16x32xf32, #tpu.memory_space<vmem>>) attributes {dimension_semantics = [#tpu.dimension_semantics<parallel>], iteration_bounds = array<i64: 2>, scalar_prefetch = 0 : i64, scratch_operands = 0 : i64, tpu.core_type = #tpu.core_type<tc>, window_params = [{transform_indices = @transform_0, window_bounds = array<i64: 1, 16, 32>}, {transform_indices = @transform_1, window_bounds = array<i64: 1, 16, 32>}]} {
    %c0 = arith.constant 0 : index
    %c0_0 = arith.constant 0 : index
    %c0_1 = arith.constant 0 : index
    %0 = vector.load %arg1[%c0, %c0_0, %c0_1] : memref<1x16x32xf32, #tpu.memory_space<vmem>>, vector<1x16x32xf32>
    %1 = vector.shape_cast %0 : vector<1x16x32xf32> to vector<16x32xf32>
    %cst = arith.constant dense<0.000000e+00> : vector<32xf32>
    %2 = vector.multi_reduction <add>, %1, %cst [0] : vector<16x32xf32> to vector<32xf32>
    %3 = vector.shape_cast %2 : vector<32xf32> to vector<1x32xf32>
    %cst_2 = arith.constant 1.600000e+01 : f32
    %4 = vector.broadcast %cst_2 : f32 to vector<1x32xf32>
    %5 = arith.divf %3, %4 : vector<1x32xf32>
    %6 = vector.broadcast %5 : vector<1x32xf32> to vector<16x32xf32>
    %7 = arith.subf %1, %6 : vector<16x32xf32>
    %8 = arith.mulf %7, %7 : vector<16x32xf32>
    %cst_3 = arith.constant dense<0.000000e+00> : vector<32xf32>
    %9 = vector.multi_reduction <add>, %8, %cst_3 [0] : vector<16x32xf32> to vector<32xf32>
    %10 = vector.shape_cast %9 : vector<32xf32> to vector<1x32xf32>
    %cst_4 = arith.constant 1.600000e+01 : f32
    %11 = vector.broadcast %cst_4 : f32 to vector<1x32xf32>
    %12 = arith.divf %10, %11 : vector<1x32xf32>
    %cst_5 = arith.constant 9.99999974E-6 : f32
    %13 = vector.broadcast %cst_5 : f32 to vector<1x32xf32>
    %14 = arith.addf %12, %13 : vector<1x32xf32>
    %15 = math.rsqrt %14 : vector<1x32xf32>
    %16 = vector.broadcast %15 : vector<1x32xf32> to vector<16x32xf32>
    %17 = arith.mulf %7, %16 : vector<16x32xf32>
    %cst_6 = arith.constant 0.000000e+00 : f32
    %18 = vector.broadcast %cst_6 : f32 to vector<16x32xf32>
    %19 = arith.maximumf %17, %18 : vector<16x32xf32>
    %c0_7 = arith.constant 0 : index
    %c0_8 = arith.constant 0 : index
    %c0_9 = arith.constant 0 : index
    %20 = vector.load %arg2[%c0_7, %c0_8, %c0_9] : memref<1x16x32xf32, #tpu.memory_space<vmem>>, vector<1x16x32xf32>
    %21 = vector.shape_cast %20 : vector<1x16x32xf32> to vector<16x32xf32>
    %22 = vector.shape_cast %19 : vector<16x32xf32> to vector<1x16x32xf32>
    tpu.vector_store %arg2[%c0_7, %c0_8, %c0_9], %22 {strides = array<i32>} : memref<1x16x32xf32, #tpu.memory_space<vmem>>, vector<1x16x32xf32>,
    return
  }
  func.func @transform_0(%arg0: i32) -> (i32, i32, i32) {
    %c0_i32 = arith.constant 0 : i32
    %c0_i32_0 = arith.constant 0 : i32
    %c0_i32_1 = arith.constant 0 : i32
    return %arg0, %c0_i32, %c0_i32_0 : i32, i32, i32
  }
  func.func @transform_1(%arg0: i32) -> (i32, i32, i32) {
    %c0_i32 = arith.constant 0 : i32
    %c0_i32_0 = arith.constant 0 : i32
    %c0_i32_1 = arith.constant 0 : i32
    return %arg0, %c0_i32, %c0_i32_0 : i32, i32, i32
  }
}

module attributes {stable_mosaic.version = 11 : i64} {
  func.func @_attention_kernel(%arg0: i32, %arg1: i32, %arg2: memref<1x1xf32, #tpu.memory_space<smem>>, %arg3: memref<1x16x4xf32, #tpu.memory_space<vmem>>, %arg4: memref<1x16x4xf32, #tpu.memory_space<vmem>>, %arg5: memref<1x16x32xf32, #tpu.memory_space<vmem>>, %arg6: memref<1x16x32xf32, #tpu.memory_space<vmem>>, %arg7: memref<1x16x32xf32, #tpu.memory_space<vmem>>, %arg8: memref<16x1xf32, #tpu.memory_space<vmem>>, %arg9: memref<16x1xf32, #tpu.memory_space<vmem>>, %arg10: memref<16x32xf32, #tpu.memory_space<vmem>>) attributes {dimension_semantics = [#tpu.dimension_semantics<parallel>, #tpu.dimension_semantics<arbitrary>], iteration_bounds = array<i64: 2, 1>, scalar_prefetch = 0 : i64, scratch_operands = 3 : i64, tpu.core_type = #tpu.core_type<tc>, window_params = [{transform_indices = @transform_0, window_bounds = array<i64: 1, 1>}, {transform_indices = @transform_1, window_bounds = array<i64: 1, 16, 4>}, {transform_indices = @transform_2, window_bounds = array<i64: 1, 16, 4>}, {transform_indices = @transform_3, window_bounds = array<i64: 1, 16, 32>}, {transform_indices = @transform_4, window_bounds = array<i64: 1, 16, 32>}, {transform_indices = @transform_5, window_bounds = array<i64: 1, 16, 32>}]} {
    %c0_i32 = arith.constant 0 : i32
    %0 = arith.cmpi eq, %arg1, %c0_i32 : i32
    %1 = arith.extui %0 : i1 to i32
    %c0_i32_0 = arith.constant 0 : i32
    %2 = arith.cmpi ne, %1, %c0_i32_0 : i32
    scf.if %2 {
      %cst_28 = arith.constant 0xFF800000 : f32
      %36 = vector.broadcast %cst_28 : f32 to vector<16x1xf32>
      %c0_29 = arith.constant 0 : index
      %c0_30 = arith.constant 0 : index
      %37 = vector.load %arg8[%c0_29, %c0_30] : memref<16x1xf32, #tpu.memory_space<vmem>>, vector<16x1xf32>
      tpu.vector_store %arg8[%c0_29, %c0_30], %36 {strides = array<i32>} : memref<16x1xf32, #tpu.memory_space<vmem>>, vector<16x1xf32>,
      %cst_31 = arith.constant 0.000000e+00 : f32
      %38 = vector.broadcast %cst_31 : f32 to vector<16x1xf32>
      %c0_32 = arith.constant 0 : index
      %c0_33 = arith.constant 0 : index
      %39 = vector.load %arg9[%c0_32, %c0_33] : memref<16x1xf32, #tpu.memory_space<vmem>>, vector<16x1xf32>
      tpu.vector_store %arg9[%c0_32, %c0_33], %38 {strides = array<i32>} : memref<16x1xf32, #tpu.memory_space<vmem>>, vector<16x1xf32>,
      %cst_34 = arith.constant 0.000000e+00 : f32
      %40 = vector.broadcast %cst_34 : f32 to vector<16x32xf32>
      %c0_35 = arith.constant 0 : index
      %c0_36 = arith.constant 0 : index
      %41 = vector.load %arg10[%c0_35, %c0_36] : memref<16x32xf32, #tpu.memory_space<vmem>>, vector<16x32xf32>
      tpu.vector_store %arg10[%c0_35, %c0_36], %40 {strides = array<i32>} : memref<16x32xf32, #tpu.memory_space<vmem>>, vector<16x32xf32>,
    } else {
    }
    %c0 = arith.constant 0 : index
    %c0_1 = arith.constant 0 : index
    %c0_2 = arith.constant 0 : index
    %3 = vector.load %arg3[%c0, %c0_1, %c0_2] : memref<1x16x4xf32, #tpu.memory_space<vmem>>, vector<1x16x4xf32>
    %4 = vector.shape_cast %3 : vector<1x16x4xf32> to vector<16x4xf32>
    %c0_3 = arith.constant 0 : index
    %c0_4 = arith.constant 0 : index
    %c0_5 = arith.constant 0 : index
    %5 = vector.load %arg4[%c0_3, %c0_4, %c0_5] : memref<1x16x4xf32, #tpu.memory_space<vmem>>, vector<1x16x4xf32>
    %6 = vector.shape_cast %5 : vector<1x16x4xf32> to vector<16x4xf32>
    %c0_6 = arith.constant 0 : index
    %c0_7 = arith.constant 0 : index
    %c0_8 = arith.constant 0 : index
    %7 = vector.load %arg5[%c0_6, %c0_7, %c0_8] : memref<1x16x32xf32, #tpu.memory_space<vmem>>, vector<1x16x32xf32>
    %8 = vector.shape_cast %7 : vector<1x16x32xf32> to vector<16x32xf32>
    %cst = arith.constant dense<0.000000e+00> : vector<16x16xf32>
    %9 = tpu.matmul %4, %6, %cst {dimension_numbers = #tpu.dot_dimension_numbers<[1], [1], [0], [0], [0, 0, 1, 0], [], []>} : vector<16x4xf32>, vector<16x4xf32>, vector<16x16xf32> -> vector<16x16xf32>
    %c0_9 = arith.constant 0 : index
    %c0_10 = arith.constant 0 : index
    %10 = vector.load %arg8[%c0_9, %c0_10] : memref<16x1xf32, #tpu.memory_space<vmem>>, vector<16x1xf32>
    %cst_11 = arith.constant dense<0xFF800000> : vector<16xf32>
    %11 = vector.multi_reduction <maximumf>, %9, %cst_11 [1] : vector<16x16xf32> to vector<16xf32>
    %12 = vector.shape_cast %11 : vector<16xf32> to vector<16x1xf32>
    %13 = arith.maximumf %10, %12 : vector<16x1xf32>
    %c0_12 = arith.constant 0 : index
    %c0_13 = arith.constant 0 : index
    %14 = vector.load %arg8[%c0_12, %c0_13] : memref<16x1xf32, #tpu.memory_space<vmem>>, vector<16x1xf32>
    %15 = arith.subf %14, %13 : vector<16x1xf32>
    %16 = math.exp %15 : vector<16x1xf32>
    %17 = vector.broadcast %13 : vector<16x1xf32> to vector<16x16xf32>
    %18 = arith.subf %9, %17 : vector<16x16xf32>
    %19 = math.exp %18 : vector<16x16xf32>
    %c0_14 = arith.constant 0 : index
    %c0_15 = arith.constant 0 : index
    %20 = vector.load %arg9[%c0_14, %c0_15] : memref<16x1xf32, #tpu.memory_space<vmem>>, vector<16x1xf32>
    %21 = arith.mulf %16, %20 : vector<16x1xf32>
    %cst_16 = arith.constant dense<0.000000e+00> : vector<16xf32>
    %22 = vector.multi_reduction <add>, %19, %cst_16 [1] : vector<16x16xf32> to vector<16xf32>
    %23 = vector.shape_cast %22 : vector<16xf32> to vector<16x1xf32>
    %24 = arith.addf %21, %23 : vector<16x1xf32>
    %c0_17 = arith.constant 0 : index
    %c0_18 = arith.constant 0 : index
    %25 = vector.load %arg9[%c0_17, %c0_18] : memref<16x1xf32, #tpu.memory_space<vmem>>, vector<16x1xf32>
    tpu.vector_store %arg9[%c0_17, %c0_18], %24 {strides = array<i32>} : memref<16x1xf32, #tpu.memory_space<vmem>>, vector<16x1xf32>,
    %c0_19 = arith.constant 0 : index
    %c0_20 = arith.constant 0 : index
    %26 = vector.load %arg10[%c0_19, %c0_20] : memref<16x32xf32, #tpu.memory_space<vmem>>, vector<16x32xf32>
    %27 = vector.broadcast %16 : vector<16x1xf32> to vector<16x32xf32>
    %28 = arith.mulf %27, %26 : vector<16x32xf32>
    %cst_21 = arith.constant dense<0.000000e+00> : vector<16x32xf32>
    %29 = tpu.matmul %19, %8, %cst_21 {dimension_numbers = #tpu.dot_dimension_numbers<[1], [0], [0], [1], [0, 0, 1, 1], [], []>} : vector<16x16xf32>, vector<16x32xf32>, vector<16x32xf32> -> vector<16x32xf32>
    %30 = arith.addf %28, %29 : vector<16x32xf32>
    %c0_22 = arith.constant 0 : index
    %c0_23 = arith.constant 0 : index
    %31 = vector.load %arg10[%c0_22, %c0_23] : memref<16x32xf32, #tpu.memory_space<vmem>>, vector<16x32xf32>
    tpu.vector_store %arg10[%c0_22, %c0_23], %30 {strides = array<i32>} : memref<16x32xf32, #tpu.memory_space<vmem>>, vector<16x32xf32>,
    %c0_24 = arith.constant 0 : index
    %c0_25 = arith.constant 0 : index
    %32 = vector.load %arg8[%c0_24, %c0_25] : memref<16x1xf32, #tpu.memory_space<vmem>>, vector<16x1xf32>
    tpu.vector_store %arg8[%c0_24, %c0_25], %13 {strides = array<i32>} : memref<16x1xf32, #tpu.memory_space<vmem>>, vector<16x1xf32>,
    %c0_i32_26 = arith.constant 0 : i32
    %33 = arith.cmpi eq, %arg1, %c0_i32_26 : i32
    %34 = arith.extui %33 : i1 to i32
    %c0_i32_27 = arith.constant 0 : i32
    %35 = arith.cmpi ne, %34, %c0_i32_27 : i32
    scf.if %35 {
      %c0_28 = arith.constant 0 : index
      %c0_29 = arith.constant 0 : index
      %36 = vector.load %arg10[%c0_28, %c0_29] : memref<16x32xf32, #tpu.memory_space<vmem>>, vector<16x32xf32>
      %c0_30 = arith.constant 0 : index
      %c0_31 = arith.constant 0 : index
      %37 = vector.load %arg9[%c0_30, %c0_31] : memref<16x1xf32, #tpu.memory_space<vmem>>, vector<16x1xf32>
      %38 = vector.broadcast %37 : vector<16x1xf32> to vector<16x32xf32>
      %39 = arith.divf %36, %38 : vector<16x32xf32>
      %c0_32 = arith.constant 0 : index
      %c0_33 = arith.constant 0 : index
      %40 = memref.load %arg2[%c0_32, %c0_33] : memref<1x1xf32, #tpu.memory_space<smem>>
      %41 = vector.broadcast %40 : f32 to vector<16x32xf32>
      %42 = arith.mulf %41, %39 : vector<16x32xf32>
      %c0_34 = arith.constant 0 : index
      %c0_35 = arith.constant 0 : index
      %c0_36 = arith.constant 0 : index
      %43 = vector.load %arg6[%c0_34, %c0_35, %c0_36] : memref<1x16x32xf32, #tpu.memory_space<vmem>>, vector<1x16x32xf32>
      %44 = vector.shape_cast %43 : vector<1x16x32xf32> to vector<16x32xf32>
      %45 = arith.addf %42, %44 : vector<16x32xf32>
      %c0_37 = arith.constant 0 : index
      %c0_38 = arith.constant 0 : index
      %c0_39 = arith.constant 0 : index
      %46 = vector.load %arg7[%c0_37, %c0_38, %c0_39] : memref<1x16x32xf32, #tpu.memory_space<vmem>>, vector<1x16x32xf32>
      %47 = vector.shape_cast %46 : vector<1x16x32xf32> to vector<16x32xf32>
      %48 = vector.shape_cast %45 : vector<16x32xf32> to vector<1x16x32xf32>
      tpu.vector_store %arg7[%c0_37, %c0_38, %c0_39], %48 {strides = array<i32>} : memref<1x16x32xf32, #tpu.memory_space<vmem>>, vector<1x16x32xf32>,
    } else {
    }
    return
  }
  func.func @transform_0(%arg0: i32, %arg1: i32) -> (i32, i32) {
    %c0_i32 = arith.constant 0 : i32
    %c0_i32_0 = arith.constant 0 : i32
    %c0_i32_1 = arith.constant 0 : i32
    return %c0_i32, %c0_i32_0 : i32, i32
  }
  func.func @transform_1(%arg0: i32, %arg1: i32) -> (i32, i32, i32) {
    %c0_i32 = arith.constant 0 : i32
    %c0_i32_0 = arith.constant 0 : i32
    %c0_i32_1 = arith.constant 0 : i32
    return %arg0, %c0_i32, %c0_i32_0 : i32, i32, i32
  }
  func.func @transform_2(%arg0: i32, %arg1: i32) -> (i32, i32, i32) {
    %c0_i32 = arith.constant 0 : i32
    %c0_i32_0 = arith.constant 0 : i32
    return %arg0, %arg1, %c0_i32 : i32, i32, i32
  }
  func.func @transform_3(%arg0: i32, %arg1: i32) -> (i32, i32, i32) {
    %c0_i32 = arith.constant 0 : i32
    %c0_i32_0 = arith.constant 0 : i32
    return %arg0, %arg1, %c0_i32 : i32, i32, i32
  }
  func.func @transform_4(%arg0: i32, %arg1: i32) -> (i32, i32, i32) {
    %c0_i32 = arith.constant 0 : i32
    %c0_i32_0 = arith.constant 0 : i32
    %c0_i32_1 = arith.constant 0 : i32
    return %arg0, %c0_i32, %c0_i32_0 : i32, i32, i32
  }
  func.func @transform_5(%arg0: i32, %arg1: i32) -> (i32, i32, i32) {
    %c0_i32 = arith.constant 0 : i32
    %c0_i32_0 = arith.constant 0 : i32
    %c0_i32_1 = arith.constant 0 : i32
    return %arg0, %c0_i32, %c0_i32_0 : i32, i32, i32
  }
}

module attributes {stable_mosaic.version = 11 : i64} {
  func.func @_instance_norm_kernel(%arg0: i32, %arg1: memref<1x16x32xf32, #tpu.memory_space<vmem>>, %arg2: memref<1x16x32xf32, #tpu.memory_space<vmem>>) attributes {dimension_semantics = [#tpu.dimension_semantics<parallel>], iteration_bounds = array<i64: 2>, scalar_prefetch = 0 : i64, scratch_operands = 0 : i64, tpu.core_type = #tpu.core_type<tc>, window_params = [{transform_indices = @transform_0, window_bounds = array<i64: 1, 16, 32>}, {transform_indices = @transform_1, window_bounds = array<i64: 1, 16, 32>}]} {
    %c0 = arith.constant 0 : index
    %c0_0 = arith.constant 0 : index
    %c0_1 = arith.constant 0 : index
    %0 = vector.load %arg1[%c0, %c0_0, %c0_1] : memref<1x16x32xf32, #tpu.memory_space<vmem>>, vector<1x16x32xf32>
    %1 = vector.shape_cast %0 : vector<1x16x32xf32> to vector<16x32xf32>
    %cst = arith.constant dense<0.000000e+00> : vector<32xf32>
    %2 = vector.multi_reduction <add>, %1, %cst [0] : vector<16x32xf32> to vector<32xf32>
    %3 = vector.shape_cast %2 : vector<32xf32> to vector<1x32xf32>
    %cst_2 = arith.constant 1.600000e+01 : f32
    %4 = vector.broadcast %cst_2 : f32 to vector<1x32xf32>
    %5 = arith.divf %3, %4 : vector<1x32xf32>
    %6 = vector.broadcast %5 : vector<1x32xf32> to vector<16x32xf32>
    %7 = arith.subf %1, %6 : vector<16x32xf32>
    %8 = arith.mulf %7, %7 : vector<16x32xf32>
    %cst_3 = arith.constant dense<0.000000e+00> : vector<32xf32>
    %9 = vector.multi_reduction <add>, %8, %cst_3 [0] : vector<16x32xf32> to vector<32xf32>
    %10 = vector.shape_cast %9 : vector<32xf32> to vector<1x32xf32>
    %cst_4 = arith.constant 1.600000e+01 : f32
    %11 = vector.broadcast %cst_4 : f32 to vector<1x32xf32>
    %12 = arith.divf %10, %11 : vector<1x32xf32>
    %cst_5 = arith.constant 9.99999974E-6 : f32
    %13 = vector.broadcast %cst_5 : f32 to vector<1x32xf32>
    %14 = arith.addf %12, %13 : vector<1x32xf32>
    %15 = math.rsqrt %14 : vector<1x32xf32>
    %16 = vector.broadcast %15 : vector<1x32xf32> to vector<16x32xf32>
    %17 = arith.mulf %7, %16 : vector<16x32xf32>
    %c0_6 = arith.constant 0 : index
    %c0_7 = arith.constant 0 : index
    %c0_8 = arith.constant 0 : index
    %18 = vector.load %arg2[%c0_6, %c0_7, %c0_8] : memref<1x16x32xf32, #tpu.memory_space<vmem>>, vector<1x16x32xf32>
    %19 = vector.shape_cast %18 : vector<1x16x32xf32> to vector<16x32xf32>
    %20 = vector.shape_cast %17 : vector<16x32xf32> to vector<1x16x32xf32>
    tpu.vector_store %arg2[%c0_6, %c0_7, %c0_8], %20 {strides = array<i32>} : memref<1x16x32xf32, #tpu.memory_space<vmem>>, vector<1x16x32xf32>,
    return
  }
  func.func @transform_0(%arg0: i32) -> (i32, i32, i32) {
    %c0_i32 = arith.constant 0 : i32
    %c0_i32_0 = arith.constant 0 : i32
    %c0_i32_1 = arith.constant 0 : i32
    return %arg0, %c0_i32, %c0_i32_0 : i32, i32, i32
  }
  func.func @transform_1(%arg0: i32) -> (i32, i32, i32) {
    %c0_i32 = arith.constant 0 : i32
    %c0_i32_0 = arith.constant 0 : i32
    %c0_i32_1 = arith.constant 0 : i32
    return %arg0, %c0_i32, %c0_i32_0 : i32, i32, i32
  }
}

module attributes {stable_mosaic.version = 11 : i64} {
  func.func @_matmul_kernel(%arg0: i32, %arg1: i32, %arg2: i32, %arg3: memref<32x32xbf16, #tpu.memory_space<vmem>>, %arg4: memref<32x128xbf16, #tpu.memory_space<vmem>>, %arg5: memref<1x128xf32, #tpu.memory_space<vmem>>, %arg6: memref<32x128xf32, #tpu.memory_space<vmem>>, %arg7: memref<32x128xf32, #tpu.memory_space<vmem>>) attributes {dimension_semantics = [#tpu.dimension_semantics<parallel>, #tpu.dimension_semantics<parallel>, #tpu.dimension_semantics<arbitrary>], iteration_bounds = array<i64: 1, 1, 1>, scalar_prefetch = 0 : i64, scratch_operands = 1 : i64, tpu.core_type = #tpu.core_type<tc>, window_params = [{transform_indices = @transform_0, window_bounds = array<i64: 32, 32>}, {transform_indices = @transform_1, window_bounds = array<i64: 32, 128>}, {transform_indices = @transform_2, window_bounds = array<i64: 1, 128>}, {transform_indices = @transform_3, window_bounds = array<i64: 32, 128>}]} {
    %c0_i32 = arith.constant 0 : i32
    %0 = arith.cmpi eq, %arg2, %c0_i32 : i32
    %1 = arith.extui %0 : i1 to i32
    %c0_i32_0 = arith.constant 0 : i32
    %2 = arith.cmpi ne, %1, %c0_i32_0 : i32
    scf.if %2 {
      %cst_10 = arith.constant 0.000000e+00 : f32
      %12 = vector.broadcast %cst_10 : f32 to vector<32x128xf32>
      %c0_11 = arith.constant 0 : index
      %c0_12 = arith.constant 0 : index
      %13 = vector.load %arg7[%c0_11, %c0_12] : memref<32x128xf32, #tpu.memory_space<vmem>>, vector<32x128xf32>
      tpu.vector_store %arg7[%c0_11, %c0_12], %12 {strides = array<i32>} : memref<32x128xf32, #tpu.memory_space<vmem>>, vector<32x128xf32>,
    } else {
    }
    %c0 = arith.constant 0 : index
    %c0_1 = arith.constant 0 : index
    %3 = vector.load %arg7[%c0, %c0_1] : memref<32x128xf32, #tpu.memory_space<vmem>>, vector<32x128xf32>
    %c0_2 = arith.constant 0 : index
    %c0_3 = arith.constant 0 : index
    %4 = vector.load %arg3[%c0_2, %c0_3] : memref<32x32xbf16, #tpu.memory_space<vmem>>, vector<32x32xbf16>
    %c0_4 = arith.constant 0 : index
    %c0_5 = arith.constant 0 : index
    %5 = vector.load %arg4[%c0_4, %c0_5] : memref<32x128xbf16, #tpu.memory_space<vmem>>, vector<32x128xbf16>
    %cst = arith.constant dense<0.000000e+00> : vector<32x128xf32>
    %6 = tpu.matmul %4, %5, %cst {dimension_numbers = #tpu.dot_dimension_numbers<[1], [0], [0], [1], [0, 0, 1, 1], [], []>} : vector<32x32xbf16>, vector<32x128xbf16>, vector<32x128xf32> -> vector<32x128xf32>
    %7 = arith.addf %3, %6 : vector<32x128xf32>
    %c0_6 = arith.constant 0 : index
    %c0_7 = arith.constant 0 : index
    %8 = vector.load %arg7[%c0_6, %c0_7] : memref<32x128xf32, #tpu.memory_space<vmem>>, vector<32x128xf32>
    tpu.vector_store %arg7[%c0_6, %c0_7], %7 {strides = array<i32>} : memref<32x128xf32, #tpu.memory_space<vmem>>, vector<32x128xf32>,
    %c0_i32_8 = arith.constant 0 : i32
    %9 = arith.cmpi eq, %arg2, %c0_i32_8 : i32
    %10 = arith.extui %9 : i1 to i32
    %c0_i32_9 = arith.constant 0 : i32
    %11 = arith.cmpi ne, %10, %c0_i32_9 : i32
    scf.if %11 {
      %c0_10 = arith.constant 0 : index
      %c0_11 = arith.constant 0 : index
      %12 = vector.load %arg7[%c0_10, %c0_11] : memref<32x128xf32, #tpu.memory_space<vmem>>, vector<32x128xf32>
      %c0_12 = arith.constant 0 : index
      %c0_13 = arith.constant 0 : index
      %13 = vector.load %arg5[%c0_12, %c0_13] : memref<1x128xf32, #tpu.memory_space<vmem>>, vector<1x128xf32>
      %14 = vector.broadcast %13 : vector<1x128xf32> to vector<32x128xf32>
      %15 = arith.addf %12, %14 : vector<32x128xf32>
      %c0_14 = arith.constant 0 : index
      %c0_15 = arith.constant 0 : index
      %16 = vector.load %arg6[%c0_14, %c0_15] : memref<32x128xf32, #tpu.memory_space<vmem>>, vector<32x128xf32>
      tpu.vector_store %arg6[%c0_14, %c0_15], %15 {strides = array<i32>} : memref<32x128xf32, #tpu.memory_space<vmem>>, vector<32x128xf32>,
    } else {
    }
    return
  }
  func.func @transform_0(%arg0: i32, %arg1: i32, %arg2: i32) -> (i32, i32) {
    %c0_i32 = arith.constant 0 : i32
    return %arg0, %arg2 : i32, i32
  }
  func.func @transform_1(%arg0: i32, %arg1: i32, %arg2: i32) -> (i32, i32) {
    %c0_i32 = arith.constant 0 : i32
    return %arg2, %arg1 : i32, i32
  }
  func.func @transform_2(%arg0: i32, %arg1: i32, %arg2: i32) -> (i32, i32) {
    %c0_i32 = arith.constant 0 : i32
    %c0_i32_0 = arith.constant 0 : i32
    return %c0_i32, %arg1 : i32, i32
  }
  func.func @transform_3(%arg0: i32, %arg1: i32, %arg2: i32) -> (i32, i32) {
    %c0_i32 = arith.constant 0 : i32
    return %arg0, %arg1 : i32, i32
  }
}

module attributes {stable_mosaic.version = 11 : i64} {
  func.func @_matmul_kernel(%arg0: i32, %arg1: i32, %arg2: i32, %arg3: memref<32x16xbf16, #tpu.memory_space<vmem>>, %arg4: memref<16x128xbf16, #tpu.memory_space<vmem>>, %arg5: memref<1x128xf32, #tpu.memory_space<vmem>>, %arg6: memref<32x128xf32, #tpu.memory_space<vmem>>, %arg7: memref<32x128xf32, #tpu.memory_space<vmem>>) attributes {dimension_semantics = [#tpu.dimension_semantics<parallel>, #tpu.dimension_semantics<parallel>, #tpu.dimension_semantics<arbitrary>], iteration_bounds = array<i64: 1, 1, 1>, scalar_prefetch = 0 : i64, scratch_operands = 1 : i64, tpu.core_type = #tpu.core_type<tc>, window_params = [{transform_indices = @transform_0, window_bounds = array<i64: 32, 16>}, {transform_indices = @transform_1, window_bounds = array<i64: 16, 128>}, {transform_indices = @transform_2, window_bounds = array<i64: 1, 128>}, {transform_indices = @transform_3, window_bounds = array<i64: 32, 128>}]} {
    %c0_i32 = arith.constant 0 : i32
    %0 = arith.cmpi eq, %arg2, %c0_i32 : i32
    %1 = arith.extui %0 : i1 to i32
    %c0_i32_0 = arith.constant 0 : i32
    %2 = arith.cmpi ne, %1, %c0_i32_0 : i32
    scf.if %2 {
      %cst_10 = arith.constant 0.000000e+00 : f32
      %12 = vector.broadcast %cst_10 : f32 to vector<32x128xf32>
      %c0_11 = arith.constant 0 : index
      %c0_12 = arith.constant 0 : index
      %13 = vector.load %arg7[%c0_11, %c0_12] : memref<32x128xf32, #tpu.memory_space<vmem>>, vector<32x128xf32>
      tpu.vector_store %arg7[%c0_11, %c0_12], %12 {strides = array<i32>} : memref<32x128xf32, #tpu.memory_space<vmem>>, vector<32x128xf32>,
    } else {
    }
    %c0 = arith.constant 0 : index
    %c0_1 = arith.constant 0 : index
    %3 = vector.load %arg7[%c0, %c0_1] : memref<32x128xf32, #tpu.memory_space<vmem>>, vector<32x128xf32>
    %c0_2 = arith.constant 0 : index
    %c0_3 = arith.constant 0 : index
    %4 = vector.load %arg3[%c0_2, %c0_3] : memref<32x16xbf16, #tpu.memory_space<vmem>>, vector<32x16xbf16>
    %c0_4 = arith.constant 0 : index
    %c0_5 = arith.constant 0 : index
    %5 = vector.load %arg4[%c0_4, %c0_5] : memref<16x128xbf16, #tpu.memory_space<vmem>>, vector<16x128xbf16>
    %cst = arith.constant dense<0.000000e+00> : vector<32x128xf32>
    %6 = tpu.matmul %4, %5, %cst {dimension_numbers = #tpu.dot_dimension_numbers<[1], [0], [0], [1], [0, 0, 1, 1], [], []>} : vector<32x16xbf16>, vector<16x128xbf16>, vector<32x128xf32> -> vector<32x128xf32>
    %7 = arith.addf %3, %6 : vector<32x128xf32>
    %c0_6 = arith.constant 0 : index
    %c0_7 = arith.constant 0 : index
    %8 = vector.load %arg7[%c0_6, %c0_7] : memref<32x128xf32, #tpu.memory_space<vmem>>, vector<32x128xf32>
    tpu.vector_store %arg7[%c0_6, %c0_7], %7 {strides = array<i32>} : memref<32x128xf32, #tpu.memory_space<vmem>>, vector<32x128xf32>,
    %c0_i32_8 = arith.constant 0 : i32
    %9 = arith.cmpi eq, %arg2, %c0_i32_8 : i32
    %10 = arith.extui %9 : i1 to i32
    %c0_i32_9 = arith.constant 0 : i32
    %11 = arith.cmpi ne, %10, %c0_i32_9 : i32
    scf.if %11 {
      %c0_10 = arith.constant 0 : index
      %c0_11 = arith.constant 0 : index
      %12 = vector.load %arg7[%c0_10, %c0_11] : memref<32x128xf32, #tpu.memory_space<vmem>>, vector<32x128xf32>
      %c0_12 = arith.constant 0 : index
      %c0_13 = arith.constant 0 : index
      %13 = vector.load %arg5[%c0_12, %c0_13] : memref<1x128xf32, #tpu.memory_space<vmem>>, vector<1x128xf32>
      %14 = vector.broadcast %13 : vector<1x128xf32> to vector<32x128xf32>
      %15 = arith.addf %12, %14 : vector<32x128xf32>
      %cst_14 = arith.constant 0.000000e+00 : f32
      %16 = vector.broadcast %cst_14 : f32 to vector<32x128xf32>
      %17 = arith.maximumf %15, %16 : vector<32x128xf32>
      %c0_15 = arith.constant 0 : index
      %c0_16 = arith.constant 0 : index
      %18 = vector.load %arg6[%c0_15, %c0_16] : memref<32x128xf32, #tpu.memory_space<vmem>>, vector<32x128xf32>
      tpu.vector_store %arg6[%c0_15, %c0_16], %17 {strides = array<i32>} : memref<32x128xf32, #tpu.memory_space<vmem>>, vector<32x128xf32>,
    } else {
    }
    return
  }
  func.func @transform_0(%arg0: i32, %arg1: i32, %arg2: i32) -> (i32, i32) {
    %c0_i32 = arith.constant 0 : i32
    return %arg0, %arg2 : i32, i32
  }
  func.func @transform_1(%arg0: i32, %arg1: i32, %arg2: i32) -> (i32, i32) {
    %c0_i32 = arith.constant 0 : i32
    return %arg2, %arg1 : i32, i32
  }
  func.func @transform_2(%arg0: i32, %arg1: i32, %arg2: i32) -> (i32, i32) {
    %c0_i32 = arith.constant 0 : i32
    %c0_i32_0 = arith.constant 0 : i32
    return %c0_i32, %arg1 : i32, i32
  }
  func.func @transform_3(%arg0: i32, %arg1: i32, %arg2: i32) -> (i32, i32) {
    %c0_i32 = arith.constant 0 : i32
    return %arg0, %arg1 : i32, i32
  }
}

module attributes {stable_mosaic.version = 11 : i64} {
  func.func @_matmul_kernel(%arg0: i32, %arg1: i32, %arg2: i32, %arg3: memref<32x384xbf16, #tpu.memory_space<vmem>>, %arg4: memref<384x128xbf16, #tpu.memory_space<vmem>>, %arg5: memref<1x128xf32, #tpu.memory_space<vmem>>, %arg6: memref<32x128xf32, #tpu.memory_space<vmem>>, %arg7: memref<32x128xf32, #tpu.memory_space<vmem>>) attributes {dimension_semantics = [#tpu.dimension_semantics<parallel>, #tpu.dimension_semantics<parallel>, #tpu.dimension_semantics<arbitrary>], iteration_bounds = array<i64: 1, 1, 3>, scalar_prefetch = 0 : i64, scratch_operands = 1 : i64, tpu.core_type = #tpu.core_type<tc>, window_params = [{transform_indices = @transform_0, window_bounds = array<i64: 32, 384>}, {transform_indices = @transform_1, window_bounds = array<i64: 384, 128>}, {transform_indices = @transform_2, window_bounds = array<i64: 1, 128>}, {transform_indices = @transform_3, window_bounds = array<i64: 32, 128>}]} {
    %c0_i32 = arith.constant 0 : i32
    %0 = arith.cmpi eq, %arg2, %c0_i32 : i32
    %1 = arith.extui %0 : i1 to i32
    %c0_i32_0 = arith.constant 0 : i32
    %2 = arith.cmpi ne, %1, %c0_i32_0 : i32
    scf.if %2 {
      %cst_9 = arith.constant 0.000000e+00 : f32
      %12 = vector.broadcast %cst_9 : f32 to vector<32x128xf32>
      %c0_10 = arith.constant 0 : index
      %c0_11 = arith.constant 0 : index
      %13 = vector.load %arg7[%c0_10, %c0_11] : memref<32x128xf32, #tpu.memory_space<vmem>>, vector<32x128xf32>
      tpu.vector_store %arg7[%c0_10, %c0_11], %12 {strides = array<i32>} : memref<32x128xf32, #tpu.memory_space<vmem>>, vector<32x128xf32>,
    } else {
    }
    %c0 = arith.constant 0 : index
    %c0_1 = arith.constant 0 : index
    %3 = vector.load %arg7[%c0, %c0_1] : memref<32x128xf32, #tpu.memory_space<vmem>>, vector<32x128xf32>
    %c0_2 = arith.constant 0 : index
    %c0_3 = arith.constant 0 : index
    %4 = vector.load %arg3[%c0_2, %c0_3] : memref<32x384xbf16, #tpu.memory_space<vmem>>, vector<32x384xbf16>
    %c0_4 = arith.constant 0 : index
    %c0_5 = arith.constant 0 : index
    %5 = vector.load %arg4[%c0_4, %c0_5] : memref<384x128xbf16, #tpu.memory_space<vmem>>, vector<384x128xbf16>
    %cst = arith.constant dense<0.000000e+00> : vector<32x128xf32>
    %6 = tpu.matmul %4, %5, %cst {dimension_numbers = #tpu.dot_dimension_numbers<[1], [0], [0], [1], [0, 0, 1, 1], [], []>} : vector<32x384xbf16>, vector<384x128xbf16>, vector<32x128xf32> -> vector<32x128xf32>
    %7 = arith.addf %3, %6 : vector<32x128xf32>
    %c0_6 = arith.constant 0 : index
    %c0_7 = arith.constant 0 : index
    %8 = vector.load %arg7[%c0_6, %c0_7] : memref<32x128xf32, #tpu.memory_space<vmem>>, vector<32x128xf32>
    tpu.vector_store %arg7[%c0_6, %c0_7], %7 {strides = array<i32>} : memref<32x128xf32, #tpu.memory_space<vmem>>, vector<32x128xf32>,
    %c2_i32 = arith.constant 2 : i32
    %9 = arith.cmpi eq, %arg2, %c2_i32 : i32
    %10 = arith.extui %9 : i1 to i32
    %c0_i32_8 = arith.constant 0 : i32
    %11 = arith.cmpi ne, %10, %c0_i32_8 : i32
    scf.if %11 {
      %c0_9 = arith.constant 0 : index
      %c0_10 = arith.constant 0 : index
      %12 = vector.load %arg7[%c0_9, %c0_10] : memref<32x128xf32, #tpu.memory_space<vmem>>, vector<32x128xf32>
      %c0_11 = arith.constant 0 : index
      %c0_12 = arith.constant 0 : index
      %13 = vector.load %arg5[%c0_11, %c0_12] : memref<1x128xf32, #tpu.memory_space<vmem>>, vector<1x128xf32>
      %14 = vector.broadcast %13 : vector<1x128xf32> to vector<32x128xf32>
      %15 = arith.addf %12, %14 : vector<32x128xf32>
      %c0_13 = arith.constant 0 : index
      %c0_14 = arith.constant 0 : index
      %16 = vector.load %arg6[%c0_13, %c0_14] : memref<32x128xf32, #tpu.memory_space<vmem>>, vector<32x128xf32>
      tpu.vector_store %arg6[%c0_13, %c0_14], %15 {strides = array<i32>} : memref<32x128xf32, #tpu.memory_space<vmem>>, vector<32x128xf32>,
    } else {
    }
    return
  }
  func.func @transform_0(%arg0: i32, %arg1: i32, %arg2: i32) -> (i32, i32) {
    %c0_i32 = arith.constant 0 : i32
    return %arg0, %arg2 : i32, i32
  }
  func.func @transform_1(%arg0: i32, %arg1: i32, %arg2: i32) -> (i32, i32) {
    %c0_i32 = arith.constant 0 : i32
    return %arg2, %arg1 : i32, i32
  }
  func.func @transform_2(%arg0: i32, %arg1: i32, %arg2: i32) -> (i32, i32) {
    %c0_i32 = arith.constant 0 : i32
    %c0_i32_0 = arith.constant 0 : i32
    return %c0_i32, %arg1 : i32, i32
  }
  func.func @transform_3(%arg0: i32, %arg1: i32, %arg2: i32) -> (i32, i32) {
    %c0_i32 = arith.constant 0 : i32
    return %arg0, %arg1 : i32, i32
  }
}

module attributes {stable_mosaic.version = 11 : i64} {
  func.func @_matmul_kernel(%arg0: i32, %arg1: i32, %arg2: i32, %arg3: memref<32x384xbf16, #tpu.memory_space<vmem>>, %arg4: memref<384x128xbf16, #tpu.memory_space<vmem>>, %arg5: memref<1x128xf32, #tpu.memory_space<vmem>>, %arg6: memref<32x128xf32, #tpu.memory_space<vmem>>, %arg7: memref<32x128xf32, #tpu.memory_space<vmem>>, %arg8: memref<32x128xf32, #tpu.memory_space<vmem>>, %arg9: memref<32x128xf32, #tpu.memory_space<vmem>>) attributes {dimension_semantics = [#tpu.dimension_semantics<parallel>, #tpu.dimension_semantics<parallel>, #tpu.dimension_semantics<arbitrary>], iteration_bounds = array<i64: 1, 1, 3>, scalar_prefetch = 0 : i64, scratch_operands = 1 : i64, tpu.core_type = #tpu.core_type<tc>, window_params = [{transform_indices = @transform_0, window_bounds = array<i64: 32, 384>}, {transform_indices = @transform_1, window_bounds = array<i64: 384, 128>}, {transform_indices = @transform_2, window_bounds = array<i64: 1, 128>}, {transform_indices = @transform_3, window_bounds = array<i64: 32, 128>}, {transform_indices = @transform_4, window_bounds = array<i64: 32, 128>}, {transform_indices = @transform_5, window_bounds = array<i64: 32, 128>}]} {
    %c0_i32 = arith.constant 0 : i32
    %0 = arith.cmpi eq, %arg2, %c0_i32 : i32
    %1 = arith.extui %0 : i1 to i32
    %c0_i32_0 = arith.constant 0 : i32
    %2 = arith.cmpi ne, %1, %c0_i32_0 : i32
    scf.if %2 {
      %cst_9 = arith.constant 0.000000e+00 : f32
      %12 = vector.broadcast %cst_9 : f32 to vector<32x128xf32>
      %c0_10 = arith.constant 0 : index
      %c0_11 = arith.constant 0 : index
      %13 = vector.load %arg9[%c0_10, %c0_11] : memref<32x128xf32, #tpu.memory_space<vmem>>, vector<32x128xf32>
      tpu.vector_store %arg9[%c0_10, %c0_11], %12 {strides = array<i32>} : memref<32x128xf32, #tpu.memory_space<vmem>>, vector<32x128xf32>,
    } else {
    }
    %c0 = arith.constant 0 : index
    %c0_1 = arith.constant 0 : index
    %3 = vector.load %arg9[%c0, %c0_1] : memref<32x128xf32, #tpu.memory_space<vmem>>, vector<32x128xf32>
    %c0_2 = arith.constant 0 : index
    %c0_3 = arith.constant 0 : index
    %4 = vector.load %arg3[%c0_2, %c0_3] : memref<32x384xbf16, #tpu.memory_space<vmem>>, vector<32x384xbf16>
    %c0_4 = arith.constant 0 : index
    %c0_5 = arith.constant 0 : index
    %5 = vector.load %arg4[%c0_4, %c0_5] : memref<384x128xbf16, #tpu.memory_space<vmem>>, vector<384x128xbf16>
    %cst = arith.constant dense<0.000000e+00> : vector<32x128xf32>
    %6 = tpu.matmul %4, %5, %cst {dimension_numbers = #tpu.dot_dimension_numbers<[1], [0], [0], [1], [0, 0, 1, 1], [], []>} : vector<32x384xbf16>, vector<384x128xbf16>, vector<32x128xf32> -> vector<32x128xf32>
    %7 = arith.addf %3, %6 : vector<32x128xf32>
    %c0_6 = arith.constant 0 : index
    %c0_7 = arith.constant 0 : index
    %8 = vector.load %arg9[%c0_6, %c0_7] : memref<32x128xf32, #tpu.memory_space<vmem>>, vector<32x128xf32>
    tpu.vector_store %arg9[%c0_6, %c0_7], %7 {strides = array<i32>} : memref<32x128xf32, #tpu.memory_space<vmem>>, vector<32x128xf32>,
    %c2_i32 = arith.constant 2 : i32
    %9 = arith.cmpi eq, %arg2, %c2_i32 : i32
    %10 = arith.extui %9 : i1 to i32
    %c0_i32_8 = arith.constant 0 : i32
    %11 = arith.cmpi ne, %10, %c0_i32_8 : i32
    scf.if %11 {
      %c0_9 = arith.constant 0 : index
      %c0_10 = arith.constant 0 : index
      %12 = vector.load %arg9[%c0_9, %c0_10] : memref<32x128xf32, #tpu.memory_space<vmem>>, vector<32x128xf32>
      %c0_11 = arith.constant 0 : index
      %c0_12 = arith.constant 0 : index
      %13 = vector.load %arg5[%c0_11, %c0_12] : memref<1x128xf32, #tpu.memory_space<vmem>>, vector<1x128xf32>
      %14 = vector.broadcast %13 : vector<1x128xf32> to vector<32x128xf32>
      %15 = arith.addf %12, %14 : vector<32x128xf32>
      %c0_13 = arith.constant 0 : index
      %c0_14 = arith.constant 0 : index
      %16 = vector.load %arg6[%c0_13, %c0_14] : memref<32x128xf32, #tpu.memory_space<vmem>>, vector<32x128xf32>
      %c0_15 = arith.constant 0 : index
      %c0_16 = arith.constant 0 : index
      %17 = vector.load %arg7[%c0_15, %c0_16] : memref<32x128xf32, #tpu.memory_space<vmem>>, vector<32x128xf32>
      %cst_17 = arith.constant 1.000000e+00 : f32
      %18 = vector.broadcast %cst_17 : f32 to vector<32x128xf32>
      %19 = arith.addf %18, %17 : vector<32x128xf32>
      %20 = arith.mulf %16, %19 : vector<32x128xf32>
      %21 = arith.addf %20, %15 : vector<32x128xf32>
      %cst_18 = arith.constant 0.000000e+00 : f32
      %22 = vector.broadcast %cst_18 : f32 to vector<32x128xf32>
      %23 = arith.cmpf ogt, %21, %22 : vector<32x128xf32>
      %cst_19 = arith.constant 2.000000e-01 : f32
      %24 = vector.broadcast %cst_19 : f32 to vector<32x128xf32>
      %25 = arith.mulf %24, %21 : vector<32x128xf32>
      %26 = arith.select %23, %21, %25 : vector<32x128xi1>, vector<32x128xf32>
      %c0_20 = arith.constant 0 : index
      %c0_21 = arith.constant 0 : index
      %27 = vector.load %arg8[%c0_20, %c0_21] : memref<32x128xf32, #tpu.memory_space<vmem>>, vector<32x128xf32>
      tpu.vector_store %arg8[%c0_20, %c0_21], %26 {strides = array<i32>} : memref<32x128xf32, #tpu.memory_space<vmem>>, vector<32x128xf32>,
    } else {
    }
    return
  }
  func.func @transform_0(%arg0: i32, %arg1: i32, %arg2: i32) -> (i32, i32) {
    %c0_i32 = arith.constant 0 : i32
    return %arg0, %arg2 : i32, i32
  }
  func.func @transform_1(%arg0: i32, %arg1: i32, %arg2: i32) -> (i32, i32) {
    %c0_i32 = arith.constant 0 : i32
    return %arg2, %arg1 : i32, i32
  }
  func.func @transform_2(%arg0: i32, %arg1: i32, %arg2: i32) -> (i32, i32) {
    %c0_i32 = arith.constant 0 : i32
    %c0_i32_0 = arith.constant 0 : i32
    return %c0_i32, %arg1 : i32, i32
  }
  func.func @transform_3(%arg0: i32, %arg1: i32, %arg2: i32) -> (i32, i32) {
    %c0_i32 = arith.constant 0 : i32
    return %arg0, %arg1 : i32, i32
  }
  func.func @transform_4(%arg0: i32, %arg1: i32, %arg2: i32) -> (i32, i32) {
    %c0_i32 = arith.constant 0 : i32
    return %arg0, %arg1 : i32, i32
  }
  func.func @transform_5(%arg0: i32, %arg1: i32, %arg2: i32) -> (i32, i32) {
    %c0_i32 = arith.constant 0 : i32
    return %arg0, %arg1 : i32, i32
  }
}

module attributes {stable_mosaic.version = 11 : i64} {
  func.func @_matmul_kernel(%arg0: i32, %arg1: i32, %arg2: i32, %arg3: memref<32x288xbf16, #tpu.memory_space<vmem>>, %arg4: memref<288x128xbf16, #tpu.memory_space<vmem>>, %arg5: memref<1x128xf32, #tpu.memory_space<vmem>>, %arg6: memref<32x128xf32, #tpu.memory_space<vmem>>, %arg7: memref<32x128xf32, #tpu.memory_space<vmem>>) attributes {dimension_semantics = [#tpu.dimension_semantics<parallel>, #tpu.dimension_semantics<parallel>, #tpu.dimension_semantics<arbitrary>], iteration_bounds = array<i64: 1, 1, 1>, scalar_prefetch = 0 : i64, scratch_operands = 1 : i64, tpu.core_type = #tpu.core_type<tc>, window_params = [{transform_indices = @transform_0, window_bounds = array<i64: 32, 288>}, {transform_indices = @transform_1, window_bounds = array<i64: 288, 128>}, {transform_indices = @transform_2, window_bounds = array<i64: 1, 128>}, {transform_indices = @transform_3, window_bounds = array<i64: 32, 128>}]} {
    %c0_i32 = arith.constant 0 : i32
    %0 = arith.cmpi eq, %arg2, %c0_i32 : i32
    %1 = arith.extui %0 : i1 to i32
    %c0_i32_0 = arith.constant 0 : i32
    %2 = arith.cmpi ne, %1, %c0_i32_0 : i32
    scf.if %2 {
      %cst_10 = arith.constant 0.000000e+00 : f32
      %12 = vector.broadcast %cst_10 : f32 to vector<32x128xf32>
      %c0_11 = arith.constant 0 : index
      %c0_12 = arith.constant 0 : index
      %13 = vector.load %arg7[%c0_11, %c0_12] : memref<32x128xf32, #tpu.memory_space<vmem>>, vector<32x128xf32>
      tpu.vector_store %arg7[%c0_11, %c0_12], %12 {strides = array<i32>} : memref<32x128xf32, #tpu.memory_space<vmem>>, vector<32x128xf32>,
    } else {
    }
    %c0 = arith.constant 0 : index
    %c0_1 = arith.constant 0 : index
    %3 = vector.load %arg7[%c0, %c0_1] : memref<32x128xf32, #tpu.memory_space<vmem>>, vector<32x128xf32>
    %c0_2 = arith.constant 0 : index
    %c0_3 = arith.constant 0 : index
    %4 = vector.load %arg3[%c0_2, %c0_3] : memref<32x288xbf16, #tpu.memory_space<vmem>>, vector<32x288xbf16>
    %c0_4 = arith.constant 0 : index
    %c0_5 = arith.constant 0 : index
    %5 = vector.load %arg4[%c0_4, %c0_5] : memref<288x128xbf16, #tpu.memory_space<vmem>>, vector<288x128xbf16>
    %cst = arith.constant dense<0.000000e+00> : vector<32x128xf32>
    %6 = tpu.matmul %4, %5, %cst {dimension_numbers = #tpu.dot_dimension_numbers<[1], [0], [0], [1], [0, 0, 1, 1], [], []>} : vector<32x288xbf16>, vector<288x128xbf16>, vector<32x128xf32> -> vector<32x128xf32>
    %7 = arith.addf %3, %6 : vector<32x128xf32>
    %c0_6 = arith.constant 0 : index
    %c0_7 = arith.constant 0 : index
    %8 = vector.load %arg7[%c0_6, %c0_7] : memref<32x128xf32, #tpu.memory_space<vmem>>, vector<32x128xf32>
    tpu.vector_store %arg7[%c0_6, %c0_7], %7 {strides = array<i32>} : memref<32x128xf32, #tpu.memory_space<vmem>>, vector<32x128xf32>,
    %c0_i32_8 = arith.constant 0 : i32
    %9 = arith.cmpi eq, %arg2, %c0_i32_8 : i32
    %10 = arith.extui %9 : i1 to i32
    %c0_i32_9 = arith.constant 0 : i32
    %11 = arith.cmpi ne, %10, %c0_i32_9 : i32
    scf.if %11 {
      %c0_10 = arith.constant 0 : index
      %c0_11 = arith.constant 0 : index
      %12 = vector.load %arg7[%c0_10, %c0_11] : memref<32x128xf32, #tpu.memory_space<vmem>>, vector<32x128xf32>
      %c0_12 = arith.constant 0 : index
      %c0_13 = arith.constant 0 : index
      %13 = vector.load %arg5[%c0_12, %c0_13] : memref<1x128xf32, #tpu.memory_space<vmem>>, vector<1x128xf32>
      %14 = vector.broadcast %13 : vector<1x128xf32> to vector<32x128xf32>
      %15 = arith.addf %12, %14 : vector<32x128xf32>
      %c0_14 = arith.constant 0 : index
      %c0_15 = arith.constant 0 : index
      %16 = vector.load %arg6[%c0_14, %c0_15] : memref<32x128xf32, #tpu.memory_space<vmem>>, vector<32x128xf32>
      tpu.vector_store %arg6[%c0_14, %c0_15], %15 {strides = array<i32>} : memref<32x128xf32, #tpu.memory_space<vmem>>, vector<32x128xf32>,
    } else {
    }
    return
  }
  func.func @transform_0(%arg0: i32, %arg1: i32, %arg2: i32) -> (i32, i32) {
    %c0_i32 = arith.constant 0 : i32
    return %arg0, %arg2 : i32, i32
  }
  func.func @transform_1(%arg0: i32, %arg1: i32, %arg2: i32) -> (i32, i32) {
    %c0_i32 = arith.constant 0 : i32
    return %arg2, %arg1 : i32, i32
  }
  func.func @transform_2(%arg0: i32, %arg1: i32, %arg2: i32) -> (i32, i32) {
    %c0_i32 = arith.constant 0 : i32
    %c0_i32_0 = arith.constant 0 : i32
    return %c0_i32, %arg1 : i32, i32
  }
  func.func @transform_3(%arg0: i32, %arg1: i32, %arg2: i32) -> (i32, i32) {
    %c0_i32 = arith.constant 0 : i32
    return %arg0, %arg1 : i32, i32
  }
}

module attributes {stable_mosaic.version = 11 : i64} {
  func.func @_matmul_kernel(%arg0: i32, %arg1: i32, %arg2: i32, %arg3: memref<32x288xbf16, #tpu.memory_space<vmem>>, %arg4: memref<288x128xbf16, #tpu.memory_space<vmem>>, %arg5: memref<1x128xf32, #tpu.memory_space<vmem>>, %arg6: memref<32x128xf32, #tpu.memory_space<vmem>>, %arg7: memref<32x128xf32, #tpu.memory_space<vmem>>, %arg8: memref<32x128xf32, #tpu.memory_space<vmem>>) attributes {dimension_semantics = [#tpu.dimension_semantics<parallel>, #tpu.dimension_semantics<parallel>, #tpu.dimension_semantics<arbitrary>], iteration_bounds = array<i64: 1, 1, 1>, scalar_prefetch = 0 : i64, scratch_operands = 1 : i64, tpu.core_type = #tpu.core_type<tc>, window_params = [{transform_indices = @transform_0, window_bounds = array<i64: 32, 288>}, {transform_indices = @transform_1, window_bounds = array<i64: 288, 128>}, {transform_indices = @transform_2, window_bounds = array<i64: 1, 128>}, {transform_indices = @transform_3, window_bounds = array<i64: 32, 128>}, {transform_indices = @transform_4, window_bounds = array<i64: 32, 128>}]} {
    %c0_i32 = arith.constant 0 : i32
    %0 = arith.cmpi eq, %arg2, %c0_i32 : i32
    %1 = arith.extui %0 : i1 to i32
    %c0_i32_0 = arith.constant 0 : i32
    %2 = arith.cmpi ne, %1, %c0_i32_0 : i32
    scf.if %2 {
      %cst_10 = arith.constant 0.000000e+00 : f32
      %12 = vector.broadcast %cst_10 : f32 to vector<32x128xf32>
      %c0_11 = arith.constant 0 : index
      %c0_12 = arith.constant 0 : index
      %13 = vector.load %arg8[%c0_11, %c0_12] : memref<32x128xf32, #tpu.memory_space<vmem>>, vector<32x128xf32>
      tpu.vector_store %arg8[%c0_11, %c0_12], %12 {strides = array<i32>} : memref<32x128xf32, #tpu.memory_space<vmem>>, vector<32x128xf32>,
    } else {
    }
    %c0 = arith.constant 0 : index
    %c0_1 = arith.constant 0 : index
    %3 = vector.load %arg8[%c0, %c0_1] : memref<32x128xf32, #tpu.memory_space<vmem>>, vector<32x128xf32>
    %c0_2 = arith.constant 0 : index
    %c0_3 = arith.constant 0 : index
    %4 = vector.load %arg3[%c0_2, %c0_3] : memref<32x288xbf16, #tpu.memory_space<vmem>>, vector<32x288xbf16>
    %c0_4 = arith.constant 0 : index
    %c0_5 = arith.constant 0 : index
    %5 = vector.load %arg4[%c0_4, %c0_5] : memref<288x128xbf16, #tpu.memory_space<vmem>>, vector<288x128xbf16>
    %cst = arith.constant dense<0.000000e+00> : vector<32x128xf32>
    %6 = tpu.matmul %4, %5, %cst {dimension_numbers = #tpu.dot_dimension_numbers<[1], [0], [0], [1], [0, 0, 1, 1], [], []>} : vector<32x288xbf16>, vector<288x128xbf16>, vector<32x128xf32> -> vector<32x128xf32>
    %7 = arith.addf %3, %6 : vector<32x128xf32>
    %c0_6 = arith.constant 0 : index
    %c0_7 = arith.constant 0 : index
    %8 = vector.load %arg8[%c0_6, %c0_7] : memref<32x128xf32, #tpu.memory_space<vmem>>, vector<32x128xf32>
    tpu.vector_store %arg8[%c0_6, %c0_7], %7 {strides = array<i32>} : memref<32x128xf32, #tpu.memory_space<vmem>>, vector<32x128xf32>,
    %c0_i32_8 = arith.constant 0 : i32
    %9 = arith.cmpi eq, %arg2, %c0_i32_8 : i32
    %10 = arith.extui %9 : i1 to i32
    %c0_i32_9 = arith.constant 0 : i32
    %11 = arith.cmpi ne, %10, %c0_i32_9 : i32
    scf.if %11 {
      %c0_10 = arith.constant 0 : index
      %c0_11 = arith.constant 0 : index
      %12 = vector.load %arg8[%c0_10, %c0_11] : memref<32x128xf32, #tpu.memory_space<vmem>>, vector<32x128xf32>
      %c0_12 = arith.constant 0 : index
      %c0_13 = arith.constant 0 : index
      %13 = vector.load %arg5[%c0_12, %c0_13] : memref<1x128xf32, #tpu.memory_space<vmem>>, vector<1x128xf32>
      %14 = vector.broadcast %13 : vector<1x128xf32> to vector<32x128xf32>
      %15 = arith.addf %12, %14 : vector<32x128xf32>
      %c0_14 = arith.constant 0 : index
      %c0_15 = arith.constant 0 : index
      %16 = vector.load %arg6[%c0_14, %c0_15] : memref<32x128xf32, #tpu.memory_space<vmem>>, vector<32x128xf32>
      %17 = arith.addf %15, %16 : vector<32x128xf32>
      %c0_16 = arith.constant 0 : index
      %c0_17 = arith.constant 0 : index
      %18 = vector.load %arg7[%c0_16, %c0_17] : memref<32x128xf32, #tpu.memory_space<vmem>>, vector<32x128xf32>
      tpu.vector_store %arg7[%c0_16, %c0_17], %17 {strides = array<i32>} : memref<32x128xf32, #tpu.memory_space<vmem>>, vector<32x128xf32>,
    } else {
    }
    return
  }
  func.func @transform_0(%arg0: i32, %arg1: i32, %arg2: i32) -> (i32, i32) {
    %c0_i32 = arith.constant 0 : i32
    return %arg0, %arg2 : i32, i32
  }
  func.func @transform_1(%arg0: i32, %arg1: i32, %arg2: i32) -> (i32, i32) {
    %c0_i32 = arith.constant 0 : i32
    return %arg2, %arg1 : i32, i32
  }
  func.func @transform_2(%arg0: i32, %arg1: i32, %arg2: i32) -> (i32, i32) {
    %c0_i32 = arith.constant 0 : i32
    %c0_i32_0 = arith.constant 0 : i32
    return %c0_i32, %arg1 : i32, i32
  }
  func.func @transform_3(%arg0: i32, %arg1: i32, %arg2: i32) -> (i32, i32) {
    %c0_i32 = arith.constant 0 : i32
    return %arg0, %arg1 : i32, i32
  }
  func.func @transform_4(%arg0: i32, %arg1: i32, %arg2: i32) -> (i32, i32) {
    %c0_i32 = arith.constant 0 : i32
    return %arg0, %arg1 : i32, i32
  }
}

module attributes {stable_mosaic.version = 11 : i64} {
  func.func @_matmul_kernel(%arg0: i32, %arg1: i32, %arg2: i32, %arg3: memref<32x128xbf16, #tpu.memory_space<vmem>>, %arg4: memref<128x128xbf16, #tpu.memory_space<vmem>>, %arg5: memref<1x128xf32, #tpu.memory_space<vmem>>, %arg6: memref<32x128xf32, #tpu.memory_space<vmem>>, %arg7: memref<32x128xf32, #tpu.memory_space<vmem>>) attributes {dimension_semantics = [#tpu.dimension_semantics<parallel>, #tpu.dimension_semantics<parallel>, #tpu.dimension_semantics<arbitrary>], iteration_bounds = array<i64: 1, 1, 1>, scalar_prefetch = 0 : i64, scratch_operands = 1 : i64, tpu.core_type = #tpu.core_type<tc>, window_params = [{transform_indices = @transform_0, window_bounds = array<i64: 32, 128>}, {transform_indices = @transform_1, window_bounds = array<i64: 128, 128>}, {transform_indices = @transform_2, window_bounds = array<i64: 1, 128>}, {transform_indices = @transform_3, window_bounds = array<i64: 32, 128>}]} {
    %c0_i32 = arith.constant 0 : i32
    %0 = arith.cmpi eq, %arg2, %c0_i32 : i32
    %1 = arith.extui %0 : i1 to i32
    %c0_i32_0 = arith.constant 0 : i32
    %2 = arith.cmpi ne, %1, %c0_i32_0 : i32
    scf.if %2 {
      %cst_10 = arith.constant 0.000000e+00 : f32
      %12 = vector.broadcast %cst_10 : f32 to vector<32x128xf32>
      %c0_11 = arith.constant 0 : index
      %c0_12 = arith.constant 0 : index
      %13 = vector.load %arg7[%c0_11, %c0_12] : memref<32x128xf32, #tpu.memory_space<vmem>>, vector<32x128xf32>
      tpu.vector_store %arg7[%c0_11, %c0_12], %12 {strides = array<i32>} : memref<32x128xf32, #tpu.memory_space<vmem>>, vector<32x128xf32>,
    } else {
    }
    %c0 = arith.constant 0 : index
    %c0_1 = arith.constant 0 : index
    %3 = vector.load %arg7[%c0, %c0_1] : memref<32x128xf32, #tpu.memory_space<vmem>>, vector<32x128xf32>
    %c0_2 = arith.constant 0 : index
    %c0_3 = arith.constant 0 : index
    %4 = vector.load %arg3[%c0_2, %c0_3] : memref<32x128xbf16, #tpu.memory_space<vmem>>, vector<32x128xbf16>
    %c0_4 = arith.constant 0 : index
    %c0_5 = arith.constant 0 : index
    %5 = vector.load %arg4[%c0_4, %c0_5] : memref<128x128xbf16, #tpu.memory_space<vmem>>, vector<128x128xbf16>
    %cst = arith.constant dense<0.000000e+00> : vector<32x128xf32>
    %6 = tpu.matmul %4, %5, %cst {dimension_numbers = #tpu.dot_dimension_numbers<[1], [0], [0], [1], [0, 0, 1, 1], [], []>} : vector<32x128xbf16>, vector<128x128xbf16>, vector<32x128xf32> -> vector<32x128xf32>
    %7 = arith.addf %3, %6 : vector<32x128xf32>
    %c0_6 = arith.constant 0 : index
    %c0_7 = arith.constant 0 : index
    %8 = vector.load %arg7[%c0_6, %c0_7] : memref<32x128xf32, #tpu.memory_space<vmem>>, vector<32x128xf32>
    tpu.vector_store %arg7[%c0_6, %c0_7], %7 {strides = array<i32>} : memref<32x128xf32, #tpu.memory_space<vmem>>, vector<32x128xf32>,
    %c0_i32_8 = arith.constant 0 : i32
    %9 = arith.cmpi eq, %arg2, %c0_i32_8 : i32
    %10 = arith.extui %9 : i1 to i32
    %c0_i32_9 = arith.constant 0 : i32
    %11 = arith.cmpi ne, %10, %c0_i32_9 : i32
    scf.if %11 {
      %c0_10 = arith.constant 0 : index
      %c0_11 = arith.constant 0 : index
      %12 = vector.load %arg7[%c0_10, %c0_11] : memref<32x128xf32, #tpu.memory_space<vmem>>, vector<32x128xf32>
      %c0_12 = arith.constant 0 : index
      %c0_13 = arith.constant 0 : index
      %13 = vector.load %arg5[%c0_12, %c0_13] : memref<1x128xf32, #tpu.memory_space<vmem>>, vector<1x128xf32>
      %14 = vector.broadcast %13 : vector<1x128xf32> to vector<32x128xf32>
      %15 = arith.addf %12, %14 : vector<32x128xf32>
      %c0_14 = arith.constant 0 : index
      %c0_15 = arith.constant 0 : index
      %16 = vector.load %arg6[%c0_14, %c0_15] : memref<32x128xf32, #tpu.memory_space<vmem>>, vector<32x128xf32>
      tpu.vector_store %arg6[%c0_14, %c0_15], %15 {strides = array<i32>} : memref<32x128xf32, #tpu.memory_space<vmem>>, vector<32x128xf32>,
    } else {
    }
    return
  }
  func.func @transform_0(%arg0: i32, %arg1: i32, %arg2: i32) -> (i32, i32) {
    %c0_i32 = arith.constant 0 : i32
    return %arg0, %arg2 : i32, i32
  }
  func.func @transform_1(%arg0: i32, %arg1: i32, %arg2: i32) -> (i32, i32) {
    %c0_i32 = arith.constant 0 : i32
    return %arg2, %arg1 : i32, i32
  }
  func.func @transform_2(%arg0: i32, %arg1: i32, %arg2: i32) -> (i32, i32) {
    %c0_i32 = arith.constant 0 : i32
    %c0_i32_0 = arith.constant 0 : i32
    return %c0_i32, %arg1 : i32, i32
  }
  func.func @transform_3(%arg0: i32, %arg1: i32, %arg2: i32) -> (i32, i32) {
    %c0_i32 = arith.constant 0 : i32
    return %arg0, %arg1 : i32, i32
  }
}

module attributes {stable_mosaic.version = 11 : i64} {
  func.func @_matmul_kernel(%arg0: i32, %arg1: i32, %arg2: i32, %arg3: memref<128x64xbf16, #tpu.memory_space<vmem>>, %arg4: memref<64x128xbf16, #tpu.memory_space<vmem>>, %arg5: memref<1x128xf32, #tpu.memory_space<vmem>>, %arg6: memref<128x128xf32, #tpu.memory_space<vmem>>, %arg7: memref<128x128xf32, #tpu.memory_space<vmem>>) attributes {dimension_semantics = [#tpu.dimension_semantics<parallel>, #tpu.dimension_semantics<parallel>, #tpu.dimension_semantics<arbitrary>], iteration_bounds = array<i64: 1, 1, 1>, scalar_prefetch = 0 : i64, scratch_operands = 1 : i64, tpu.core_type = #tpu.core_type<tc>, window_params = [{transform_indices = @transform_0, window_bounds = array<i64: 128, 64>}, {transform_indices = @transform_1, window_bounds = array<i64: 64, 128>}, {transform_indices = @transform_2, window_bounds = array<i64: 1, 128>}, {transform_indices = @transform_3, window_bounds = array<i64: 128, 128>}]} {
    %c0_i32 = arith.constant 0 : i32
    %0 = arith.cmpi eq, %arg2, %c0_i32 : i32
    %1 = arith.extui %0 : i1 to i32
    %c0_i32_0 = arith.constant 0 : i32
    %2 = arith.cmpi ne, %1, %c0_i32_0 : i32
    scf.if %2 {
      %cst_10 = arith.constant 0.000000e+00 : f32
      %12 = vector.broadcast %cst_10 : f32 to vector<128x128xf32>
      %c0_11 = arith.constant 0 : index
      %c0_12 = arith.constant 0 : index
      %13 = vector.load %arg7[%c0_11, %c0_12] : memref<128x128xf32, #tpu.memory_space<vmem>>, vector<128x128xf32>
      tpu.vector_store %arg7[%c0_11, %c0_12], %12 {strides = array<i32>} : memref<128x128xf32, #tpu.memory_space<vmem>>, vector<128x128xf32>,
    } else {
    }
    %c0 = arith.constant 0 : index
    %c0_1 = arith.constant 0 : index
    %3 = vector.load %arg7[%c0, %c0_1] : memref<128x128xf32, #tpu.memory_space<vmem>>, vector<128x128xf32>
    %c0_2 = arith.constant 0 : index
    %c0_3 = arith.constant 0 : index
    %4 = vector.load %arg3[%c0_2, %c0_3] : memref<128x64xbf16, #tpu.memory_space<vmem>>, vector<128x64xbf16>
    %c0_4 = arith.constant 0 : index
    %c0_5 = arith.constant 0 : index
    %5 = vector.load %arg4[%c0_4, %c0_5] : memref<64x128xbf16, #tpu.memory_space<vmem>>, vector<64x128xbf16>
    %cst = arith.constant dense<0.000000e+00> : vector<128x128xf32>
    %6 = tpu.matmul %4, %5, %cst {dimension_numbers = #tpu.dot_dimension_numbers<[1], [0], [0], [1], [0, 0, 1, 1], [], []>} : vector<128x64xbf16>, vector<64x128xbf16>, vector<128x128xf32> -> vector<128x128xf32>
    %7 = arith.addf %3, %6 : vector<128x128xf32>
    %c0_6 = arith.constant 0 : index
    %c0_7 = arith.constant 0 : index
    %8 = vector.load %arg7[%c0_6, %c0_7] : memref<128x128xf32, #tpu.memory_space<vmem>>, vector<128x128xf32>
    tpu.vector_store %arg7[%c0_6, %c0_7], %7 {strides = array<i32>} : memref<128x128xf32, #tpu.memory_space<vmem>>, vector<128x128xf32>,
    %c0_i32_8 = arith.constant 0 : i32
    %9 = arith.cmpi eq, %arg2, %c0_i32_8 : i32
    %10 = arith.extui %9 : i1 to i32
    %c0_i32_9 = arith.constant 0 : i32
    %11 = arith.cmpi ne, %10, %c0_i32_9 : i32
    scf.if %11 {
      %c0_10 = arith.constant 0 : index
      %c0_11 = arith.constant 0 : index
      %12 = vector.load %arg7[%c0_10, %c0_11] : memref<128x128xf32, #tpu.memory_space<vmem>>, vector<128x128xf32>
      %c0_12 = arith.constant 0 : index
      %c0_13 = arith.constant 0 : index
      %13 = vector.load %arg5[%c0_12, %c0_13] : memref<1x128xf32, #tpu.memory_space<vmem>>, vector<1x128xf32>
      %14 = vector.broadcast %13 : vector<1x128xf32> to vector<128x128xf32>
      %15 = arith.addf %12, %14 : vector<128x128xf32>
      %c0_14 = arith.constant 0 : index
      %c0_15 = arith.constant 0 : index
      %16 = vector.load %arg6[%c0_14, %c0_15] : memref<128x128xf32, #tpu.memory_space<vmem>>, vector<128x128xf32>
      tpu.vector_store %arg6[%c0_14, %c0_15], %15 {strides = array<i32>} : memref<128x128xf32, #tpu.memory_space<vmem>>, vector<128x128xf32>,
    } else {
    }
    return
  }
  func.func @transform_0(%arg0: i32, %arg1: i32, %arg2: i32) -> (i32, i32) {
    %c0_i32 = arith.constant 0 : i32
    return %arg0, %arg2 : i32, i32
  }
  func.func @transform_1(%arg0: i32, %arg1: i32, %arg2: i32) -> (i32, i32) {
    %c0_i32 = arith.constant 0 : i32
    return %arg2, %arg1 : i32, i32
  }
  func.func @transform_2(%arg0: i32, %arg1: i32, %arg2: i32) -> (i32, i32) {
    %c0_i32 = arith.constant 0 : i32
    %c0_i32_0 = arith.constant 0 : i32
    return %c0_i32, %arg1 : i32, i32
  }
  func.func @transform_3(%arg0: i32, %arg1: i32, %arg2: i32) -> (i32, i32) {
    %c0_i32 = arith.constant 0 : i32
    return %arg0, %arg1 : i32, i32
  }
}

module attributes {stable_mosaic.version = 11 : i64} {
  func.func @_matmul_kernel(%arg0: i32, %arg1: i32, %arg2: i32, %arg3: memref<256x392xbf16, #tpu.memory_space<vmem>>, %arg4: memref<392x128xbf16, #tpu.memory_space<vmem>>, %arg5: memref<1x128xf32, #tpu.memory_space<vmem>>, %arg6: memref<256x128xf32, #tpu.memory_space<vmem>>, %arg7: memref<256x128xf32, #tpu.memory_space<vmem>>) attributes {dimension_semantics = [#tpu.dimension_semantics<parallel>, #tpu.dimension_semantics<parallel>, #tpu.dimension_semantics<arbitrary>], iteration_bounds = array<i64: 2, 1, 1>, scalar_prefetch = 0 : i64, scratch_operands = 1 : i64, tpu.core_type = #tpu.core_type<tc>, window_params = [{transform_indices = @transform_0, window_bounds = array<i64: 256, 392>}, {transform_indices = @transform_1, window_bounds = array<i64: 392, 128>}, {transform_indices = @transform_2, window_bounds = array<i64: 1, 128>}, {transform_indices = @transform_3, window_bounds = array<i64: 256, 128>}]} {
    %c0_i32 = arith.constant 0 : i32
    %0 = arith.cmpi eq, %arg2, %c0_i32 : i32
    %1 = arith.extui %0 : i1 to i32
    %c0_i32_0 = arith.constant 0 : i32
    %2 = arith.cmpi ne, %1, %c0_i32_0 : i32
    scf.if %2 {
      %cst_10 = arith.constant 0.000000e+00 : f32
      %12 = vector.broadcast %cst_10 : f32 to vector<256x128xf32>
      %c0_11 = arith.constant 0 : index
      %c0_12 = arith.constant 0 : index
      %13 = vector.load %arg7[%c0_11, %c0_12] : memref<256x128xf32, #tpu.memory_space<vmem>>, vector<256x128xf32>
      tpu.vector_store %arg7[%c0_11, %c0_12], %12 {strides = array<i32>} : memref<256x128xf32, #tpu.memory_space<vmem>>, vector<256x128xf32>,
    } else {
    }
    %c0 = arith.constant 0 : index
    %c0_1 = arith.constant 0 : index
    %3 = vector.load %arg7[%c0, %c0_1] : memref<256x128xf32, #tpu.memory_space<vmem>>, vector<256x128xf32>
    %c0_2 = arith.constant 0 : index
    %c0_3 = arith.constant 0 : index
    %4 = vector.load %arg3[%c0_2, %c0_3] : memref<256x392xbf16, #tpu.memory_space<vmem>>, vector<256x392xbf16>
    %c0_4 = arith.constant 0 : index
    %c0_5 = arith.constant 0 : index
    %5 = vector.load %arg4[%c0_4, %c0_5] : memref<392x128xbf16, #tpu.memory_space<vmem>>, vector<392x128xbf16>
    %cst = arith.constant dense<0.000000e+00> : vector<256x128xf32>
    %6 = tpu.matmul %4, %5, %cst {dimension_numbers = #tpu.dot_dimension_numbers<[1], [0], [0], [1], [0, 0, 1, 1], [], []>} : vector<256x392xbf16>, vector<392x128xbf16>, vector<256x128xf32> -> vector<256x128xf32>
    %7 = arith.addf %3, %6 : vector<256x128xf32>
    %c0_6 = arith.constant 0 : index
    %c0_7 = arith.constant 0 : index
    %8 = vector.load %arg7[%c0_6, %c0_7] : memref<256x128xf32, #tpu.memory_space<vmem>>, vector<256x128xf32>
    tpu.vector_store %arg7[%c0_6, %c0_7], %7 {strides = array<i32>} : memref<256x128xf32, #tpu.memory_space<vmem>>, vector<256x128xf32>,
    %c0_i32_8 = arith.constant 0 : i32
    %9 = arith.cmpi eq, %arg2, %c0_i32_8 : i32
    %10 = arith.extui %9 : i1 to i32
    %c0_i32_9 = arith.constant 0 : i32
    %11 = arith.cmpi ne, %10, %c0_i32_9 : i32
    scf.if %11 {
      %c0_10 = arith.constant 0 : index
      %c0_11 = arith.constant 0 : index
      %12 = vector.load %arg7[%c0_10, %c0_11] : memref<256x128xf32, #tpu.memory_space<vmem>>, vector<256x128xf32>
      %c0_12 = arith.constant 0 : index
      %c0_13 = arith.constant 0 : index
      %13 = vector.load %arg5[%c0_12, %c0_13] : memref<1x128xf32, #tpu.memory_space<vmem>>, vector<1x128xf32>
      %14 = vector.broadcast %13 : vector<1x128xf32> to vector<256x128xf32>
      %15 = arith.addf %12, %14 : vector<256x128xf32>
      %16 = arith.negf %15 : vector<256x128xf32>
      %17 = math.exp %16 : vector<256x128xf32>
      %cst_14 = arith.constant 1.000000e+00 : f32
      %18 = vector.broadcast %cst_14 : f32 to vector<256x128xf32>
      %19 = arith.addf %18, %17 : vector<256x128xf32>
      %20 = arith.divf %18, %19 : vector<256x128xf32>
      %c0_15 = arith.constant 0 : index
      %c0_16 = arith.constant 0 : index
      %21 = vector.load %arg6[%c0_15, %c0_16] : memref<256x128xf32, #tpu.memory_space<vmem>>, vector<256x128xf32>
      tpu.vector_store %arg6[%c0_15, %c0_16], %20 {strides = array<i32>} : memref<256x128xf32, #tpu.memory_space<vmem>>, vector<256x128xf32>,
    } else {
    }
    return
  }
  func.func @transform_0(%arg0: i32, %arg1: i32, %arg2: i32) -> (i32, i32) {
    %c0_i32 = arith.constant 0 : i32
    return %arg0, %arg2 : i32, i32
  }
  func.func @transform_1(%arg0: i32, %arg1: i32, %arg2: i32) -> (i32, i32) {
    %c0_i32 = arith.constant 0 : i32
    return %arg2, %arg1 : i32, i32
  }
  func.func @transform_2(%arg0: i32, %arg1: i32, %arg2: i32) -> (i32, i32) {
    %c0_i32 = arith.constant 0 : i32
    %c0_i32_0 = arith.constant 0 : i32
    return %c0_i32, %arg1 : i32, i32
  }
  func.func @transform_3(%arg0: i32, %arg1: i32, %arg2: i32) -> (i32, i32) {
    %c0_i32 = arith.constant 0 : i32
    return %arg0, %arg1 : i32, i32
  }
}

</mosaic_0001>

<bundles_post_ra>
// kernel: spade_generator_forward.34
= control target key start
LH: loop header
LB: loop body
LE: loop exit
PB: predicated region body
PF: predicated region fallthrough
CT: control target
= control target key end

     0   :  { %s549_s6 = smov 0   ;;  %s1093_s0 = inlined_call_operand.vmem [shape: f32[2,256,8], index: 0, kind: input, shape index: {}]   ;;  %s1094_s1 = inlined_call_operand.vmem [shape: f32[2,256,8], index: 1, kind: output, shape index: {}]  }
   0x1 LB: > { %s508_s7 = sadd.s32 4294967295, %s537_s6   ;;  %p512_p0 = scmp.ge.s32.totalorder %s537_s6, 1  ;;  %s537_s6 = sphi %s549_s6, %s11_s6  }
   0x2   : > { %p87_p1 = scmp.lt.s32.totalorder %s537_s6, 3 }
   0x4   : > { %p88_p2 = pnand %p512_p0, %p87_p1 }
   0x5   : > { %p107_p3 = scmp.lt.s32.totalorder (!%p88_p2), %s508_s7, 1 }
   0x6   : > { %91 = sbr.rel (%p88_p2) target bundleno = 210 (0xd2), region = 24 }
   0xb   : > { %s1096_s7 = smov (!%p107_p3, %s508_s7), 1  ;;  %vm149_vm0 = vcmask 64512  }
   0xc   : > { %s519_s8 = sshll.u32 %s1096_s7, 8 }
   0xd   : > { %s565_s11 = scalar_lea.vmem %s1093_s0, %s519_s8  ;;  %s968_s14 = scalar_lea.vmem %s1094_s1, %s519_s8 }
   0xe   : > { %v568_v0 = vld [vmem:[%s565_s11] sm:$0xff]  ;;  %v571_v1 = vld [vmem:[%s565_s11 + $0x8] sm:$0xff]  ;;  %v574_v2 = vld [vmem:[%s565_s11 + $0x10] sm:$0xff] }
   0xf   : > { %v577_v3 = vld [vmem:[%s565_s11 + $0x18] sm:$0xff]  ;;  %v150_v4 = vsel %vm149_vm0, %v568_v0, 0.0  ;;  %v151_v5 = vsel %vm149_vm0, %v571_v1, 0.0  ;;  %v153_v6 = vsel %vm149_vm0, %v574_v2, 0.0  ;;  %v586_v7 = vld [vmem:[%s565_s11 + $0x20] sm:$0xff]  ;;  %v591_v10 = vld [vmem:[%s565_s11 + $0x28] sm:$0xff] }
  0x10   : > { %v152_v8 = vadd.f32 %v151_v5, %v150_v4  ;;  %v155_v9 = vsel %vm149_vm0, %v577_v3, 0.0  ;;  %v157_v12 = vsel %vm149_vm0, %v586_v7, 0.0  ;;  %v596_v13 = vld [vmem:[%s565_s11 + $0x30] sm:$0xff]  ;;  %v159_v15 = vsel %vm149_vm0, %v591_v10, 0.0  ;;  %v601_v16 = vld [vmem:[%s565_s11 + $0x38] sm:$0xff]  ;;  %v606_v19 = vld [vmem:[%s565_s11 + $0x40] sm:$0xff] }
  0x11   : > { %v161_v18 = vsel %vm149_vm0, %v596_v13, 0.0  ;;  %v163_v21 = vsel %vm149_vm0, %v601_v16, 0.0  ;;  %v611_v22 = vld [vmem:[%s565_s11 + $0x48] sm:$0xff]  ;;  %v165_v24 = vsel %vm149_vm0, %v606_v19, 0.0  ;;  %v616_v25 = vld [vmem:[%s565_s11 + $0x50] sm:$0xff]  ;;  %v621_v28 = vld [vmem:[%s565_s11 + $0x58] sm:$0xff] }
  0x12   : > { %v154_v11 = vadd.f32 %v153_v6, %v152_v8  ;;  %v167_v27 = vsel %vm149_vm0, %v611_v22, 0.0  ;;  %v169_v30 = vsel %vm149_vm0, %v616_v25, 0.0  ;;  %v626_v31 = vld [vmem:[%s565_s11 + $0x60] sm:$0xff]  ;;  %v171_v33 = vsel %vm149_vm0, %v621_v28, 0.0  ;;  %v631_v34 = vld [vmem:[%s565_s11 + $0x68] sm:$0xff]  ;;  %v636_v37 = vld [vmem:[%s565_s11 + $0x70] sm:$0xff] }
  0x13   : > { %v173_v36 = vsel %vm149_vm0, %v626_v31, 0.0  ;;  %v175_v39 = vsel %vm149_vm0, %v631_v34, 0.0  ;;  %v641_v40 = vld [vmem:[%s565_s11 + $0x78] sm:$0xff]  ;;  %v177_v42 = vsel %vm149_vm0, %v636_v37, 0.0  ;;  %v646_v43 = vld [vmem:[%s565_s11 + $0x80] sm:$0xff]  ;;  %v651_v46 = vld [vmem:[%s565_s11 + $0x88] sm:$0xff] }
  0x14   : > { %v156_v14 = vadd.f32 %v155_v9, %v154_v11  ;;  %v179_v45 = vsel %vm149_vm0, %v641_v40, 0.0  ;;  %v181_v48 = vsel %vm149_vm0, %v646_v43, 0.0  ;;  %v656_v49 = vld [vmem:[%s565_s11 + $0x90] sm:$0xff]  ;;  %v183_v51 = vsel %vm149_vm0, %v651_v46, 0.0  ;;  %v661_v52 = vld [vmem:[%s565_s11 + $0x98] sm:$0xff]  ;;  %v666_v55 = vld [vmem:[%s565_s11 + $0xa0] sm:$0xff] }
  0x15   : > { %v185_v54 = vsel %vm149_vm0, %v656_v49, 0.0  ;;  %v187_v57 = vsel %vm149_vm0, %v661_v52, 0.0  ;;  %v671_v58 = vld [vmem:[%s565_s11 + $0xa8] sm:$0xff]  ;;  %v189_v60 = vsel %vm149_vm0, %v666_v55, 0.0  ;;  %v676_v61 = vld [vmem:[%s565_s11 + $0xb0] sm:$0xff]  ;;  %v681_v4 = vld [vmem:[%s565_s11 + $0xb8] sm:$0xff] }
  0x16   : > { %v158_v17 = vadd.f32 %v157_v12, %v156_v14  ;;  %v191_v63 = vsel %vm149_vm0, %v671_v58, 0.0  ;;  %v193_v6 = vsel %vm149_vm0, %v676_v61, 0.0  ;;  %v686_v8 = vld [vmem:[%s565_s11 + $0xc0] sm:$0xff]  ;;  %v195_v11 = vsel %vm149_vm0, %v681_v4, 0.0  ;;  %v691_v12 = vld [vmem:[%s565_s11 + $0xc8] sm:$0xff] }
  0x18   : > { %v160_v20 = vadd.f32 %v159_v15, %v158_v17  ;;  %v197_v15 = vsel %vm149_vm0, %v686_v8, 0.0  ;;  %v696_v17 = vld [vmem:[%s565_s11 + $0xd0] sm:$0xff] }
  0x1a   : > { %v162_v23 = vadd.f32 %v161_v18, %v160_v20  ;;  %v199_v20 = vsel %vm149_vm0, %v691_v12, 0.0 }
  0x1c   : > { %v164_v26 = vadd.f32 %v163_v21, %v162_v23  ;;  %v701_v21 = vld [vmem:[%s565_s11 + $0xd8] sm:$0xff] }
  0x1e   : > { %v166_v29 = vadd.f32 %v165_v24, %v164_v26  ;;  %v201_v24 = vsel %vm149_vm0, %v696_v17, 0.0  ;;  %v706_v26 = vld [vmem:[%s565_s11 + $0xe0] sm:$0xff] }
  0x20   : > { %v168_v32 = vadd.f32 %v167_v27, %v166_v29  ;;  %v203_v29 = vsel %vm149_vm0, %v701_v21, 0.0 }
  0x22   : > { %v170_v35 = vadd.f32 %v169_v30, %v168_v32  ;;  %v711_v30 = vld [vmem:[%s565_s11 + $0xe8] sm:$0xff] }
  0x24   : > { %v172_v38 = vadd.f32 %v171_v33, %v170_v35  ;;  %v205_v33 = vsel %vm149_vm0, %v706_v26, 0.0  ;;  %v716_v35 = vld [vmem:[%s565_s11 + $0xf0] sm:$0xff] }
  0x26   : > { %v174_v41 = vadd.f32 %v173_v36, %v172_v38  ;;  %v207_v38 = vsel %vm149_vm0, %v711_v30, 0.0 }
  0x28   : > { %v176_v44 = vadd.f32 %v175_v39, %v174_v41  ;;  %v721_v39 = vld [vmem:[%s565_s11 + $0xf8] sm:$0xff] }
  0x2a   : > { %v178_v47 = vadd.f32 %v177_v42, %v176_v44  ;;  %v209_v42 = vsel %vm149_vm0, %v716_v35, 0.0 }
  0x2c   : > { %v180_v50 = vadd.f32 %v179_v45, %v178_v47  ;;  %v211_v45 = vsel %vm149_vm0, %v721_v39, 0.0 }
  0x2e   : > { %v182_v53 = vadd.f32 %v181_v48, %v180_v50 }
  0x30   : > { %v184_v56 = vadd.f32 %v183_v51, %v182_v53 }
  0x32   : > { %v186_v59 = vadd.f32 %v185_v54, %v184_v56 }
  0x34   : > { %v188_v62 = vadd.f32 %v187_v57, %v186_v59 }
  0x36   : > { %v190_v5 = vadd.f32 %v189_v60, %v188_v62 }
  0x38   : > { %v192_v9 = vadd.f32 %v191_v63, %v190_v5 }
  0x3a   : > { %v194_v14 = vadd.f32 %v193_v6, %v192_v9 }
  0x3c   : > { %v196_v18 = vadd.f32 %v195_v11, %v194_v14 }
  0x3e   : > { %v198_v23 = vadd.f32 %v197_v15, %v196_v18 }
  0x40   : > { %v200_v27 = vadd.f32 %v199_v20, %v198_v23 }
  0x42   : > { %v202_v32 = vadd.f32 %v201_v24, %v200_v27 }
  0x44   : > { %v204_v36 = vadd.f32 %v203_v29, %v202_v32 }
  0x46   : > { %v206_v41 = vadd.f32 %v205_v33, %v204_v36 }
  0x48   : > { %v208_v44 = vadd.f32 %v207_v38, %v206_v41 }
  0x4a   : > { %v210_v47 = vadd.f32 %v209_v42, %v208_v44 }
  0x4c   : > { %v212_v48 = vadd.f32 %v211_v45, %v210_v47 }
  0x4e   : > { %v213_v50 = vrot.slane %v212_v48, 4 }
  0x50   : > { %v214_v51 = vadd.f32 %v213_v50, %v212_v48 }
  0x52   : > { %v215_v53 = vrot.slane %v214_v51, 2 }
  0x54   : > { %v216_v54 = vadd.f32 %v215_v53, %v214_v51 }
  0x56   : > { %v217_v56 = vrot.slane %v216_v54, 1 }
  0x58   : > { %v218_v57 = vadd.f32 %v217_v56, %v216_v54 }
  0x5a   : > { %v727_v59 = vmul.f32 0.00390625, %v218_v57 }
  0x5c   : > { %v731_v60 = vsub.f32 %v568_v0, %v727_v59  ;;  %v735_v62 = vsub.f32 %v571_v1, %v727_v59  ;;  %v739_v63 = vsub.f32 %v574_v2, %v727_v59  ;;  %v743_v5 = vsub.f32 %v577_v3, %v727_v59 }
  0x5d   : > { %v747_v6 = vsub.f32 %v586_v7, %v727_v59  ;;  %v757_v2 = vsub.f32 %v591_v10, %v727_v59  ;;  %v763_v7 = vsub.f32 %v596_v13, %v727_v59  ;;  %v772_v10 = vsub.f32 %v601_v16, %v727_v59 }
  0x5e   : > { %v253_v0 = vmul.f32 %v731_v60, %v731_v60  ;;  %v254_v9 = vmul.f32 %v735_v62, %v735_v62  ;;  %v255_v1 = vmul.f32 %v739_v63, %v739_v63  ;;  %v256_v3 = vmul.f32 %v743_v5, %v743_v5 }
  0x5f   : > { %v257_v11 = vmul.f32 %v747_v6, %v747_v6  ;;  %v258_v23 = vmul.f32 %v757_v2, %v757_v2  ;;  %v779_v27 = vsub.f32 %v606_v19, %v727_v59  ;;  %v259_v29 = vmul.f32 %v763_v7, %v763_v7 }
  0x60   : > { %v285_v14 = vsel %vm149_vm0, %v253_v0, 0.0  ;;  %v286_v15 = vsel %vm149_vm0, %v254_v9, 0.0  ;;  %v288_v18 = vsel %vm149_vm0, %v255_v1, 0.0  ;;  %v290_v13 = vsel %vm149_vm0, %v256_v3, 0.0 }
  0x61   : > { %v287_v20 = vadd.f32 %v286_v15, %v285_v14  ;;  %v292_v32 = vsel %vm149_vm0, %v257_v11, 0.0  ;;  %v786_v16 = vsub.f32 %v611_v22, %v727_v59  ;;  %v260_v36 = vmul.f32 %v772_v10, %v772_v10 }
  0x62   : > { %v294_v38 = vsel %vm149_vm0, %v258_v23, 0.0  ;;  %v793_v19 = vsub.f32 %v616_v25, %v727_v59  ;;  %v261_v42 = vmul.f32 %v779_v27, %v779_v27  ;;  %v296_v44 = vsel %vm149_vm0, %v259_v29, 0.0 }
  0x63   : > { %v289_v24 = vadd.f32 %v288_v18, %v287_v20  ;;  %v800_v22 = vsub.f32 %v621_v28, %v727_v59  ;;  %v262_v47 = vmul.f32 %v786_v16, %v786_v16  ;;  %v298_v48 = vsel %vm149_vm0, %v260_v36, 0.0 }
  0x64   : > { %v807_v25 = vsub.f32 %v626_v31, %v727_v59  ;;  %v263_v51 = vmul.f32 %v793_v19, %v793_v19  ;;  %v300_v53 = vsel %vm149_vm0, %v261_v42, 0.0  ;;  %v814_v28 = vsub.f32 %v631_v34, %v727_v59 }
  0x65   : > { %v291_v33 = vadd.f32 %v290_v13, %v289_v24  ;;  %v264_v56 = vmul.f32 %v800_v22, %v800_v22  ;;  %v302_v57 = vsel %vm149_vm0, %v262_v47, 0.0  ;;  %v821_v31 = vsub.f32 %v636_v37, %v727_v59 }
  0x66   : > { %v265_v9 = vmul.f32 %v807_v25, %v807_v25  ;;  %v304_v1 = vsel %vm149_vm0, %v263_v51, 0.0  ;;  %v828_v34 = vsub.f32 %v641_v40, %v727_v59  ;;  %v266_v11 = vmul.f32 %v814_v28, %v814_v28 }
  0x67   : > { %v293_v41 = vadd.f32 %v292_v32, %v291_v33  ;;  %v306_v14 = vsel %vm149_vm0, %v264_v56, 0.0  ;;  %v835_v37 = vsub.f32 %v646_v43, %v727_v59  ;;  %v267_v18 = vmul.f32 %v821_v31, %v821_v31 }
  0x68   : > { %v308_v20 = vsel %vm149_vm0, %v265_v9, 0.0  ;;  %v842_v40 = vsub.f32 %v651_v46, %v727_v59  ;;  %v268_v13 = vmul.f32 %v828_v34, %v828_v34  ;;  %v310_v24 = vsel %vm149_vm0, %v266_v11, 0.0 }
  0x69   : > { %v295_v45 = vadd.f32 %v294_v38, %v293_v41  ;;  %v849_v43 = vsub.f32 %v656_v49, %v727_v59  ;;  %v269_v32 = vmul.f32 %v835_v37, %v835_v37  ;;  %v312_v33 = vsel %vm149_vm0, %v267_v18, 0.0 }
  0x6a   : > { %v856_v46 = vsub.f32 %v661_v52, %v727_v59  ;;  %v270_v38 = vmul.f32 %v842_v40, %v842_v40  ;;  %v314_v41 = vsel %vm149_vm0, %v268_v13, 0.0  ;;  %v863_v49 = vsub.f32 %v666_v55, %v727_v59 }
  0x6b   : > { %v297_v50 = vadd.f32 %v296_v44, %v295_v45  ;;  %v271_v44 = vmul.f32 %v849_v43, %v849_v43  ;;  %v316_v45 = vsel %vm149_vm0, %v269_v32, 0.0  ;;  %v870_v52 = vsub.f32 %v671_v58, %v727_v59 }
  0x6c   : > { %v877_v55 = vsub.f32 %v676_v61, %v727_v59  ;;  %v884_v58 = vsub.f32 %v681_v4, %v727_v59  ;;  %v891_v61 = vsub.f32 %v686_v8, %v727_v59  ;;  %v898_v4 = vsub.f32 %v691_v12, %v727_v59 }
  0x6d   : > { %v299_v54 = vadd.f32 %v298_v48, %v297_v50  ;;  %v272_v48 = vmul.f32 %v856_v46, %v856_v46  ;;  %v318_v50 = vsel %vm149_vm0, %v270_v38, 0.0  ;;  %v905_v8 = vsub.f32 %v696_v17, %v727_v59 }
  0x6e   : > { %v912_v12 = vsub.f32 %v701_v21, %v727_v59  ;;  %v919_v17 = vsub.f32 %v706_v26, %v727_v59  ;;  %v926_v21 = vsub.f32 %v711_v30, %v727_v59  ;;  %v933_v26 = vsub.f32 %v716_v35, %v727_v59 }
  0x6f   : > { %v301_v0 = vadd.f32 %v300_v53, %v299_v54  ;;  %v273_v53 = vmul.f32 %v863_v49, %v863_v49  ;;  %v320_v54 = vsel %vm149_vm0, %v271_v44, 0.0  ;;  %v940_v30 = vsub.f32 %v721_v39, %v727_v59 }
  0x70   : > { %v283_v35 = vmul.f32 %v933_v26, %v933_v26 }
  0x71   : > { %v303_v3 = vadd.f32 %v302_v57, %v301_v0  ;;  %v274_v57 = vmul.f32 %v870_v52, %v870_v52  ;;  %v322_v0 = vsel %vm149_vm0, %v272_v48, 0.0 }
  0x72   : > { %v344_v39 = vsel %vm149_vm0, %v283_v35, 0.0 }
  0x73   : > { %v305_v15 = vadd.f32 %v304_v1, %v303_v3  ;;  %v275_v1 = vmul.f32 %v877_v55, %v877_v55  ;;  %v324_v3 = vsel %vm149_vm0, %v273_v53, 0.0 }
  0x75   : > { %v307_v23 = vadd.f32 %v306_v14, %v305_v15  ;;  %v276_v14 = vmul.f32 %v884_v58, %v884_v58  ;;  %v326_v15 = vsel %vm149_vm0, %v274_v57, 0.0  ;;  %v284_v57 = vmul.f32 %v940_v30, %v940_v30 }
  0x77   : > { %v309_v29 = vadd.f32 %v308_v20, %v307_v23  ;;  %v277_v20 = vmul.f32 %v891_v61, %v891_v61  ;;  %v328_v23 = vsel %vm149_vm0, %v275_v1, 0.0  ;;  %v346_v1 = vsel %vm149_vm0, %v284_v57, 0.0 }
  0x79   : > { %v311_v36 = vadd.f32 %v310_v24, %v309_v29  ;;  %v278_v24 = vmul.f32 %v898_v4, %v898_v4  ;;  %v330_v29 = vsel %vm149_vm0, %v276_v14, 0.0 }
  0x7b   : > { %v313_v42 = vadd.f32 %v312_v33, %v311_v36  ;;  %v279_v33 = vmul.f32 %v905_v8, %v905_v8  ;;  %v332_v36 = vsel %vm149_vm0, %v277_v20, 0.0 }
  0x7d   : > { %v315_v47 = vadd.f32 %v314_v41, %v313_v42  ;;  %v280_v41 = vmul.f32 %v912_v12, %v912_v12  ;;  %v334_v42 = vsel %vm149_vm0, %v278_v24, 0.0 }
  0x7f   : > { %v317_v51 = vadd.f32 %v316_v45, %v315_v47  ;;  %v281_v45 = vmul.f32 %v919_v17, %v919_v17  ;;  %v336_v47 = vsel %vm149_vm0, %v279_v33, 0.0 }
  0x81   : > { %v319_v56 = vadd.f32 %v318_v50, %v317_v51  ;;  %v282_v50 = vmul.f32 %v926_v21, %v926_v21  ;;  %v338_v51 = vsel %vm149_vm0, %v280_v41, 0.0 }
  0x83   : > { %v321_v9 = vadd.f32 %v320_v54, %v319_v56  ;;  %v340_v54 = vsel %vm149_vm0, %v281_v45, 0.0 }
  0x85   : > { %v323_v11 = vadd.f32 %v322_v0, %v321_v9  ;;  %v342_v0 = vsel %vm149_vm0, %v282_v50, 0.0 }
  0x87   : > { %v325_v18 = vadd.f32 %v324_v3, %v323_v11 }
  0x89   : > { %v327_v13 = vadd.f32 %v326_v15, %v325_v18 }
  0x8b   : > { %v329_v32 = vadd.f32 %v328_v23, %v327_v13 }
  0x8d   : > { %v331_v38 = vadd.f32 %v330_v29, %v329_v32 }
  0x8f   : > { %v333_v44 = vadd.f32 %v332_v36, %v331_v38 }
  0x91   : > { %v335_v48 = vadd.f32 %v334_v42, %v333_v44 }
  0x93   : > { %v337_v53 = vadd.f32 %v336_v47, %v335_v48 }
  0x95   : > { %v339_v56 = vadd.f32 %v338_v51, %v337_v53 }
  0x97   : > { %v341_v9 = vadd.f32 %v340_v54, %v339_v56 }
  0x99   : > { %v343_v59 = vadd.f32 %v342_v0, %v341_v9 }
  0x9b   : > { %v345_v3 = vadd.f32 %v344_v39, %v343_v59 }
  0x9d   : > { %v347_v11 = vadd.f32 %v346_v1, %v345_v3 }
  0x9f   : > { %v348_v14 = vrot.slane %v347_v11, 4 }
  0xa1   : > { %v349_v15 = vadd.f32 %v348_v14, %v347_v11 }
  0xa3   : > { %v350_v18 = vrot.slane %v349_v15, 2 }
  0xa5   : > { %v351_v20 = vadd.f32 %v350_v18, %v349_v15 }
  0xa7   : > { %v352_v23 = vrot.slane %v351_v20, 1 }
  0xa9   : > { %v353_v13 = vadd.f32 %v352_v23, %v351_v20 }
  0xab   : > { %v354_v24 = vmul.f32 0.00390625, %v353_v13 }
  0xad   : > { %v355_v29 = vadd.f32 1e-05, %v354_v24 }
  0xaf   : > { %529 = vrsqrt.f32 %v355_v29 }
  0xbc   : > { %v953_v32 = vpop.eup %529 }
  0xbd   : > { %v357_v33 = vmul.f32 %v953_v32, %v731_v60  ;;  %v358_v36 = vmul.f32 %v953_v32, %v735_v62  ;;  %v359_v38 = vmul.f32 %v953_v32, %v739_v63  ;;  %v360_v41 = vmul.f32 %v953_v32, %v743_v5 }
  0xbe   : > { %v361_v60 = vmul.f32 %v953_v32, %v747_v6  ;;  %v362_v62 = vmul.f32 %v953_v32, %v757_v2  ;;  %v363_v63 = vmul.f32 %v953_v32, %v763_v7  ;;  %v364_v5 = vmul.f32 %v953_v32, %v772_v10 }
  0xbf   : > { %v389_v42 = vmax.f32 %v357_v33, 0.0  ;;  %v390_v44 = vmax.f32 %v358_v36, 0.0  ;;  %v391_v45 = vmax.f32 %v359_v38, 0.0  ;;  %v392_v47 = vmax.f32 %v360_v41, 0.0 }
  0xc0   : > { %v393_v48 = vmax.f32 %v361_v60, 0.0  ;;  %v394_v50 = vmax.f32 %v362_v62, 0.0  ;;  %v395_v6 = vmax.f32 %v363_v63, 0.0  ;;  %v396_v51 = vmax.f32 %v364_v5, 0.0 }
  0xc1   : > { %421 = vst.msk [vmem:[%s968_s14] sm:$0xff] %vm149_vm0, %v389_v42  ;;  %422 = vst.msk [vmem:[%s968_s14 + $0x8] sm:$0xff] %vm149_vm0, %v390_v44  ;;  %v365_v2 = vmul.f32 %v953_v32, %v779_v27  ;;  %v366_v7 = vmul.f32 %v953_v32, %v786_v16  ;;  %v367_v10 = vmul.f32 %v953_v32, %v793_v19 }
  0xc2   : > { %423 = vst.msk [vmem:[%s968_s14 + $0x10] sm:$0xff] %vm149_vm0, %v391_v45  ;;  %424 = vst.msk [vmem:[%s968_s14 + $0x18] sm:$0xff] %vm149_vm0, %v392_v47  ;;  %v368_v53 = vmul.f32 %v953_v32, %v800_v22  ;;  %v369_v27 = vmul.f32 %v953_v32, %v807_v25  ;;  %v370_v16 = vmul.f32 %v953_v32, %v814_v28 }
  0xc3   : > { %425 = vst.msk [vmem:[%s968_s14 + $0x20] sm:$0xff] %vm149_vm0, %v393_v48  ;;  %426 = vst.msk [vmem:[%s968_s14 + $0x28] sm:$0xff] %vm149_vm0, %v394_v50  ;;  %v371_v19 = vmul.f32 %v953_v32, %v821_v31  ;;  %v372_v22 = vmul.f32 %v953_v32, %v828_v34  ;;  %v397_v35 = vmax.f32 %v365_v2, 0.0  ;;  %v398_v54 = vmax.f32 %v366_v7, 0.0 }
  0xc4   : > { %427 = vst.msk [vmem:[%s968_s14 + $0x30] sm:$0xff] %vm149_vm0, %v395_v6  ;;  %428 = vst.msk [vmem:[%s968_s14 + $0x38] sm:$0xff] %vm149_vm0, %v396_v51  ;;  %v399_v56 = vmax.f32 %v367_v10, 0.0  ;;  %v400_v57 = vmax.f32 %v368_v53, 0.0  ;;  %v401_v0 = vmax.f32 %v369_v27, 0.0  ;;  %v402_v9 = vmax.f32 %v370_v16, 0.0 }
  0xc5   : > { %v403_v25 = vmax.f32 %v371_v19, 0.0  ;;  %v404_v39 = vmax.f32 %v372_v22, 0.0  ;;  %429 = vst.msk [vmem:[%s968_s14 + $0x40] sm:$0xff] %vm149_vm0, %v397_v35  ;;  %430 = vst.msk [vmem:[%s968_s14 + $0x48] sm:$0xff] %vm149_vm0, %v398_v54  ;;  %v373_v28 = vmul.f32 %v953_v32, %v835_v37  ;;  %v374_v31 = vmul.f32 %v953_v32, %v842_v40 }
  0xc6   : > { %431 = vst.msk [vmem:[%s968_s14 + $0x50] sm:$0xff] %vm149_vm0, %v399_v56  ;;  %432 = vst.msk [vmem:[%s968_s14 + $0x58] sm:$0xff] %vm149_vm0, %v400_v57  ;;  %v375_v34 = vmul.f32 %v953_v32, %v849_v43  ;;  %v376_v59 = vmul.f32 %v953_v32, %v856_v46  ;;  %v377_v37 = vmul.f32 %v953_v32, %v863_v49 }
  0xc7   : > { %433 = vst.msk [vmem:[%s968_s14 + $0x60] sm:$0xff] %vm149_vm0, %v401_v0  ;;  %434 = vst.msk [vmem:[%s968_s14 + $0x68] sm:$0xff] %vm149_vm0, %v402_v9  ;;  %v378_v40 = vmul.f32 %v953_v32, %v870_v52  ;;  %v379_v43 = vmul.f32 %v953_v32, %v877_v55  ;;  %v380_v46 = vmul.f32 %v953_v32, %v884_v58  ;;  %v405_v1 = vmax.f32 %v373_v28, 0.0 }
  0xc8   : > { %435 = vst.msk [vmem:[%s968_s14 + $0x70] sm:$0xff] %vm149_vm0, %v403_v25  ;;  %436 = vst.msk [vmem:[%s968_s14 + $0x78] sm:$0xff] %vm149_vm0, %v404_v39  ;;  %v406_v3 = vmax.f32 %v374_v31, 0.0  ;;  %v407_v11 = vmax.f32 %v375_v34, 0.0  ;;  %v408_v14 = vmax.f32 %v376_v59, 0.0  ;;  %v409_v15 = vmax.f32 %v377_v37, 0.0 }
  0xc9   : > { %v410_v18 = vmax.f32 %v378_v40, 0.0  ;;  %v411_v49 = vmax.f32 %v379_v43, 0.0  ;;  %v412_v20 = vmax.f32 %v380_v46, 0.0  ;;  %437 = vst.msk [vmem:[%s968_s14 + $0x80] sm:$0xff] %vm149_vm0, %v405_v1  ;;  %v381_v52 = vmul.f32 %v953_v32, %v891_v61 }
  0xca   : > { %438 = vst.msk [vmem:[%s968_s14 + $0x88] sm:$0xff] %vm149_vm0, %v406_v3  ;;  %439 = vst.msk [vmem:[%s968_s14 + $0x90] sm:$0xff] %vm149_vm0, %v407_v11  ;;  %v382_v55 = vmul.f32 %v953_v32, %v898_v4  ;;  %v383_v58 = vmul.f32 %v953_v32, %v905_v8  ;;  %v384_v23 = vmul.f32 %v953_v32, %v912_v12 }
  0xcb   : > { %440 = vst.msk [vmem:[%s968_s14 + $0x98] sm:$0xff] %vm149_vm0, %v408_v14  ;;  %441 = vst.msk [vmem:[%s968_s14 + $0xa0] sm:$0xff] %vm149_vm0, %v409_v15  ;;  %v385_v61 = vmul.f32 %v953_v32, %v919_v17  ;;  %v386_v4 = vmul.f32 %v953_v32, %v926_v21  ;;  %v387_v8 = vmul.f32 %v953_v32, %v933_v26  ;;  %v413_v13 = vmax.f32 %v381_v52, 0.0 }
  0xcc   : > { %442 = vst.msk [vmem:[%s968_s14 + $0xa8] sm:$0xff] %vm149_vm0, %v410_v18  ;;  %443 = vst.msk [vmem:[%s968_s14 + $0xb0] sm:$0xff] %vm149_vm0, %v411_v49  ;;  %v388_v12 = vmul.f32 %v953_v32, %v940_v30  ;;  %v414_v24 = vmax.f32 %v382_v55, 0.0  ;;  %v415_v29 = vmax.f32 %v383_v58, 0.0  ;;  %v416_v33 = vmax.f32 %v384_v23, 0.0 }
  0xcd   : > { %444 = vst.msk [vmem:[%s968_s14 + $0xb8] sm:$0xff] %vm149_vm0, %v412_v20  ;;  %v417_v36 = vmax.f32 %v385_v61, 0.0  ;;  %v418_v38 = vmax.f32 %v386_v4, 0.0  ;;  %v419_v17 = vmax.f32 %v387_v8, 0.0  ;;  %445 = vst.msk [vmem:[%s968_s14 + $0xc0] sm:$0xff] %vm149_vm0, %v413_v13 }
  0xce   : > { %v420_v41 = vmax.f32 %v388_v12, 0.0  ;;  %446 = vst.msk [vmem:[%s968_s14 + $0xc8] sm:$0xff] %vm149_vm0, %v414_v24  ;;  %447 = vst.msk [vmem:[%s968_s14 + $0xd0] sm:$0xff] %vm149_vm0, %v415_v29 }
  0xcf   : > { %448 = vst.msk [vmem:[%s968_s14 + $0xd8] sm:$0xff] %vm149_vm0, %v416_v33  ;;  %449 = vst.msk [vmem:[%s968_s14 + $0xe0] sm:$0xff] %vm149_vm0, %v417_v36 }
  0xd0   : > { %450 = vst.msk [vmem:[%s968_s14 + $0xe8] sm:$0xff] %vm149_vm0, %v418_v38  ;;  %451 = vst.msk [vmem:[%s968_s14 + $0xf0] sm:$0xff] %vm149_vm0, %v419_v17 }
  0xd1   : > { %452 = vst.msk [vmem:[%s968_s14 + $0xf8] sm:$0xff] %vm149_vm0, %v420_v41 }
  0xd2 PF: > { %s11_s6 = sadd.s32 1, %s537_s6  }
  0xd3   : > { %p8_p4 = scmp.ge.s32.totalorder %s11_s6, 4  }
  0xd5   :  { %10 = sbr.rel (!%p8_p4) target bundleno = 1 (0x1), region = 54 }

// kernel: spade_generator_forward.33
= control target key start
LH: loop header
LB: loop body
LE: loop exit
PB: predicated region body
PF: predicated region fallthrough
CT: control target
= control target key end

     0   :  { %s1308_s12 = smov 0   ;;  %s1310_s13 = smov 0   ;;  %s1499_s0 = inlined_call_operand.vmem [shape: bf16[512,152], index: 0, kind: input, shape index: {}]   ;;  %s1500_s1 = inlined_call_operand.vmem [shape: bf16[152,128], index: 1, kind: input, shape index: {}]   ;;  %s1501_s2 = inlined_call_operand.vmem [shape: f32[1,128], index: 2, kind: input, shape index: {}]   ;;  %s1502_s3 = inlined_call_operand.vmem [shape: f32[512,128], index: 3, kind: output, shape index: {}]  }
   0x1   :  { %s1312_s14 = smov 0  }
   0x2 LB: > { %s32_s15 = sadd.s32 1, %s1281_s13  ;;  %p1092_p0 = scmp.ge.s32.totalorder %s1285_s14, 1  ;;  %s1285_s14 = sphi %s1312_s14, %s13_s14   ;;  %s1281_s13 = sphi %s1310_s13, %s1504_s13   ;;  %s1277_s12 = sphi %s1308_s12, %s1503_s12  }
   0x3   : > { %p34_p1 = scmp.ge.s32.totalorder %s32_s15, 2  ;;  %p191_p2 = scmp.lt.s32.totalorder %s1285_s14, 3 }
   0x5   : > { %s1506_s15 = smov (%p34_p1, %s32_s15), 0  ;;  %p192_p3 = pnand %p1092_p0, %p191_p2 }
   0x6   : > { %s1093_s20 = sshll.u32 (!%p192_p3), %s1277_s12, 5 }
   0x7   : > { %195 = sbr.rel (%p192_p3) target bundleno = 309 (0x135), region = 32  ;;  %p236_p4 = scmp.lt.s32.totalorder (!%p192_p3), %s1093_s20, 63 }
   0xc   : > { %v1205_v0 = vld [vmem:[%s1500_s1 + $0x38] sm:$0xff]   ;;  %v1287_v1 = vmov 0   ;;  %v1206_v2 = vld [vmem:[%s1500_s1 + $0x30] sm:$0xff]   ;;  %s1508_s20 = smov (!%p236_p4, %s1093_s20), 63  ;;  %v1207_v3 = vld [vmem:[%s1500_s1 + $0x28] sm:$0xff]   ;;  %vm588_vm0 = vcmask 195584  }
   0xd   : > { %641 = vmatprep.subr.bf16.mxu0 %v1287_v1  ;;  %1160 = vmatprep.subr.bf16.mxu1 %v1287_v1  ;;  %s1159_s23 = sshll.u32 %s1508_s20, 3  ;;  %v1208_v4 = vld [vmem:[%s1500_s1 + $0x20] sm:$0xff]   ;;  %v1209_v7 = vld [vmem:[%s1500_s1 + $0x18] sm:$0xff]   ;;  %v1210_v8 = vld [vmem:[%s1500_s1 + $0x10] sm:$0xff]   ;;  %vm637_vm1 = vcmask 1043456  }
   0xe   : > { %642 = vmatpush1.bf16.msra.mxu0 %v1205_v0  ;;  %1170 = vmatpush1.bf16.msra.mxu1 %v1205_v0  ;;  %s1343_s26 = scalar_lea.vmem %s1499_s0, %s1159_s23  ;;  %v1211_v9 = vld [vmem:[%s1500_s1 + $0x8] sm:$0xff]   ;;  %v1212_v10 = vld [vmem:[%s1500_s1] sm:$0xff]   ;;  %s1424_s22 = scalar_lea.vmem %s1502_s3, %s1159_s23 }
   0xf   : > { %643 = vmatprep.subr.bf16.mxu0 %v1287_v1  ;;  %1161 = vmatprep.subr.bf16.mxu1 %v1287_v1  ;;  %v1217_v5 = vld [vmem:[%s1343_s26 + $0x4] ss:$8 sps:$4 sm:$0xff]   ;;  %v1213_v11 = vld [vmem:[%s1500_s1 + $0x48] ss:$0 sps:$4 sm:$0xff]   ;;  %v1221_v16 = vld [vmem:[%s1343_s26 + $0x14] ss:$8 sps:$4 sm:$0xff]  }
  0x10   : > { %1140 = vmatprep.mubr.msk.bf16.mxu0 %vm588_vm0, %v1217_v5  ;;  %v1220_v6 = vld [vmem:[%s1343_s26 + $0x84] ss:$8 sps:$4 sm:$0xff]   ;;  %v639_v12 = vsel %vm637_vm1, %v1213_v11, 0  ;;  %v1215_v14 = vld [vmem:[%s1343_s26] ss:$8 sps:$4 sm:$0xff]  }
  0x11   : > { %1148 = vmatprep.mubr.msk.bf16.mxu1 %vm588_vm0, %v1220_v6  ;;  %v1214_v13 = vld [vmem:[%s1500_s1 + $0x40] sm:$0xff]   ;;  %v1223_v17 = vld [vmem:[%s1343_s26 + $0x94] ss:$8 sps:$4 sm:$0xff]   ;;  %v1225_v18 = vld [vmem:[%s1343_s26 + $0x10] ss:$8 sps:$4 sm:$0xff]  }
  0x12   : > { %644 = vmatpush1.bf16.msra.mxu0 %v1206_v2  ;;  %1171 = vmatpush1.bf16.msra.mxu1 %v1206_v2  ;;  %v1218_v15 = vld [vmem:[%s1343_s26 + $0x80] ss:$8 sps:$4 sm:$0xff]   ;;  %v1226_v19 = vld [vmem:[%s1343_s26 + $0x90] ss:$8 sps:$4 sm:$0xff]   ;;  %v1227_v20 = vld [vmem:[%s1343_s26 + $0x24] ss:$8 sps:$4 sm:$0xff]  }
  0x13   : > { %645 = vmatprep.subr.bf16.mxu0 %v1287_v1  ;;  %1162 = vmatprep.subr.bf16.mxu1 %v1287_v1  ;;  %v1229_v21 = vld [vmem:[%s1343_s26 + $0xa4] ss:$8 sps:$4 sm:$0xff]   ;;  %v1231_v22 = vld [vmem:[%s1343_s26 + $0x20] ss:$8 sps:$4 sm:$0xff]   ;;  %v1233_v24 = vld [vmem:[%s1343_s26 + $0x34] ss:$8 sps:$4 sm:$0xff]  }
  0x14   : > { %v1232_v23 = vld [vmem:[%s1343_s26 + $0xa0] ss:$8 sps:$4 sm:$0xff]   ;;  %v1235_v25 = vld [vmem:[%s1343_s26 + $0xb4] ss:$8 sps:$4 sm:$0xff]   ;;  %v1237_v26 = vld [vmem:[%s1343_s26 + $0x30] ss:$8 sps:$4 sm:$0xff]  }
  0x15   : > { %v1238_v27 = vld [vmem:[%s1343_s26 + $0xb0] ss:$8 sps:$4 sm:$0xff]   ;;  %v1239_v28 = vld [vmem:[%s1343_s26 + $0x44] ss:$8 sps:$4 sm:$0xff]   ;;  %v1243_v30 = vld [vmem:[%s1343_s26 + $0x40] ss:$8 sps:$4 sm:$0xff]  }
  0x16   : > { %646 = vmatpush1.bf16.msra.mxu0 %v1207_v3  ;;  %1172 = vmatpush1.bf16.msra.mxu1 %v1207_v3  ;;  %v1241_v29 = vld [vmem:[%s1343_s26 + $0xc4] ss:$8 sps:$4 sm:$0xff]   ;;  %v1244_v31 = vld [vmem:[%s1343_s26 + $0xc0] ss:$8 sps:$4 sm:$0xff]   ;;  %v1245_v32 = vld [vmem:[%s1343_s26 + $0x54] ss:$8 sps:$4 sm:$0xff]  }
  0x17   : > { %647 = vmatprep.subr.bf16.mxu0 %v1287_v1  ;;  %1163 = vmatprep.subr.bf16.mxu1 %v1287_v1  ;;  %v1247_v33 = vld [vmem:[%s1343_s26 + $0xd4] ss:$8 sps:$4 sm:$0xff]   ;;  %v1249_v34 = vld [vmem:[%s1343_s26 + $0x50] ss:$8 sps:$4 sm:$0xff]   ;;  %v1251_v36 = vld [vmem:[%s1343_s26 + $0x64] ss:$8 sps:$4 sm:$0xff]  }
  0x18   : > { %v1250_v35 = vld [vmem:[%s1343_s26 + $0xd0] ss:$8 sps:$4 sm:$0xff]   ;;  %v1253_v37 = vld [vmem:[%s1343_s26 + $0xe4] ss:$8 sps:$4 sm:$0xff]   ;;  %v1255_v38 = vld [vmem:[%s1343_s26 + $0x60] ss:$8 sps:$4 sm:$0xff]  }
  0x19   : > { %v1256_v39 = vld [vmem:[%s1343_s26 + $0xe0] ss:$8 sps:$4 sm:$0xff]   ;;  %v1257_v40 = vld [vmem:[%s1343_s26 + $0x74] ss:$8 sps:$4 sm:$0xff]   ;;  %v1261_v42 = vld [vmem:[%s1343_s26 + $0x70] ss:$8 sps:$4 sm:$0xff]  }
  0x1a   : > { %648 = vmatpush1.bf16.msra.mxu0 %v1208_v4  ;;  %1173 = vmatpush1.bf16.msra.mxu1 %v1208_v4  ;;  %v1259_v41 = vld [vmem:[%s1343_s26 + $0xf4] ss:$8 sps:$4 sm:$0xff]   ;;  %v1262_v43 = vld [vmem:[%s1343_s26 + $0xf0] ss:$8 sps:$4 sm:$0xff]   ;;  %v1417_v44 = vld [vmem:[%s1501_s2] ss:$0 sm:$0xff] }
  0x1b   : > { %649 = vmatprep.subr.bf16.mxu0 %v1287_v1  ;;  %1164 = vmatprep.subr.bf16.mxu1 %v1287_v1 }
  0x1e   : > { %650 = vmatpush1.bf16.msra.mxu0 %v1209_v7  ;;  %1174 = vmatpush1.bf16.msra.mxu1 %v1209_v7 }
  0x1f   : > { %651 = vmatprep.subr.bf16.mxu0 %v1287_v1  ;;  %1165 = vmatprep.subr.bf16.mxu1 %v1287_v1 }
  0x22   : > { %652 = vmatpush1.bf16.msra.mxu0 %v1210_v8  ;;  %1175 = vmatpush1.bf16.msra.mxu1 %v1210_v8 }
  0x23   : > { %653 = vmatprep.subr.bf16.mxu0 %v1287_v1  ;;  %1166 = vmatprep.subr.bf16.mxu1 %v1287_v1 }
  0x26   : > { %654 = vmatpush1.bf16.msra.mxu0 %v1211_v9  ;;  %1176 = vmatpush1.bf16.msra.mxu1 %v1211_v9 }
  0x27   : > { %655 = vmatprep.subr.bf16.mxu0 %v1287_v1  ;;  %1167 = vmatprep.subr.bf16.mxu1 %v1287_v1 }
  0x2a   : > { %656 = vmatpush1.bf16.msra.mxu0 %v1212_v10  ;;  %1177 = vmatpush1.bf16.msra.mxu1 %v1212_v10 }
  0x2b   : > { %669 = vmatprep.subr.bf16.mxu0 %v1287_v1  ;;  %1168 = vmatprep.subr.bf16.mxu1 %v1287_v1 }
  0x2e   : > { %670 = vmatpush2.bf16.msra.mxu0 %v639_v12  ;;  %1178 = vmatpush2.bf16.msra.mxu1 %v639_v12 }
  0x2f   : > { %671 = vmatprep.subr.bf16.mxu0 %v1287_v1  ;;  %1169 = vmatprep.subr.bf16.mxu1 %v1287_v1 }
  0x32   : > { %672 = vmatpush2.bf16.msra.mxu0 %v1214_v13  ;;  %1179 = vmatpush2.bf16.msra.mxu1 %v1214_v13 }
  0x35   : > { %674 = vmatmul.mubr.bf16.vlgmr.msra.gmra.mxu0 %v1215_v14  ;;  %738 = vmatmul.mubr.bf16.vlgmr.msra.gmra.mxu1 %v1218_v15 }
  0x36   : > { %1141 = vmatprep.mubr.msk.bf16.mxu0 %vm588_vm0, %v1221_v16  ;;  %1149 = vmatprep.mubr.msk.bf16.mxu1 %vm588_vm0, %v1223_v17 }
  0x3d   : > { %682 = vmatmul.mubr.bf16.gmra.mxu0 %v1225_v18  ;;  %746 = vmatmul.mubr.bf16.gmra.mxu1 %v1226_v19 }
  0x3e   : > { %1142 = vmatprep.mubr.msk.bf16.mxu0 %vm588_vm0, %v1227_v20  ;;  %1150 = vmatprep.mubr.msk.bf16.mxu1 %vm588_vm0, %v1229_v21 }
  0x45   : > { %690 = vmatmul.mubr.bf16.gmra.mxu0 %v1231_v22  ;;  %754 = vmatmul.mubr.bf16.gmra.mxu1 %v1232_v23 }
  0x46   : > { %1143 = vmatprep.mubr.msk.bf16.mxu0 %vm588_vm0, %v1233_v24  ;;  %1151 = vmatprep.mubr.msk.bf16.mxu1 %vm588_vm0, %v1235_v25 }
  0x4d   : > { %698 = vmatmul.mubr.bf16.gmra.mxu0 %v1237_v26  ;;  %762 = vmatmul.mubr.bf16.gmra.mxu1 %v1238_v27 }
  0x4e   : > { %1144 = vmatprep.mubr.msk.bf16.mxu0 %vm588_vm0, %v1239_v28  ;;  %1152 = vmatprep.mubr.msk.bf16.mxu1 %vm588_vm0, %v1241_v29 }
  0x55   : > { %706 = vmatmul.mubr.bf16.gmra.mxu0 %v1243_v30  ;;  %770 = vmatmul.mubr.bf16.gmra.mxu1 %v1244_v31 }
  0x56   : > { %1145 = vmatprep.mubr.msk.bf16.mxu0 %vm588_vm0, %v1245_v32  ;;  %1153 = vmatprep.mubr.msk.bf16.mxu1 %vm588_vm0, %v1247_v33 }
  0x5d   : > { %714 = vmatmul.mubr.bf16.gmra.mxu0 %v1249_v34  ;;  %778 = vmatmul.mubr.bf16.gmra.mxu1 %v1250_v35 }
  0x5e   : > { %1146 = vmatprep.mubr.msk.bf16.mxu0 %vm588_vm0, %v1251_v36  ;;  %1154 = vmatprep.mubr.msk.bf16.mxu1 %vm588_vm0, %v1253_v37 }
  0x65   : > { %722 = vmatmul.mubr.bf16.gmra.mxu0 %v1255_v38  ;;  %786 = vmatmul.mubr.bf16.gmra.mxu1 %v1256_v39 }
  0x66   : > { %1147 = vmatprep.mubr.msk.bf16.mxu0 %vm588_vm0, %v1257_v40  ;;  %1155 = vmatprep.mubr.msk.bf16.mxu1 %vm588_vm0, %v1259_v41 }
  0x6d   : > { %730 = vmatmul.mubr.bf16.gmra.mxu0 %v1261_v42  ;;  %794 = vmatmul.mubr.bf16.gmra.mxu1 %v1262_v43 }
  0xf5   : > { %v675_v45 = vpop.f32.mrf.mxu0  ;;  %v739_v46 = vpop.f32.mrf.mxu1 }
  0xf6   : > { %v908_v47 = vadd.f32 %v1417_v44, %v675_v45  ;;  %v924_v48 = vadd.f32 %v1417_v44, %v739_v46 }
  0xf7   : > { %v677_v49 = vpop.f32.mrf.mxu0  ;;  %v741_v50 = vpop.f32.mrf.mxu1 }
  0xf8   : > { %940 = vst [vmem:[%s1424_s22] sm:$0xff] %v908_v47  ;;  %956 = vst [vmem:[%s1424_s22 + $0x80] sm:$0xff] %v924_v48 }
  0xf9   : > { %v678_v51 = vpop.f32.mrf.mxu0  ;;  %v742_v52 = vpop.f32.mrf.mxu1 }
  0xfa   : > { %v909_v53 = vadd.f32 %v1417_v44, %v678_v51  ;;  %v925_v54 = vadd.f32 %v1417_v44, %v742_v52 }
  0xfb   : > { %v680_v55 = vpop.f32.mrf.mxu0  ;;  %v744_v56 = vpop.f32.mrf.mxu1 }
  0xfc   : > { %941 = vst [vmem:[%s1424_s22 + $0x8] sm:$0xff] %v909_v53  ;;  %957 = vst [vmem:[%s1424_s22 + $0x88] sm:$0xff] %v925_v54 }
  0xfd   : > { %v683_v57 = vpop.f32.mrf.mxu0  ;;  %v747_v58 = vpop.f32.mrf.mxu1 }
  0xfe   : > { %v910_v59 = vadd.f32 %v1417_v44, %v683_v57  ;;  %v926_v60 = vadd.f32 %v1417_v44, %v747_v58 }
  0xff   : > { %v685_v61 = vpop.f32.mrf.mxu0  ;;  %v749_v62 = vpop.f32.mrf.mxu1 }
 0x100   : > { %942 = vst [vmem:[%s1424_s22 + $0x10] sm:$0xff] %v910_v59  ;;  %958 = vst [vmem:[%s1424_s22 + $0x90] sm:$0xff] %v926_v60 }
 0x101   : > { %v686_v63 = vpop.f32.mrf.mxu0  ;;  %v750_v0 = vpop.f32.mrf.mxu1 }
 0x102   : > { %v911_v1 = vadd.f32 %v1417_v44, %v686_v63  ;;  %v927_v2 = vadd.f32 %v1417_v44, %v750_v0 }
 0x103   : > { %v688_v3 = vpop.f32.mrf.mxu0  ;;  %v752_v4 = vpop.f32.mrf.mxu1 }
 0x104   : > { %943 = vst [vmem:[%s1424_s22 + $0x18] sm:$0xff] %v911_v1  ;;  %959 = vst [vmem:[%s1424_s22 + $0x98] sm:$0xff] %v927_v2 }
 0x105   : > { %v691_v5 = vpop.f32.mrf.mxu0  ;;  %v755_v6 = vpop.f32.mrf.mxu1 }
 0x106   : > { %v912_v7 = vadd.f32 %v1417_v44, %v691_v5  ;;  %v928_v8 = vadd.f32 %v1417_v44, %v755_v6 }
 0x107   : > { %v693_v9 = vpop.f32.mrf.mxu0  ;;  %v757_v10 = vpop.f32.mrf.mxu1 }
 0x108   : > { %944 = vst [vmem:[%s1424_s22 + $0x20] sm:$0xff] %v912_v7  ;;  %960 = vst [vmem:[%s1424_s22 + $0xa0] sm:$0xff] %v928_v8 }
 0x109   : > { %v694_v11 = vpop.f32.mrf.mxu0  ;;  %v758_v12 = vpop.f32.mrf.mxu1 }
 0x10a   : > { %v913_v13 = vadd.f32 %v1417_v44, %v694_v11  ;;  %v929_v14 = vadd.f32 %v1417_v44, %v758_v12 }
 0x10b   : > { %v696_v15 = vpop.f32.mrf.mxu0  ;;  %v760_v16 = vpop.f32.mrf.mxu1 }
 0x10c   : > { %945 = vst [vmem:[%s1424_s22 + $0x28] sm:$0xff] %v913_v13  ;;  %961 = vst [vmem:[%s1424_s22 + $0xa8] sm:$0xff] %v929_v14 }
 0x10d   : > { %v699_v17 = vpop.f32.mrf.mxu0  ;;  %v763_v18 = vpop.f32.mrf.mxu1 }
 0x10e   : > { %v914_v19 = vadd.f32 %v1417_v44, %v699_v17  ;;  %v930_v20 = vadd.f32 %v1417_v44, %v763_v18 }
 0x10f   : > { %v701_v21 = vpop.f32.mrf.mxu0  ;;  %v765_v22 = vpop.f32.mrf.mxu1 }
 0x110   : > { %946 = vst [vmem:[%s1424_s22 + $0x30] sm:$0xff] %v914_v19  ;;  %962 = vst [vmem:[%s1424_s22 + $0xb0] sm:$0xff] %v930_v20 }
 0x111   : > { %v702_v23 = vpop.f32.mrf.mxu0  ;;  %v766_v24 = vpop.f32.mrf.mxu1 }
 0x112   : > { %v915_v25 = vadd.f32 %v1417_v44, %v702_v23  ;;  %v931_v26 = vadd.f32 %v1417_v44, %v766_v24 }
 0x113   : > { %v704_v27 = vpop.f32.mrf.mxu0  ;;  %v768_v28 = vpop.f32.mrf.mxu1 }
 0x114   : > { %947 = vst [vmem:[%s1424_s22 + $0x38] sm:$0xff] %v915_v25  ;;  %963 = vst [vmem:[%s1424_s22 + $0xb8] sm:$0xff] %v931_v26 }
 0x115   : > { %v707_v29 = vpop.f32.mrf.mxu0  ;;  %v771_v30 = vpop.f32.mrf.mxu1 }
 0x116   : > { %v916_v31 = vadd.f32 %v1417_v44, %v707_v29  ;;  %v932_v32 = vadd.f32 %v1417_v44, %v771_v30 }
 0x117   : > { %v709_v33 = vpop.f32.mrf.mxu0  ;;  %v773_v34 = vpop.f32.mrf.mxu1 }
 0x118   : > { %948 = vst [vmem:[%s1424_s22 + $0x40] sm:$0xff] %v916_v31  ;;  %964 = vst [vmem:[%s1424_s22 + $0xc0] sm:$0xff] %v932_v32 }
 0x119   : > { %v710_v35 = vpop.f32.mrf.mxu0  ;;  %v774_v36 = vpop.f32.mrf.mxu1 }
 0x11a   : > { %v917_v37 = vadd.f32 %v1417_v44, %v710_v35  ;;  %v933_v38 = vadd.f32 %v1417_v44, %v774_v36 }
 0x11b   : > { %v712_v39 = vpop.f32.mrf.mxu0  ;;  %v776_v40 = vpop.f32.mrf.mxu1 }
 0x11c   : > { %949 = vst [vmem:[%s1424_s22 + $0x48] sm:$0xff] %v917_v37  ;;  %965 = vst [vmem:[%s1424_s22 + $0xc8] sm:$0xff] %v933_v38 }
 0x11d   : > { %v715_v41 = vpop.f32.mrf.mxu0  ;;  %v779_v42 = vpop.f32.mrf.mxu1 }
 0x11e   : > { %v918_v43 = vadd.f32 %v1417_v44, %v715_v41  ;;  %v934_v45 = vadd.f32 %v1417_v44, %v779_v42 }
 0x11f   : > { %v717_v46 = vpop.f32.mrf.mxu0  ;;  %v781_v47 = vpop.f32.mrf.mxu1 }
 0x120   : > { %950 = vst [vmem:[%s1424_s22 + $0x50] sm:$0xff] %v918_v43  ;;  %966 = vst [vmem:[%s1424_s22 + $0xd0] sm:$0xff] %v934_v45 }
 0x121   : > { %v718_v48 = vpop.f32.mrf.mxu0  ;;  %v782_v49 = vpop.f32.mrf.mxu1 }
 0x122   : > { %v919_v50 = vadd.f32 %v1417_v44, %v718_v48  ;;  %v935_v51 = vadd.f32 %v1417_v44, %v782_v49 }
 0x123   : > { %v720_v52 = vpop.f32.mrf.mxu0  ;;  %v784_v53 = vpop.f32.mrf.mxu1 }
 0x124   : > { %951 = vst [vmem:[%s1424_s22 + $0x58] sm:$0xff] %v919_v50  ;;  %967 = vst [vmem:[%s1424_s22 + $0xd8] sm:$0xff] %v935_v51 }
 0x125   : > { %v723_v54 = vpop.f32.mrf.mxu0  ;;  %v787_v55 = vpop.f32.mrf.mxu1 }
 0x126   : > { %v920_v56 = vadd.f32 %v1417_v44, %v723_v54  ;;  %v936_v57 = vadd.f32 %v1417_v44, %v787_v55 }
 0x127   : > { %v725_v58 = vpop.f32.mrf.mxu0  ;;  %v789_v59 = vpop.f32.mrf.mxu1 }
 0x128   : > { %952 = vst [vmem:[%s1424_s22 + $0x60] sm:$0xff] %v920_v56  ;;  %968 = vst [vmem:[%s1424_s22 + $0xe0] sm:$0xff] %v936_v57 }
 0x129   : > { %v726_v60 = vpop.f32.mrf.mxu0  ;;  %v790_v61 = vpop.f32.mrf.mxu1 }
 0x12a   : > { %v921_v62 = vadd.f32 %v1417_v44, %v726_v60  ;;  %v937_v63 = vadd.f32 %v1417_v44, %v790_v61 }
 0x12b   : > { %v728_v0 = vpop.f32.mrf.mxu0  ;;  %v792_v1 = vpop.f32.mrf.mxu1 }
 0x12c   : > { %953 = vst [vmem:[%s1424_s22 + $0x68] sm:$0xff] %v921_v62  ;;  %969 = vst [vmem:[%s1424_s22 + $0xe8] sm:$0xff] %v937_v63 }
 0x12d   : > { %v731_v2 = vpop.f32.mrf.mxu0  ;;  %v795_v3 = vpop.f32.mrf.mxu1 }
 0x12e   : > { %v922_v4 = vadd.f32 %v1417_v44, %v731_v2  ;;  %v938_v5 = vadd.f32 %v1417_v44, %v795_v3 }
 0x12f   : > { %v733_v6 = vpop.f32.mrf.mxu0  ;;  %v797_v7 = vpop.f32.mrf.mxu1 }
 0x130   : > { %954 = vst [vmem:[%s1424_s22 + $0x70] sm:$0xff] %v922_v4  ;;  %970 = vst [vmem:[%s1424_s22 + $0xf0] sm:$0xff] %v938_v5 }
 0x131   : > { %v734_v8 = vpop.f32.mrf.mxu0  ;;  %v798_v9 = vpop.f32.mrf.mxu1 }
 0x132   : > { %v923_v10 = vadd.f32 %v1417_v44, %v734_v8  ;;  %v939_v11 = vadd.f32 %v1417_v44, %v798_v9 }
 0x133   : > { %v736_v12 = vpop.f32.mrf.mxu0  ;;  %v800_v13 = vpop.f32.mrf.mxu1 }
 0x134   : > { %955 = vst [vmem:[%s1424_s22 + $0x78] sm:$0xff] %v923_v10  ;;  %971 = vst [vmem:[%s1424_s22 + $0xf8] sm:$0xff] %v939_v11 }
 0x135 PF: > { %s13_s14 = sadd.s32 1, %s1285_s14   ;;  %s1503_s12 = smov %s1281_s13 }
 0x136   : > { %p10_p5 = scmp.ge.s32.totalorder %s13_s14, 4   ;;  %s1504_s13 = smov %s1506_s15 }
 0x138   :  { %12 = sbr.rel (!%p10_p5) target bundleno = 2 (0x2), region = 76 }

// kernel: spade_generator_forward.36
= control target key start
LH: loop header
LB: loop body
LE: loop exit
PB: predicated region body
PF: predicated region fallthrough
CT: control target
= control target key end

     0   :  { %s309_s6 = smov 0   ;;  %s357_s0 = inlined_call_operand.vmem [shape: f32[2,64,16], index: 0, kind: input, shape index: {}]   ;;  %s358_s1 = inlined_call_operand.vmem [shape: f32[2,64,16], index: 1, kind: output, shape index: {}]  }
   0x1 LB: > { %s268_s7 = sadd.s32 4294967295, %s297_s6   ;;  %p272_p0 = scmp.ge.s32.totalorder %s297_s6, 1  ;;  %s297_s6 = sphi %s309_s6, %s11_s6  }
   0x2   : > { %p87_p1 = scmp.lt.s32.totalorder %s297_s6, 3 }
   0x4   : > { %p88_p2 = pnand %p272_p0, %p87_p1 }
   0x5   : > { %p107_p3 = scmp.lt.s32.totalorder (!%p88_p2), %s268_s7, 1 }
   0x6   : > { %91 = sbr.rel (%p88_p2) target bundleno = 101 (0x65), region = 24 }
   0xb   : > { %s360_s7 = smov (!%p107_p3, %s268_s7), 1  ;;  %vm125_vm0 = vcmask 130048  }
   0xc   : > { %s279_s8 = sshll.u32 %s360_s7, 6 }
   0xd   : > { %s111_s11 = scalar_lea.vmem %s357_s0, %s279_s8  ;;  %s116_s14 = scalar_lea.vmem %s358_s1, %s279_s8 }
   0xe   : > { %v117_v0 = vld [vmem:[%s111_s11] sm:$0xff]  ;;  %v118_v1 = vld [vmem:[%s111_s11 + $0x8] sm:$0xff]  ;;  %v119_v2 = vld [vmem:[%s111_s11 + $0x10] sm:$0xff] }
   0xf   : > { %v120_v3 = vld [vmem:[%s111_s11 + $0x18] sm:$0xff]  ;;  %v126_v4 = vsel %vm125_vm0, %v117_v0, 0.0  ;;  %v127_v5 = vsel %vm125_vm0, %v118_v1, 0.0  ;;  %v129_v6 = vsel %vm125_vm0, %v119_v2, 0.0  ;;  %v121_v7 = vld [vmem:[%s111_s11 + $0x20] sm:$0xff]  ;;  %v122_v10 = vld [vmem:[%s111_s11 + $0x28] sm:$0xff] }
  0x10   : > { %v128_v8 = vadd.f32 %v127_v5, %v126_v4  ;;  %v131_v9 = vsel %vm125_vm0, %v120_v3, 0.0  ;;  %v133_v12 = vsel %vm125_vm0, %v121_v7, 0.0  ;;  %v123_v13 = vld [vmem:[%s111_s11 + $0x30] sm:$0xff]  ;;  %v135_v15 = vsel %vm125_vm0, %v122_v10, 0.0  ;;  %v124_v16 = vld [vmem:[%s111_s11 + $0x38] sm:$0xff] }
  0x11   : > { %v137_v18 = vsel %vm125_vm0, %v123_v13, 0.0  ;;  %v139_v20 = vsel %vm125_vm0, %v124_v16, 0.0 }
  0x12   : > { %v130_v11 = vadd.f32 %v129_v6, %v128_v8 }
  0x14   : > { %v132_v14 = vadd.f32 %v131_v9, %v130_v11 }
  0x16   : > { %v134_v17 = vadd.f32 %v133_v12, %v132_v14 }
  0x18   : > { %v136_v19 = vadd.f32 %v135_v15, %v134_v17 }
  0x1a   : > { %v138_v21 = vadd.f32 %v137_v18, %v136_v19 }
  0x1c   : > { %v140_v22 = vadd.f32 %v139_v20, %v138_v21 }
  0x1e   : > { %v141_v23 = vrot.slane %v140_v22, 4 }
  0x20   : > { %v142_v24 = vadd.f32 %v141_v23, %v140_v22 }
  0x22   : > { %v143_v25 = vrot.slane %v142_v24, 2 }
  0x24   : > { %v144_v26 = vadd.f32 %v143_v25, %v142_v24 }
  0x26   : > { %v145_v27 = vrot.slane %v144_v26, 1 }
  0x28   : > { %v146_v28 = vadd.f32 %v145_v27, %v144_v26 }
  0x2a   : > { %v148_v29 = vmul.f32 0.015625, %v146_v28 }
  0x2c   : > { %v149_v30 = vsub.f32 %v117_v0, %v148_v29  ;;  %v150_v31 = vsub.f32 %v118_v1, %v148_v29  ;;  %v151_v32 = vsub.f32 %v119_v2, %v148_v29  ;;  %v152_v33 = vsub.f32 %v120_v3, %v148_v29 }
  0x2d   : > { %v153_v34 = vsub.f32 %v121_v7, %v148_v29  ;;  %v154_v35 = vsub.f32 %v122_v10, %v148_v29  ;;  %v155_v40 = vsub.f32 %v123_v13, %v148_v29  ;;  %v156_v46 = vsub.f32 %v124_v16, %v148_v29 }
  0x2e   : > { %v157_v36 = vmul.f32 %v149_v30, %v149_v30  ;;  %v158_v37 = vmul.f32 %v150_v31, %v150_v31  ;;  %v159_v38 = vmul.f32 %v151_v32, %v151_v32  ;;  %v160_v39 = vmul.f32 %v152_v33, %v152_v33 }
  0x2f   : > { %v161_v41 = vmul.f32 %v153_v34, %v153_v34  ;;  %v162_v47 = vmul.f32 %v154_v35, %v154_v35  ;;  %v163_v50 = vmul.f32 %v155_v40, %v155_v40  ;;  %v164_v53 = vmul.f32 %v156_v46, %v156_v46 }
  0x30   : > { %v165_v42 = vsel %vm125_vm0, %v157_v36, 0.0  ;;  %v166_v43 = vsel %vm125_vm0, %v158_v37, 0.0  ;;  %v168_v44 = vsel %vm125_vm0, %v159_v38, 0.0  ;;  %v170_v48 = vsel %vm125_vm0, %v160_v39, 0.0 }
  0x31   : > { %v167_v45 = vadd.f32 %v166_v43, %v165_v42  ;;  %v172_v51 = vsel %vm125_vm0, %v161_v41, 0.0  ;;  %v174_v54 = vsel %vm125_vm0, %v162_v47, 0.0  ;;  %v176_v56 = vsel %vm125_vm0, %v163_v50, 0.0 }
  0x32   : > { %v178_v58 = vsel %vm125_vm0, %v164_v53, 0.0 }
  0x33   : > { %v169_v49 = vadd.f32 %v168_v44, %v167_v45 }
  0x35   : > { %v171_v52 = vadd.f32 %v170_v48, %v169_v49 }
  0x37   : > { %v173_v55 = vadd.f32 %v172_v51, %v171_v52 }
  0x39   : > { %v175_v57 = vadd.f32 %v174_v54, %v173_v55 }
  0x3b   : > { %v177_v59 = vadd.f32 %v176_v56, %v175_v57 }
  0x3d   : > { %v179_v60 = vadd.f32 %v178_v58, %v177_v59 }
  0x3f   : > { %v180_v61 = vrot.slane %v179_v60, 4 }
  0x41   : > { %v181_v62 = vadd.f32 %v180_v61, %v179_v60 }
  0x43   : > { %v182_v63 = vrot.slane %v181_v62, 2 }
  0x45   : > { %v183_v0 = vadd.f32 %v182_v63, %v181_v62 }
  0x47   : > { %v184_v1 = vrot.slane %v183_v0, 1 }
  0x49   : > { %v185_v2 = vadd.f32 %v184_v1, %v183_v0 }
  0x4b   : > { %v186_v3 = vmul.f32 0.015625, %v185_v2 }
  0x4d   : > { %v187_v4 = vadd.f32 1e-05, %v186_v3 }
  0x4f   : > { %289 = vrsqrt.f32 %v187_v4 }
  0x5c   : > { %v290_v5 = vpop.eup %289 }
  0x5d   : > { %v189_v6 = vmul.f32 %v290_v5, %v149_v30  ;;  %v190_v7 = vmul.f32 %v290_v5, %v150_v31  ;;  %v191_v8 = vmul.f32 %v290_v5, %v151_v32  ;;  %v192_v9 = vmul.f32 %v290_v5, %v152_v33 }
  0x5e   : > { %v193_v10 = vmul.f32 %v290_v5, %v153_v34  ;;  %v194_v11 = vmul.f32 %v290_v5, %v154_v35  ;;  %v195_v12 = vmul.f32 %v290_v5, %v155_v40  ;;  %v196_v13 = vmul.f32 %v290_v5, %v156_v46 }
  0x5f   : > { %v197_v14 = vmax.f32 %v189_v6, 0.0  ;;  %v198_v15 = vmax.f32 %v190_v7, 0.0  ;;  %v199_v16 = vmax.f32 %v191_v8, 0.0  ;;  %v200_v17 = vmax.f32 %v192_v9, 0.0 }
  0x60   : > { %v201_v18 = vmax.f32 %v193_v10, 0.0  ;;  %v202_v19 = vmax.f32 %v194_v11, 0.0  ;;  %v203_v20 = vmax.f32 %v195_v12, 0.0  ;;  %v204_v21 = vmax.f32 %v196_v13, 0.0 }
  0x61   : > { %205 = vst.msk [vmem:[%s116_s14] sm:$0xff] %vm125_vm0, %v197_v14  ;;  %206 = vst.msk [vmem:[%s116_s14 + $0x8] sm:$0xff] %vm125_vm0, %v198_v15 }
  0x62   : > { %207 = vst.msk [vmem:[%s116_s14 + $0x10] sm:$0xff] %vm125_vm0, %v199_v16  ;;  %208 = vst.msk [vmem:[%s116_s14 + $0x18] sm:$0xff] %vm125_vm0, %v200_v17 }
  0x63   : > { %209 = vst.msk [vmem:[%s116_s14 + $0x20] sm:$0xff] %vm125_vm0, %v201_v18  ;;  %210 = vst.msk [vmem:[%s116_s14 + $0x28] sm:$0xff] %vm125_vm0, %v202_v19 }
  0x64   : > { %211 = vst.msk [vmem:[%s116_s14 + $0x30] sm:$0xff] %vm125_vm0, %v203_v20  ;;  %212 = vst.msk [vmem:[%s116_s14 + $0x38] sm:$0xff] %vm125_vm0, %v204_v21 }
  0x65 PF: > { %s11_s6 = sadd.s32 1, %s297_s6  }
  0x66   : > { %p8_p4 = scmp.ge.s32.totalorder %s11_s6, 4  }
  0x68   :  { %10 = sbr.rel (!%p8_p4) target bundleno = 1 (0x1), region = 54 }

// kernel: spade_generator_forward.35
= control target key start
LH: loop header
LB: loop body
LE: loop exit
PB: predicated region body
PF: predicated region fallthrough
CT: control target
= control target key end

     0   :  { %vm168_vm0 = vcmask 1043456   ;;  %vm143_vm1 = vcmask 588800   ;;  %s567_s1 = inlined_call_operand.vmem [shape: bf16[72,128], index: 1, kind: input, shape index: {}]   ;;  %s568_s0 = inlined_call_operand.vmem [shape: bf16[128,72], index: 0, kind: input, shape index: {}]   ;;  %s569_s2 = inlined_call_operand.vmem [shape: f32[1,128], index: 2, kind: input, shape index: {}]   ;;  %s570_s3 = inlined_call_operand.vmem [shape: f32[128,128], index: 3, kind: output, shape index: {}]  }
   0x1   :  { %v436_v0 = vld [vmem:[%s567_s1 + $0x20] ss:$0 sps:$4 sm:$0xff]   ;;  %v437_v1 = vld [vmem:[%s567_s1 + $0x18] sm:$0xff]   ;;  %v438_v3 = vld [vmem:[%s567_s1 + $0x10] sm:$0xff]  }
   0x2   :  { %434 = vmatprep.subr.msk.bf16.mxu0 %vm168_vm0, %v436_v0  ;;  %435 = vmatprep.subr.msk.bf16.mxu1 %vm168_vm0, %v436_v0  ;;  %v170_v2 = vsel %vm168_vm0, %v436_v0, 0  ;;  %v441_v4 = vld [vmem:[%s568_s0] sm:$0xff]   ;;  %v439_v6 = vld [vmem:[%s567_s1 + $0x8] sm:$0xff]   ;;  %v445_v10 = vld [vmem:[%s568_s0 + $0x10] sm:$0xff]  }
   0x3   :  { %399 = vmatpush3.bf16.msra.mxu0 %v170_v2  ;;  %429 = vmatpush3.bf16.msra.mxu1 %v170_v2  ;;  %v442_v5 = vld [vmem:[%s568_s0 + $0x20] sm:$0xff]   ;;  %v443_v8 = vld [vmem:[%s568_s0 + $0x8] sm:$0xff]   ;;  %v446_v11 = vld [vmem:[%s568_s0 + $0x30] sm:$0xff]  }
   0x4   :  { %400 = vmatprep.subr.bf16.mxu0 %v437_v1  ;;  %425 = vmatprep.subr.bf16.mxu1 %v437_v1  ;;  %v440_v7 = vld [vmem:[%s567_s1] sm:$0xff]   ;;  %v444_v9 = vld [vmem:[%s568_s0 + $0x28] sm:$0xff]   ;;  %v447_v12 = vld [vmem:[%s568_s0 + $0x18] sm:$0xff]  }
   0x5   :  { %408 = vmatprep.mubr.msk.bf16.mxu0 %vm143_vm1, %v441_v4  ;;  %416 = vmatprep.mubr.msk.bf16.mxu1 %vm143_vm1, %v442_v5  ;;  %v448_v13 = vld [vmem:[%s568_s0 + $0x38] sm:$0xff]   ;;  %v384_v14 = vld [vmem:[%s569_s2] ss:$0 sm:$0xff] }
   0x7   :  { %401 = vmatpush3.bf16.msra.mxu0 %v437_v1  ;;  %430 = vmatpush3.bf16.msra.mxu1 %v437_v1 }
   0x8   :  { %402 = vmatprep.subr.bf16.mxu0 %v438_v3  ;;  %426 = vmatprep.subr.bf16.mxu1 %v438_v3 }
   0xb   :  { %403 = vmatpush3.bf16.msra.mxu0 %v438_v3  ;;  %431 = vmatpush3.bf16.msra.mxu1 %v438_v3 }
   0xc   :  { %404 = vmatprep.subr.bf16.mxu0 %v439_v6  ;;  %427 = vmatprep.subr.bf16.mxu1 %v439_v6 }
   0xf   :  { %405 = vmatpush3.bf16.msra.mxu0 %v439_v6  ;;  %432 = vmatpush3.bf16.msra.mxu1 %v439_v6 }
  0x10   :  { %406 = vmatprep.subr.bf16.mxu0 %v440_v7  ;;  %428 = vmatprep.subr.bf16.mxu1 %v440_v7 }
  0x13   :  { %407 = vmatpush3.bf16.msra.mxu0 %v440_v7  ;;  %433 = vmatpush3.bf16.msra.mxu1 %v440_v7 }
  0x16   :  { %409 = vmatmul.mubr.msk.bf16.vlgmr.msra.gmra.mxu0 %vm143_vm1, %v443_v8  ;;  %417 = vmatmul.mubr.msk.bf16.vlgmr.msra.gmra.mxu1 %vm143_vm1, %v444_v9 }
  0x17   :  { %412 = vmatprep.mubr.msk.bf16.mxu0 %vm143_vm1, %v445_v10  ;;  %420 = vmatprep.mubr.msk.bf16.mxu1 %vm143_vm1, %v446_v11 }
  0x1e   :  { %413 = vmatmul.mubr.msk.bf16.gmra.mxu0 %vm143_vm1, %v447_v12  ;;  %421 = vmatmul.mubr.msk.bf16.gmra.mxu1 %vm143_vm1, %v448_v13 }
  0xd6   :  { %v410_v15 = vpop.f32.mrf.mxu0  ;;  %v418_v16 = vpop.f32.mrf.mxu1 }
  0xd7   :  { %v329_v17 = vadd.f32 %v410_v15, %v384_v14  ;;  %v337_v18 = vadd.f32 %v418_v16, %v384_v14 }
  0xd8   :  { %v206_v19 = vpop.f32.mrf.mxu0  ;;  %v238_v20 = vpop.f32.mrf.mxu1 }
  0xd9   :  { %345 = vst [vmem:[%s570_s3 + $0x10] sm:$0xff] %v329_v17  ;;  %353 = vst [vmem:[%s570_s3 + $0x50] sm:$0xff] %v337_v18  ;;  %v327_v21 = vadd.f32 %v384_v14, %v206_v19  ;;  %v335_v22 = vadd.f32 %v384_v14, %v238_v20 }
  0xda   :  { %v411_v23 = vpop.f32.mrf.mxu0  ;;  %v419_v24 = vpop.f32.mrf.mxu1 }
  0xdb   :  { %343 = vst [vmem:[%s570_s3] sm:$0xff] %v327_v21  ;;  %351 = vst [vmem:[%s570_s3 + $0x40] sm:$0xff] %v335_v22  ;;  %v330_v25 = vadd.f32 %v411_v23, %v384_v14  ;;  %v338_v26 = vadd.f32 %v419_v24, %v384_v14 }
  0xdc   :  { %v209_v27 = vpop.f32.mrf.mxu0  ;;  %v241_v28 = vpop.f32.mrf.mxu1 }
  0xdd   :  { %346 = vst [vmem:[%s570_s3 + $0x18] sm:$0xff] %v330_v25  ;;  %354 = vst [vmem:[%s570_s3 + $0x58] sm:$0xff] %v338_v26  ;;  %v328_v29 = vadd.f32 %v384_v14, %v209_v27  ;;  %v336_v30 = vadd.f32 %v384_v14, %v241_v28 }
  0xde   :  { %v414_v31 = vpop.f32.mrf.mxu0  ;;  %v422_v32 = vpop.f32.mrf.mxu1 }
  0xdf   :  { %344 = vst [vmem:[%s570_s3 + $0x8] sm:$0xff] %v328_v29  ;;  %352 = vst [vmem:[%s570_s3 + $0x48] sm:$0xff] %v336_v30  ;;  %v333_v33 = vadd.f32 %v414_v31, %v384_v14  ;;  %v341_v34 = vadd.f32 %v422_v32, %v384_v14 }
  0xe0   :  { %v222_v35 = vpop.f32.mrf.mxu0  ;;  %v254_v36 = vpop.f32.mrf.mxu1 }
  0xe1   :  { %349 = vst [vmem:[%s570_s3 + $0x30] sm:$0xff] %v333_v33  ;;  %357 = vst [vmem:[%s570_s3 + $0x70] sm:$0xff] %v341_v34  ;;  %v331_v37 = vadd.f32 %v384_v14, %v222_v35  ;;  %v339_v38 = vadd.f32 %v384_v14, %v254_v36 }
  0xe2   :  { %v415_v39 = vpop.f32.mrf.mxu0  ;;  %v423_v40 = vpop.f32.mrf.mxu1 }
  0xe3   :  { %347 = vst [vmem:[%s570_s3 + $0x20] sm:$0xff] %v331_v37  ;;  %355 = vst [vmem:[%s570_s3 + $0x60] sm:$0xff] %v339_v38  ;;  %v334_v41 = vadd.f32 %v415_v39, %v384_v14  ;;  %v342_v42 = vadd.f32 %v423_v40, %v384_v14 }
  0xe4   :  { %v225_v43 = vpop.f32.mrf.mxu0  ;;  %v257_v44 = vpop.f32.mrf.mxu1 }
  0xe5   :  { %350 = vst [vmem:[%s570_s3 + $0x38] sm:$0xff] %v334_v41  ;;  %358 = vst [vmem:[%s570_s3 + $0x78] sm:$0xff] %v342_v42  ;;  %v332_v45 = vadd.f32 %v384_v14, %v225_v43  ;;  %v340_v46 = vadd.f32 %v384_v14, %v257_v44 }
  0xe7   :  { %348 = vst [vmem:[%s570_s3 + $0x28] sm:$0xff] %v332_v45  ;;  %356 = vst [vmem:[%s570_s3 + $0x68] sm:$0xff] %v340_v46 }

// kernel: spade_generator_forward.37
= control target key start
LH: loop header
LB: loop body
LE: loop exit
PB: predicated region body
PF: predicated region fallthrough
CT: control target
= control target key end

     0   :  { %v261_v0 = vmov 0   ;;  %vm121_vm0 = vcmask 130048   ;;  %s336_s1 = inlined_call_operand.vmem [shape: bf16[144,128], index: 1, kind: input, shape index: {}]   ;;  %s337_s0 = inlined_call_operand.vmem [shape: bf16[32,144], index: 0, kind: input, shape index: {}]   ;;  %s338_s2 = inlined_call_operand.vmem [shape: f32[1,128], index: 2, kind: input, shape index: {}]   ;;  %s339_s3 = inlined_call_operand.vmem [shape: f32[32,128], index: 3, kind: output, shape index: {}]  }
   0x1   :  { %128 = vmatprep.subr.bf16.mxu0 %v261_v0  ;;  %227 = vmatprep.subr.bf16.mxu1 %v261_v0  ;;  %v246_v1 = vld [vmem:[%s336_s1 + $0x38] sm:$0xff]   ;;  %v247_v2 = vld [vmem:[%s336_s1 + $0x30] sm:$0xff]   ;;  %v248_v3 = vld [vmem:[%s336_s1 + $0x28] sm:$0xff]  }
   0x2   :  { %129 = vmatpush1.bf16.msra.mxu0 %v246_v1  ;;  %236 = vmatpush1.bf16.msra.mxu1 %v246_v1  ;;  %v249_v4 = vld [vmem:[%s336_s1 + $0x20] sm:$0xff]   ;;  %v260_v6 = vld [vmem:[%s337_s0 + $0x14] ss:$8 sps:$4 sm:$0xff]   ;;  %v252_v9 = vld [vmem:[%s336_s1 + $0x8] sm:$0xff]  }
   0x3   :  { %130 = vmatprep.subr.bf16.mxu0 %v261_v0  ;;  %228 = vmatprep.subr.bf16.mxu1 %v261_v0  ;;  %v257_v5 = vld [vmem:[%s337_s0 + $0x4] ss:$8 sps:$4 sm:$0xff]   ;;  %v250_v7 = vld [vmem:[%s336_s1 + $0x18] sm:$0xff]   ;;  %v251_v8 = vld [vmem:[%s336_s1 + $0x10] sm:$0xff]  }
   0x4   :  { %224 = vmatprep.mubr.msk.bf16.mxu0 %vm121_vm0, %v257_v5  ;;  %225 = vmatprep.mubr.msk.bf16.mxu1 %vm121_vm0, %v260_v6  ;;  %v253_v10 = vld [vmem:[%s336_s1] sm:$0xff]   ;;  %v258_v13 = vld [vmem:[%s337_s0 + $0x10] ss:$8 sps:$4 sm:$0xff]  }
   0x5   :  { %v254_v11 = vld [vmem:[%s336_s1 + $0x40] sm:$0xff]  }
   0x6   :  { %131 = vmatpush1.bf16.msra.mxu0 %v247_v2  ;;  %237 = vmatpush1.bf16.msra.mxu1 %v247_v2  ;;  %v255_v12 = vld [vmem:[%s337_s0] ss:$8 sps:$4 sm:$0xff]  }
   0x7   :  { %132 = vmatprep.subr.bf16.mxu0 %v261_v0  ;;  %229 = vmatprep.subr.bf16.mxu1 %v261_v0  ;;  %v226_v14 = vld [vmem:[%s338_s2] ss:$0 sm:$0xff] }
   0xa   :  { %133 = vmatpush1.bf16.msra.mxu0 %v248_v3  ;;  %238 = vmatpush1.bf16.msra.mxu1 %v248_v3 }
   0xb   :  { %134 = vmatprep.subr.bf16.mxu0 %v261_v0  ;;  %230 = vmatprep.subr.bf16.mxu1 %v261_v0 }
   0xe   :  { %135 = vmatpush1.bf16.msra.mxu0 %v249_v4  ;;  %239 = vmatpush1.bf16.msra.mxu1 %v249_v4 }
   0xf   :  { %136 = vmatprep.subr.bf16.mxu0 %v261_v0  ;;  %231 = vmatprep.subr.bf16.mxu1 %v261_v0 }
  0x12   :  { %137 = vmatpush1.bf16.msra.mxu0 %v250_v7  ;;  %240 = vmatpush1.bf16.msra.mxu1 %v250_v7 }
  0x13   :  { %138 = vmatprep.subr.bf16.mxu0 %v261_v0  ;;  %232 = vmatprep.subr.bf16.mxu1 %v261_v0 }
  0x16   :  { %139 = vmatpush1.bf16.msra.mxu0 %v251_v8  ;;  %241 = vmatpush1.bf16.msra.mxu1 %v251_v8 }
  0x17   :  { %140 = vmatprep.subr.bf16.mxu0 %v261_v0  ;;  %233 = vmatprep.subr.bf16.mxu1 %v261_v0 }
  0x1a   :  { %141 = vmatpush1.bf16.msra.mxu0 %v252_v9  ;;  %242 = vmatpush1.bf16.msra.mxu1 %v252_v9 }
  0x1b   :  { %142 = vmatprep.subr.bf16.mxu0 %v261_v0  ;;  %234 = vmatprep.subr.bf16.mxu1 %v261_v0 }
  0x1e   :  { %143 = vmatpush1.bf16.msra.mxu0 %v253_v10  ;;  %243 = vmatpush1.bf16.msra.mxu1 %v253_v10 }
  0x1f   :  { %158 = vmatprep.subr.bf16.mxu0 %v261_v0  ;;  %235 = vmatprep.subr.bf16.mxu1 %v261_v0 }
  0x22   :  { %159 = vmatpush2.bf16.msra.mxu0 %v254_v11  ;;  %244 = vmatpush2.bf16.msra.mxu1 %v254_v11 }
  0x25   :  { %161 = vmatmul.mubr.bf16.vlgmr.msra.gmra.mxu0 %v255_v12  ;;  %169 = vmatmul.mubr.bf16.vlgmr.msra.gmra.mxu1 %v258_v13 }
  0xe5   :  { %v162_v15 = vpop.f32.mrf.mxu0  ;;  %v170_v16 = vpop.f32.mrf.mxu1 }
  0xe6   :  { %v199_v17 = vadd.f32 %v226_v14, %v162_v15  ;;  %v201_v18 = vadd.f32 %v226_v14, %v170_v16 }
  0xe7   :  { %v164_v19 = vpop.f32.mrf.mxu0  ;;  %v172_v20 = vpop.f32.mrf.mxu1 }
  0xe8   :  { %203 = vst [vmem:[%s339_s3] sm:$0xff] %v199_v17  ;;  %205 = vst [vmem:[%s339_s3 + $0x10] sm:$0xff] %v201_v18 }
  0xe9   :  { %v165_v21 = vpop.f32.mrf.mxu0  ;;  %v173_v22 = vpop.f32.mrf.mxu1 }
  0xea   :  { %v200_v23 = vadd.f32 %v226_v14, %v165_v21  ;;  %v202_v24 = vadd.f32 %v226_v14, %v173_v22 }
  0xeb   :  { %v167_v25 = vpop.f32.mrf.mxu0  ;;  %v175_v26 = vpop.f32.mrf.mxu1 }
  0xec   :  { %204 = vst [vmem:[%s339_s3 + $0x8] sm:$0xff] %v200_v23  ;;  %206 = vst [vmem:[%s339_s3 + $0x18] sm:$0xff] %v202_v24 }

// kernel: spade_generator_forward.38
= control target key start
LH: loop header
LB: loop body
LE: loop exit
PB: predicated region body
PF: predicated region fallthrough
CT: control target
= control target key end

     0   :  { %s249_s6 = smov 0   ;;  %s279_s0 = inlined_call_operand.vmem [shape: f32[2,16,32], index: 0, kind: input, shape index: {}]   ;;  %s280_s1 = inlined_call_operand.vmem [shape: f32[2,16,32], index: 1, kind: output, shape index: {}]  }
   0x1 LB: > { %s208_s7 = sadd.s32 4294967295, %s237_s6   ;;  %p212_p0 = scmp.ge.s32.totalorder %s237_s6, 1  ;;  %s237_s6 = sphi %s249_s6, %s11_s6  }
   0x2   : > { %p87_p1 = scmp.lt.s32.totalorder %s237_s6, 3 }
   0x4   : > { %p88_p2 = pnand %p212_p0, %p87_p1 }
   0x5   : > { %p107_p3 = scmp.lt.s32.totalorder (!%p88_p2), %s208_s7, 1 }
   0x6   : > { %91 = sbr.rel (%p88_p2) target bundleno = 74 (0x4a), region = 24 }
   0xb   : > { %s282_s7 = smov (!%p107_p3, %s208_s7), 1  ;;  %vm119_vm0 = vcmask 261120  }
   0xc   : > { %s219_s8 = sshll.u32 %s282_s7, 4 }
   0xd   : > { %s111_s11 = scalar_lea.vmem %s279_s0, %s219_s8  ;;  %s116_s14 = scalar_lea.vmem %s280_s1, %s219_s8 }
   0xe   : > { %v117_v0 = vld [vmem:[%s111_s11] sm:$0xff]  ;;  %v118_v1 = vld [vmem:[%s111_s11 + $0x8] sm:$0xff] }
   0xf   : > { %v120_v2 = vsel %vm119_vm0, %v117_v0, 0.0  ;;  %v121_v3 = vsel %vm119_vm0, %v118_v1, 0.0 }
  0x10   : > { %v122_v4 = vadd.f32 %v121_v3, %v120_v2 }
  0x12   : > { %v123_v5 = vrot.slane %v122_v4, 4 }
  0x14   : > { %v124_v6 = vadd.f32 %v123_v5, %v122_v4 }
  0x16   : > { %v125_v7 = vrot.slane %v124_v6, 2 }
  0x18   : > { %v126_v8 = vadd.f32 %v125_v7, %v124_v6 }
  0x1a   : > { %v127_v9 = vrot.slane %v126_v8, 1 }
  0x1c   : > { %v128_v10 = vadd.f32 %v127_v9, %v126_v8 }
  0x1e   : > { %v130_v11 = vmul.f32 0.0625, %v128_v10 }
  0x20   : > { %v131_v12 = vsub.f32 %v117_v0, %v130_v11  ;;  %v132_v13 = vsub.f32 %v118_v1, %v130_v11 }
  0x22   : > { %v133_v14 = vmul.f32 %v131_v12, %v131_v12  ;;  %v134_v15 = vmul.f32 %v132_v13, %v132_v13 }
  0x24   : > { %v135_v16 = vsel %vm119_vm0, %v133_v14, 0.0  ;;  %v136_v17 = vsel %vm119_vm0, %v134_v15, 0.0 }
  0x25   : > { %v137_v18 = vadd.f32 %v136_v17, %v135_v16 }
  0x27   : > { %v138_v19 = vrot.slane %v137_v18, 4 }
  0x29   : > { %v139_v20 = vadd.f32 %v138_v19, %v137_v18 }
  0x2b   : > { %v140_v21 = vrot.slane %v139_v20, 2 }
  0x2d   : > { %v141_v22 = vadd.f32 %v140_v21, %v139_v20 }
  0x2f   : > { %v142_v23 = vrot.slane %v141_v22, 1 }
  0x31   : > { %v143_v24 = vadd.f32 %v142_v23, %v141_v22 }
  0x33   : > { %v144_v25 = vmul.f32 0.0625, %v143_v24 }
  0x35   : > { %v145_v26 = vadd.f32 1e-05, %v144_v25 }
  0x37   : > { %229 = vrsqrt.f32 %v145_v26 }
  0x44   : > { %v230_v27 = vpop.eup %229 }
  0x45   : > { %v147_v28 = vmul.f32 %v230_v27, %v131_v12  ;;  %v148_v29 = vmul.f32 %v230_v27, %v132_v13 }
  0x47   : > { %v149_v30 = vmax.f32 %v147_v28, 0.0  ;;  %v150_v31 = vmax.f32 %v148_v29, 0.0 }
  0x49   : > { %151 = vst.msk [vmem:[%s116_s14] sm:$0xff] %vm119_vm0, %v149_v30  ;;  %152 = vst.msk [vmem:[%s116_s14 + $0x8] sm:$0xff] %vm119_vm0, %v150_v31 }
  0x4a PF: > { %s11_s6 = sadd.s32 1, %s237_s6  }
  0x4b   : > { %p8_p4 = scmp.ge.s32.totalorder %s11_s6, 4  }
  0x4d   :  { %10 = sbr.rel (!%p8_p4) target bundleno = 1 (0x1), region = 54 }

// kernel: spade_generator_forward.41
= control target key start
LH: loop header
LB: loop body
LE: loop exit
PB: predicated region body
PF: predicated region fallthrough
CT: control target
= control target key end

     0   :  { %s247_s6 = smov 0   ;;  %s277_s0 = inlined_call_operand.vmem [shape: f32[2,16,32], index: 0, kind: input, shape index: {}]   ;;  %s278_s1 = inlined_call_operand.vmem [shape: f32[2,16,32], index: 1, kind: output, shape index: {}]  }
   0x1 LB: > { %s206_s7 = sadd.s32 4294967295, %s235_s6   ;;  %p210_p0 = scmp.ge.s32.totalorder %s235_s6, 1  ;;  %s235_s6 = sphi %s247_s6, %s11_s6  }
   0x2   : > { %p87_p1 = scmp.lt.s32.totalorder %s235_s6, 3 }
   0x4   : > { %p88_p2 = pnand %p210_p0, %p87_p1 }
   0x5   : > { %p107_p3 = scmp.lt.s32.totalorder (!%p88_p2), %s206_s7, 1 }
   0x6   : > { %91 = sbr.rel (%p88_p2) target bundleno = 72 (0x48), region = 24 }
   0xb   : > { %s280_s7 = smov (!%p107_p3, %s206_s7), 1  ;;  %vm119_vm0 = vcmask 261120  }
   0xc   : > { %s217_s8 = sshll.u32 %s280_s7, 4 }
   0xd   : > { %s111_s11 = scalar_lea.vmem %s277_s0, %s217_s8  ;;  %s116_s14 = scalar_lea.vmem %s278_s1, %s217_s8 }
   0xe   : > { %v117_v0 = vld [vmem:[%s111_s11] sm:$0xff]  ;;  %v118_v1 = vld [vmem:[%s111_s11 + $0x8] sm:$0xff] }
   0xf   : > { %v120_v2 = vsel %vm119_vm0, %v117_v0, 0.0  ;;  %v121_v3 = vsel %vm119_vm0, %v118_v1, 0.0 }
  0x10   : > { %v122_v4 = vadd.f32 %v121_v3, %v120_v2 }
  0x12   : > { %v123_v5 = vrot.slane %v122_v4, 4 }
  0x14   : > { %v124_v6 = vadd.f32 %v123_v5, %v122_v4 }
  0x16   : > { %v125_v7 = vrot.slane %v124_v6, 2 }
  0x18   : > { %v126_v8 = vadd.f32 %v125_v7, %v124_v6 }
  0x1a   : > { %v127_v9 = vrot.slane %v126_v8, 1 }
  0x1c   : > { %v128_v10 = vadd.f32 %v127_v9, %v126_v8 }
  0x1e   : > { %v130_v11 = vmul.f32 0.0625, %v128_v10 }
  0x20   : > { %v131_v12 = vsub.f32 %v117_v0, %v130_v11  ;;  %v132_v13 = vsub.f32 %v118_v1, %v130_v11 }
  0x22   : > { %v133_v14 = vmul.f32 %v131_v12, %v131_v12  ;;  %v134_v15 = vmul.f32 %v132_v13, %v132_v13 }
  0x24   : > { %v135_v16 = vsel %vm119_vm0, %v133_v14, 0.0  ;;  %v136_v17 = vsel %vm119_vm0, %v134_v15, 0.0 }
  0x25   : > { %v137_v18 = vadd.f32 %v136_v17, %v135_v16 }
  0x27   : > { %v138_v19 = vrot.slane %v137_v18, 4 }
  0x29   : > { %v139_v20 = vadd.f32 %v138_v19, %v137_v18 }
  0x2b   : > { %v140_v21 = vrot.slane %v139_v20, 2 }
  0x2d   : > { %v141_v22 = vadd.f32 %v140_v21, %v139_v20 }
  0x2f   : > { %v142_v23 = vrot.slane %v141_v22, 1 }
  0x31   : > { %v143_v24 = vadd.f32 %v142_v23, %v141_v22 }
  0x33   : > { %v144_v25 = vmul.f32 0.0625, %v143_v24 }
  0x35   : > { %v145_v26 = vadd.f32 1e-05, %v144_v25 }
  0x37   : > { %227 = vrsqrt.f32 %v145_v26 }
  0x44   : > { %v228_v27 = vpop.eup %227 }
  0x45   : > { %v147_v28 = vmul.f32 %v228_v27, %v131_v12  ;;  %v148_v29 = vmul.f32 %v228_v27, %v132_v13 }
  0x47   : > { %149 = vst.msk [vmem:[%s116_s14] sm:$0xff] %vm119_vm0, %v147_v28  ;;  %150 = vst.msk [vmem:[%s116_s14 + $0x8] sm:$0xff] %vm119_vm0, %v148_v29 }
  0x48 PF: > { %s11_s6 = sadd.s32 1, %s235_s6  }
  0x49   : > { %p8_p4 = scmp.ge.s32.totalorder %s11_s6, 4  }
  0x4b   :  { %10 = sbr.rel (!%p8_p4) target bundleno = 1 (0x1), region = 54 }

// kernel: spade_generator_forward.40
= control target key start
LH: loop header
LB: loop body
LE: loop exit
PB: predicated region body
PF: predicated region fallthrough
CT: control target
= control target key end

     0   :  { %s879_s20 = smov 0   ;;  %s881_s21 = smov 0   ;;  %s948_s0 = inlined_call_operand.<no memory space> [shape: f32[1,1], index: 0, kind: input, shape index: {}]   ;;  %s949_s1 = inlined_call_operand.vmem [shape: f32[2,16,4], index: 1, kind: input, shape index: {}]   ;;  %s950_s2 = inlined_call_operand.vmem [shape: f32[2,16,4], index: 2, kind: input, shape index: {}]   ;;  %s951_s3 = inlined_call_operand.vmem [shape: f32[2,16,32], index: 3, kind: input, shape index: {}]   ;;  %s952_s4 = inlined_call_operand.vmem [shape: f32[2,16,32], index: 4, kind: input, shape index: {}]   ;;  %s953_s5 = inlined_call_operand.vmem [shape: f32[2,16,32], index: 5, kind: output, shape index: {}]  }
   0x1   :  { %10 = sst [smem:[#allocation5]] %s948_s0  ;;  %s883_s22 = smov 0  }
   0x2 LB: > { %s28_s0 = sadd.s32 1, %s837_s21  ;;  %p732_p0 = scmp.ge.s32.totalorder %s841_s22, 1  ;;  %s841_s22 = sphi %s883_s22, %s16_s22   ;;  %s837_s21 = sphi %s881_s21, %s955_s21   ;;  %s833_s20 = sphi %s879_s20, %s954_s20  }
   0x3   : > { %p30_p1 = scmp.ge.s32.totalorder %s28_s0, 2  ;;  %p244_p2 = scmp.lt.s32.totalorder %s841_s22, 3 }
   0x5   : > { %s957_s0 = smov (%p30_p1, %s28_s0), 0  ;;  %p245_p3 = pnand %p732_p0, %p244_p2 }
   0x6   : > { %p295_p4 = scmp.lt.s32.totalorder (!%p245_p3), %s833_s20, 1  ;;  %s607_s8 = sld [smem:[#allocation5]] (!%p245_p3) }
   0x7   : > { %248 = sbr.rel (%p245_p3) target bundleno = 800 (0x320), region = 40 }
   0xc   : > { %s959_s20 = smov (!%p295_p4, %s833_s20), 1  ;;  %vm348_vm0 = vcmask 31744   ;;  %vm334_vm1 = vcmask 7168   ;;  %v843_v4 = vmov -inf   ;;  %vm438_vm2 = vcmask 130048  }
   0xd   : > { %s897_s23 = sshll.u32 %s959_s20, 4  ;;  %335 = vst.msk [vmem:[#allocation2] sm:$0xff] %vm334_vm1, %v843_v4  ;;  %336 = vst.msk [vmem:[#allocation2 + $0x8] sm:$0xff] %vm334_vm1, %v843_v4  ;;  %v844_v9 = vmov 0   ;;  %v845_v10 = vmov 0.0   ;;  %vm339_vm3 = vcmask 261120   ;;  %v608_v59 = vstv %s607_s8 }
   0xe   : > { %s308_s26 = scalar_lea.vmem %s950_s2, %s897_s23  ;;  %s299_s29 = scalar_lea.vmem %s949_s1, %s897_s23  ;;  %805 = vset.pattern.permute.xlu1 %v844_v9  ;;  %806 = vset.pattern.permute.xlu0 %v844_v9  ;;  %337 = vst.msk [vmem:[#allocation3] sm:$0xff] %vm334_vm1, %v845_v10  ;;  %338 = vst.msk [vmem:[#allocation3 + $0x8] sm:$0xff] %vm334_vm1, %v845_v10 }
   0xf   : > { %v344_v0 = vld [vmem:[%s308_s26] sm:$0xff]  ;;  %v345_v1 = vld [vmem:[%s308_s26 + $0x8] sm:$0xff]  ;;  %s318_s7 = scalar_lea.vmem %s951_s3, %s897_s23  ;;  %340 = vst.msk [vmem:[#allocation4] sm:$0xff] %vm339_vm3, %v845_v10  ;;  %341 = vst.msk [vmem:[#allocation4 + $0x8] sm:$0xff] %vm339_vm3, %v845_v10  ;;  %s324_s11 = scalar_lea.vmem %s952_s4, %s897_s23 }
  0x10   : > { %764 = vmatprep.subr.msk.mxu0 %vm348_vm0, %v345_v1  ;;  %v342_v2 = vld [vmem:[%s299_s29] sm:$0xff]  ;;  %v343_v3 = vld [vmem:[%s299_s29 + $0x8] sm:$0xff]  ;;  %s329_s14 = scalar_lea.vmem %s953_s5, %s897_s23 }
  0x11   : > { %765 = vmatpush3.xpose.msk.msra.mxu0 %vm348_vm0, %v345_v1  ;;  %768 = vmatprep.mubr.msk.f32.mxu0 %vm348_vm0, %v342_v2  ;;  %v347_v19 = vld [vmem:[%s318_s7 + $0x8] sm:$0xff]  ;;  %v346_v20 = vld [vmem:[%s318_s7] sm:$0xff] }
  0x12   : > { %766 = vmatprep.subr.msk.mxu0 %vm348_vm0, %v344_v0  ;;  %771 = vmatprep.subr.mxu1 %v347_v19  ;;  %v611_v61 = vld [vmem:[%s324_s11] sm:$0xff] }
  0x13   : > { %772 = vmatpush3.msra.mxu1 %v347_v19 }
  0x14   : > { %v436_v11 = vld [vmem:[#allocation2] sm:$0xff]  ;;  %v437_v14 = vld [vmem:[#allocation2 + $0x8] sm:$0xff]  ;;  %773 = vmatprep.subr.mxu1 %v346_v20 }
  0x15   : > { %767 = vmatpush3.xpose.msk.msra.mxu0 %vm348_vm0, %v344_v0  ;;  %774 = vmatpush3.msra.mxu1 %v346_v20  ;;  %v469_v34 = vld [vmem:[#allocation3] sm:$0xff]  ;;  %v470_v38 = vld [vmem:[#allocation3 + $0x8] sm:$0xff] }
  0x16   : > { %v484_v45 = vld [vmem:[#allocation4] sm:$0xff]  ;;  %v485_v52 = vld [vmem:[#allocation4 + $0x8] sm:$0xff] }
  0x18   : > { %769 = vmatmul.mubr.msk.f32.vlgmr.msra.gmra.mxu0 %vm348_vm0, %v343_v3  ;;  %v612_v3 = vld [vmem:[%s324_s11 + $0x8] sm:$0xff] }
  0xd8   : > { %v770_v5 = vpop.f32.mrf.mxu0 }
  0xd9   : > { %v442_v8 = vsel %vm438_vm2, %v770_v5, -inf }
  0xda   : > { %v427_v6 = vpop.f32.mrf.mxu0 }
  0xdb   : > { %v439_v7 = vsel %vm438_vm2, %v427_v6, -inf }
  0xdc   : > { %440 = vmax.xlane.f32.xlu0 %v439_v7 }
  0xe0   : > { %443 = vmax.xlane.f32.xlu0 %v442_v8 }
 0x165   : > { %v441_v12 = vpop.xlane.xlu0 %440 }
 0x166   : > { %v445_v13 = vmax.f32 %v436_v11, %v441_v12 }
 0x168   : > { %v447_v15 = vsub.f32 %v436_v11, %v445_v13  ;;  %584 = vst.msk [vmem:[#allocation2] sm:$0xff] %vm334_vm1, %v445_v13  ;;  %455 = vperm.xlu1 %805, %v445_v13  }
 0x169   : > { %v444_v16 = vpop.xlane.xlu0 %443 }
 0x16a   : > { %v446_v17 = vmax.f32 %v437_v14, %v444_v16  ;;  %v449_v31 = vmul.f32 1.442695, %v447_v15 }
 0x16c   : > { %v448_v18 = vsub.f32 %v437_v14, %v446_v17  ;;  %585 = vst.msk [vmem:[#allocation2 + $0x8] sm:$0xff] %vm334_vm1, %v446_v17  ;;  %460 = vperm.xlu1 %805, %v446_v17  }
 0x16e   : > { %v451_v33 = vmul.f32 1.442695, %v448_v18 }
 0x1e3   : > { %v456_v21 = vpop.permute.xlu1 %455 }
 0x1e4   : > { %v463_v22 = vsub.f32 %v427_v6, %v456_v21 }
 0x1e6   : > { %v465_v23 = vmul.f32 1.442695, %v463_v22 }
 0x1e7   : > { %v461_v24 = vpop.permute.xlu1 %460 }
 0x1e8   : > { %807 = vpow2.f32 %v465_v23  ;;  %v464_v25 = vsub.f32 %v770_v5, %v461_v24 }
 0x1ea   : > { %v467_v26 = vmul.f32 1.442695, %v464_v25 }
 0x1ec   : > { %809 = vpow2.f32 %v467_v26 }
 0x1ed   : > { %811 = vpow2.f32 %v449_v31 }
 0x1ee   : > { %813 = vpow2.f32 %v451_v33 }
 0x1f5   : > { %v808_v27 = vpop.eup %807 }
 0x1f6   : > { %775 = vmatprep.mubr.msk.f32.mxu1 %vm438_vm2, %v808_v27  ;;  %v473_v28 = vsel %vm438_vm2, %v808_v27, 0.0 }
 0x1f7   : > { %474 = vadd.xlane.f32.xlu0 %v473_v28 }
 0x1f9   : > { %v810_v29 = vpop.eup %809 }
 0x1fa   : > { %776 = vmatmul.mubr.msk.f32.vlgmr.msra.gmra.mxu1 %vm438_vm2, %v810_v29  ;;  %v476_v30 = vsel %vm438_vm2, %v810_v29, 0.0  ;;  %v812_v32 = vpop.eup %811 }
 0x1fb   : > { %477 = vadd.xlane.f32.xlu1 %v476_v30  ;;  %v471_v35 = vmul.f32 %v812_v32, %v469_v34  ;;  %v814_v36 = vpop.eup %813 }
 0x1fc   : > { %v472_v40 = vmul.f32 %v814_v36, %v470_v38 }
 0x20d   : > { %488 = vperm.xlu0 %806, %v812_v32  }
 0x280   : > { %v475_v37 = vpop.xlane.xlu0 %474 }
 0x281   : > { %v479_v39 = vadd.f32 %v475_v37, %v471_v35 }
 0x283   : > { %482 = vst.msk [vmem:[#allocation3] sm:$0xff] %vm334_vm1, %v479_v39 }
 0x284   : > { %v478_v41 = vpop.xlane.xlu1 %477 }
 0x285   : > { %v480_v42 = vadd.f32 %v478_v41, %v472_v40 }
 0x287   : > { %483 = vst.msk [vmem:[#allocation3 + $0x8] sm:$0xff] %vm334_vm1, %v480_v42 }
 0x288   : > { %v489_v46 = vpop.permute.xlu0 %488 }
 0x289   : > { %v496_v48 = vmul.f32 %v489_v46, %v484_v45 }
 0x28a   : > { %v591_v43 = vld [vmem:[#allocation3] sm:$0xff] }
 0x28b   : > { %595 = vperm.xlu0 %806, %v591_v43  }
 0x28e   : > { %v592_v44 = vld [vmem:[#allocation3 + $0x8] sm:$0xff] }
 0x28f   : > { %600 = vperm.xlu1 %805, %v592_v44   ;;  %493 = vperm.xlu0 %806, %v814_v36  }
 0x2ba   : > { %v777_v47 = vpop.f32.mrf.mxu1 }
 0x2bc   : > { %v570_v49 = vpop.f32.mrf.mxu1 }
 0x2bd   : > { %v579_v50 = vadd.f32 %v570_v49, %v496_v48 }
 0x2bf   : > { %582 = vst.msk [vmem:[#allocation4] sm:$0xff] %vm339_vm3, %v579_v50 }
 0x2c6   : > { %v589_v58 = vld [vmem:[#allocation4] sm:$0xff] }
 0x306   : > { %v596_v51 = vpop.permute.xlu0 %595 }
 0x307   : > { %815 = vrcp.f32 %v596_v51 }
 0x30a   : > { %v601_v53 = vpop.permute.xlu1 %600  ;;  %v494_v54 = vpop.permute.xlu0 %493 }
 0x30b   : > { %817 = vrcp.f32 %v601_v53  ;;  %v497_v55 = vmul.f32 %v494_v54, %v485_v52 }
 0x30d   : > { %v580_v56 = vadd.f32 %v777_v47, %v497_v55 }
 0x30f   : > { %583 = vst.msk [vmem:[#allocation4 + $0x8] sm:$0xff] %vm339_vm3, %v580_v56 }
 0x314   : > { %v816_v57 = vpop.eup %815 }
 0x315   : > { %v604_v60 = vmul.f32 %v816_v57, %v589_v58 }
 0x316   : > { %v590_v0 = vld [vmem:[#allocation4 + $0x8] sm:$0xff] }
 0x317   : > { %v609_v62 = vmul.f32 %v608_v59, %v604_v60 }
 0x318   : > { %v818_v63 = vpop.eup %817 }
 0x319   : > { %v613_v1 = vadd.f32 %v611_v61, %v609_v62  ;;  %v606_v2 = vmul.f32 %v818_v63, %v590_v0 }
 0x31b   : > { %615 = vst.msk [vmem:[%s329_s14] sm:$0xff] %vm339_vm3, %v613_v1  ;;  %v610_v4 = vmul.f32 %v608_v59, %v606_v2 }
 0x31d   : > { %v614_v5 = vadd.f32 %v612_v3, %v610_v4 }
 0x31f   : > { %616 = vst.msk [vmem:[%s329_s14 + $0x8] sm:$0xff] %vm339_vm3, %v614_v5 }
 0x320 PF: > { %s16_s22 = sadd.s32 1, %s841_s22   ;;  %s954_s20 = smov %s837_s21 }
 0x321   : > { %p13_p5 = scmp.ge.s32.totalorder %s16_s22, 4   ;;  %s955_s21 = smov %s957_s0 }
 0x323   :  { %15 = sbr.rel (!%p13_p5) target bundleno = 2 (0x2), region = 87 }

// kernel: spade_generator_forward.39
= control target key start
LH: loop header
LB: loop body
LE: loop exit
PB: predicated region body
PF: predicated region fallthrough
CT: control target
= control target key end

     0   :  { %vm57_vm0 = vcmask 261120   ;;  %s217_s1 = inlined_call_operand.vmem [shape: bf16[32,128], index: 1, kind: input, shape index: {}]   ;;  %s218_s0 = inlined_call_operand.vmem [shape: bf16[32,32], index: 0, kind: input, shape index: {}]   ;;  %s219_s2 = inlined_call_operand.vmem [shape: f32[1,128], index: 2, kind: input, shape index: {}]   ;;  %s220_s3 = inlined_call_operand.vmem [shape: f32[32,128], index: 3, kind: output, shape index: {}]  }
   0x1   :  { %v166_v0 = vld [vmem:[%s217_s1 + $0x8] sm:$0xff]   ;;  %v167_v1 = vld [vmem:[%s217_s1] sm:$0xff]  }
   0x2   :  { %158 = vmatprep.subr.bf16.mxu0 %v166_v0  ;;  %v168_v2 = vld [vmem:[%s218_s0] sm:$0xff]   ;;  %v169_v3 = vld [vmem:[%s218_s0 + $0x8] sm:$0xff]  }
   0x3   :  { %159 = vmatpush3.bf16.msra.mxu0 %v166_v0  ;;  %162 = vmatprep.mubr.msk.bf16.mxu0 %vm57_vm0, %v168_v2  ;;  %v153_v4 = vld [vmem:[%s219_s2] ss:$0 sm:$0xff] }
   0x4   :  { %160 = vmatprep.subr.bf16.mxu0 %v167_v1 }
   0x7   :  { %161 = vmatpush3.bf16.msra.mxu0 %v167_v1 }
   0xa   :  { %163 = vmatmul.mubr.msk.bf16.vlgmr.msra.gmra.mxu0 %vm57_vm0, %v169_v3 }
  0xca   :  { %v164_v5 = vpop.f32.mrf.mxu0 }
  0xcb   :  { %v137_v6 = vadd.f32 %v164_v5, %v153_v4 }
  0xcc   :  { %v98_v7 = vpop.f32.mrf.mxu0 }
  0xcd   :  { %141 = vst [vmem:[%s220_s3 + $0x10] sm:$0xff] %v137_v6  ;;  %v135_v8 = vadd.f32 %v153_v4, %v98_v7 }
  0xce   :  { %v165_v9 = vpop.f32.mrf.mxu0 }
  0xcf   :  { %139 = vst [vmem:[%s220_s3] sm:$0xff] %v135_v8  ;;  %v138_v10 = vadd.f32 %v165_v9, %v153_v4 }
  0xd0   :  { %v101_v11 = vpop.f32.mrf.mxu0 }
  0xd1   :  { %142 = vst [vmem:[%s220_s3 + $0x18] sm:$0xff] %v138_v10  ;;  %v136_v12 = vadd.f32 %v153_v4, %v101_v11 }
  0xd3   :  { %140 = vst [vmem:[%s220_s3 + $0x8] sm:$0xff] %v136_v12 }

// kernel: spade_generator_forward.42
= control target key start
LH: loop header
LB: loop body
LE: loop exit
PB: predicated region body
PF: predicated region fallthrough
CT: control target
= control target key end

     0   :  { %vm49_vm0 = vcmask 130048   ;;  %s205_s1 = inlined_call_operand.vmem [shape: bf16[16,128], index: 1, kind: input, shape index: {}]   ;;  %s206_s0 = inlined_call_operand.vmem [shape: bf16[32,16], index: 0, kind: input, shape index: {}]   ;;  %s207_s2 = inlined_call_operand.vmem [shape: f32[1,128], index: 2, kind: input, shape index: {}]   ;;  %s208_s3 = inlined_call_operand.vmem [shape: f32[32,128], index: 3, kind: output, shape index: {}]  }
   0x1   :  { %v158_v0 = vld [vmem:[%s205_s1] sm:$0xff]   ;;  %v160_v2 = vld [vmem:[%s206_s0 + $0x8] sm:$0xff]  }
   0x2   :  { %v159_v1 = vld [vmem:[%s206_s0] sm:$0xff]   ;;  %152 = vmatprep.subr.bf16.mxu0 %v158_v0 }
   0x3   :  { %153 = vmatpush3.bf16.msra.mxu0 %v158_v0  ;;  %154 = vmatprep.mubr.msk.bf16.mxu0 %vm49_vm0, %v159_v1  ;;  %v148_v3 = vld [vmem:[%s207_s2] ss:$0 sm:$0xff] }
   0x6   :  { %155 = vmatmul.mubr.msk.bf16.vlgmr.msra.gmra.mxu0 %vm49_vm0, %v160_v2 }
  0xc6   :  { %v156_v4 = vpop.f32.mrf.mxu0 }
  0xc7   :  { %v129_v5 = vadd.f32 %v156_v4, %v148_v3 }
  0xc8   :  { %v90_v6 = vpop.f32.mrf.mxu0 }
  0xc9   :  { %v133_v7 = vmax.f32 %v129_v5, 0.0  ;;  %v127_v8 = vadd.f32 %v148_v3, %v90_v6 }
  0xca   :  { %v157_v9 = vpop.f32.mrf.mxu0 }
  0xcb   :  { %137 = vst [vmem:[%s208_s3 + $0x10] sm:$0xff] %v133_v7  ;;  %v131_v10 = vmax.f32 %v127_v8, 0.0  ;;  %v130_v11 = vadd.f32 %v157_v9, %v148_v3 }
  0xcc   :  { %v93_v12 = vpop.f32.mrf.mxu0 }
  0xcd   :  { %135 = vst [vmem:[%s208_s3] sm:$0xff] %v131_v10  ;;  %v134_v13 = vmax.f32 %v130_v11, 0.0  ;;  %v128_v14 = vadd.f32 %v148_v3, %v93_v12 }
  0xcf   :  { %138 = vst [vmem:[%s208_s3 + $0x18] sm:$0xff] %v134_v13  ;;  %v132_v15 = vmax.f32 %v128_v14, 0.0 }
  0xd1   :  { %136 = vst [vmem:[%s208_s3 + $0x8] sm:$0xff] %v132_v15 }

// kernel: spade_generator_forward.43
= control target key start
LH: loop header
LB: loop body
LE: loop exit
PB: predicated region body
PF: predicated region fallthrough
CT: control target
= control target key end

     0   :  { %s1033_s12 = smov 0   ;;  %s1035_s13 = smov 0   ;;  %s1149_s0 = inlined_call_operand.vmem [shape: bf16[32,1152], index: 0, kind: input, shape index: {}]   ;;  %s1150_s1 = inlined_call_operand.vmem [shape: bf16[1152,128], index: 1, kind: input, shape index: {}]   ;;  %s1151_s2 = inlined_call_operand.vmem [shape: f32[1,128], index: 2, kind: input, shape index: {}]   ;;  %s1152_s3 = inlined_call_operand.vmem [shape: f32[32,128], index: 3, kind: output, shape index: {}]  }
   0x1   :  { %s1037_s14 = smov 0   ;;  %s1039_s15 = smov 0  }
   0x2   :  { %s1041_s16 = smov 0  }
   0x3 LB: > { %s25_s17 = sadd.s32 1, %s1006_s15  ;;  %p48_p1 = scmp.ne.s32.totalorder %s998_s13, %s994_s12  ;;  %s1010_s16 = sphi %s1041_s16, %s13_s16   ;;  %s1006_s15 = sphi %s1039_s15, %s1156_s15   ;;  %s1002_s14 = sphi %s1037_s14, %s1155_s14   ;;  %s998_s13 = sphi %s1035_s13, %s1154_s13   ;;  %s994_s12 = sphi %s1033_s12, %s1153_s12  }
   0x4   : > { %p26_p0 = scmp.ge.s32.totalorder %s25_s17, 3  ;;  %p49_p2 = scmp.eq.s32.totalorder %s1010_s16, 0 }
   0x5   : > { %s41_s19 = sadd.s32 1, %s998_s13  ;;  %p789_p5 = scmp.ge.s32.totalorder %s1010_s16, 3 }
   0x6   : > { %s1158_s17 = smov (%p26_p0, %s25_s17), 0  ;;  %p50_p3 = por %p49_p2, %p48_p1 }
   0x7   : > { %s37_s18 = ssub.s32 %s1006_s15, %s1158_s17  ;;  %162 = sbr.rel (%p789_p5) target bundleno = 21 (0x15), region = 20 }
   0x8   : > { %p39_p4 = scmp.eq.s32.totalorder %s37_s18, 0 }
   0xa   : > { %s1068_s20 = scalar_select %p39_p4, %s998_s13, %s41_s19  }
   0xc   : > { %165 = sbr.rel (!%p50_p3) target bundleno = 21 (0x15), region = 24  ;;  %s167_s21 = sand.u32 (%p50_p3), 1, %s998_s13  }
   0xd   : > { %s838_s22 = smul.u32 (%p50_p3), 12, %s1006_s15 }
   0xe   : > { %s897_s23 = smul.u32 (%p50_p3), 48, %s167_s21 }
   0xf   : > { %s175_s26 = scalar_lea.vmem (%p50_p3), %s1149_s0, %s838_s22 }
  0x10   : > { %v190_v0 = vld [vmem:[%s175_s26] sm:$0xff] (%p50_p3)  ;;  %v194_v2 = vld [vmem:[%s175_s26 + $0x48] sm:$0xff] (%p50_p3)  ;;  %s169_s27 = scalar_lea.vmem (%p50_p3), [#allocation3], %s897_s23  ;;  %v795_v6 = vld [vmem:[%s175_s26 + $0x50] sm:$0xf] (%p50_p3) }
  0x11   : > { %v192_v1 = vld [vmem:[%s175_s26 + $0x24] sm:$0xff]  ;;  %191 = vst [vmem:[%s169_s27] sm:$0xff] %v190_v0  ;;  %195 = vst [vmem:[%s169_s27 + $0x18] sm:$0xff] %v194_v2  ;;  %v196_v3 = vld [vmem:[%s175_s26 + $0x6c] sm:$0xff] }
  0x12   : > { %193 = vst [vmem:[%s169_s27 + $0xc] sm:$0xff] %v192_v1  ;;  %v791_v4 = vld [vmem:[%s175_s26 + $0x8] sm:$0xf]  ;;  %v793_v5 = vld [vmem:[%s175_s26 + $0x2c] sm:$0xf]  ;;  %197 = vst [vmem:[%s169_s27 + $0x24] sm:$0xff] %v196_v3 }
  0x13   : > { %792 = vst [vmem:[%s169_s27 + $0x8] sm:$0xf] %v791_v4  ;;  %794 = vst [vmem:[%s169_s27 + $0x14] sm:$0xf] %v793_v5  ;;  %v797_v7 = vld [vmem:[%s175_s26 + $0x74] sm:$0xf] }
  0x14   : > { %796 = vst [vmem:[%s169_s27 + $0x20] sm:$0xf] %v795_v6  ;;  %798 = vst [vmem:[%s169_s27 + $0x2c] sm:$0xf] %v797_v7 }
  0x15 PF: > { %p799_p6 = scmp.ge.s32.totalorder %s1010_s16, 1  ;;  %p230_p7 = scmp.lt.s32.totalorder %s1010_s16, 4 }
  0x17   : > { %p231_p8 = pnand %p799_p6, %p230_p7 }
  0x18   : > { %s237_s28 = sand.u32 (!%p231_p8), 1, %s994_s12   ;;  %s276_s29 = smul.u32 (!%p231_p8), 48, %s1002_s14 }
  0x19   : > { %234 = sbr.rel (%p231_p8) target bundleno = 295 (0x127), region = 54  ;;  %p801_p10 = scmp.ne.s32.totalorder (!%p231_p8), %s1002_s14, 0 }
  0x1a   : > { %s898_s30 = smul.u32 (!%p231_p8), 48, %s237_s28  ;;  %p277_p9 = scmp.lt.s32.totalorder (!%p231_p8), %s276_s29, 143 }
  0x1c   : > { %s1085_s8 = scalar_lea.vmem (!%p231_p8), [#allocation3], %s898_s30 }
  0x1e   : > { %s1160_s29 = smov (!%p277_p9, %s276_s29), 143  ;;  %301 = sbr.rel (%p801_p10) target bundleno = 38 (0x26), region = 62 }
  0x1f   : > { %s800_s4 = sshll.u32 %s1160_s29, 2 }
  0x20   : > { %s1083_s7 = scalar_lea.vmem %s1150_s1, %s800_s4 }
  0x23   : > { %v1012_v8 = vmov 0.0  }
  0x24   : > { %302 = vst [vmem:[#allocation2 + $0x10] sm:$0xff] %v1012_v8  ;;  %303 = vst [vmem:[#allocation2] sm:$0xff] %v1012_v8 }
  0x25   : > { %304 = vst [vmem:[#allocation2 + $0x18] sm:$0xff] %v1012_v8  ;;  %305 = vst [vmem:[#allocation2 + $0x8] sm:$0xff] %v1012_v8 }
  0x26 PF: > { %v940_v9 = vld [vmem:[%s1083_s7 + $0x78] sm:$0xff]   ;;  %v943_v12 = vld [vmem:[%s1083_s7 + $0x70] sm:$0xff]   ;;  %v946_v15 = vld [vmem:[%s1083_s7 + $0x68] sm:$0xff]   ;;  %p832_p11 = scmp.ne.s32.totalorder %s1002_s14, 2 }
  0x27   : > { %v941_v10 = vld [vmem:[%s1083_s7 + $0x38] sm:$0xff]   ;;  %839 = vmatprep.subr.bf16.mxu0 %v940_v9  ;;  %v944_v13 = vld [vmem:[%s1083_s7 + $0x30] sm:$0xff]   ;;  %v947_v16 = vld [vmem:[%s1083_s7 + $0x28] sm:$0xff]  }
  0x28   : > { %v942_v11 = vld [vmem:[%s1083_s7 + $0xb8] sm:$0xff]   ;;  %840 = vmatpush3.bf16.msra.mxu0 %v941_v10  ;;  %v945_v14 = vld [vmem:[%s1083_s7 + $0xb0] sm:$0xff]   ;;  %v948_v17 = vld [vmem:[%s1083_s7 + $0xa8] sm:$0xff]  }
  0x29   : > { %877 = vmatprep.subr.bf16.mxu1 %v942_v11  ;;  %841 = vmatprep.subr.bf16.mxu0 %v943_v12  ;;  %v949_v18 = vld [vmem:[%s1083_s7 + $0x60] sm:$0xff]   ;;  %v952_v21 = vld [vmem:[%s1083_s7 + $0x58] sm:$0xff]   ;;  %v955_v24 = vld [vmem:[%s1083_s7 + $0x50] sm:$0xff]  }
  0x2a   : > { %878 = vmatpush3.bf16.msra.mxu1 %v942_v11  ;;  %v950_v19 = vld [vmem:[%s1083_s7 + $0x20] sm:$0xff]   ;;  %v954_v22 = vld [vmem:[%s1083_s7 + $0x98] sm:$0xff]   ;;  %v957_v25 = vld [vmem:[%s1083_s7 + $0x90] sm:$0xff]  }
  0x2b   : > { %879 = vmatprep.subr.bf16.mxu1 %v945_v14  ;;  %v951_v20 = vld [vmem:[%s1083_s7 + $0xa0] sm:$0xff]   ;;  %v953_v23 = vld [vmem:[%s1083_s7 + $0x18] sm:$0xff]   ;;  %v956_v26 = vld [vmem:[%s1083_s7 + $0x10] sm:$0xff]  }
  0x2c   : > { %842 = vmatpush3.bf16.msra.mxu0 %v944_v13  ;;  %v958_v27 = vld [vmem:[%s1083_s7 + $0x48] sm:$0xff]   ;;  %v961_v30 = vld [vmem:[%s1083_s7 + $0x40] sm:$0xff]   ;;  %v306_v44 = vld [vmem:[#allocation2 + $0x10] sm:$0xff] }
  0x2d   : > { %843 = vmatprep.subr.bf16.mxu0 %v946_v15  ;;  %v959_v28 = vld [vmem:[%s1083_s7 + $0x8] sm:$0xff]   ;;  %v963_v31 = vld [vmem:[%s1083_s7 + $0x80] sm:$0xff]   ;;  %v308_v58 = vld [vmem:[#allocation2 + $0x18] sm:$0xff] }
  0x2e   : > { %880 = vmatpush3.bf16.msra.mxu1 %v945_v14  ;;  %v960_v29 = vld [vmem:[%s1083_s7 + $0x88] sm:$0xff]   ;;  %v966_v32 = vld [vmem:[%s1085_s8 + $0x4] ss:$12 sps:$4 sm:$0xff]  }
  0x2f   : > { %881 = vmatprep.subr.bf16.mxu1 %v948_v17  ;;  %v967_v33 = vld [vmem:[%s1085_s8 + $0x8] ss:$12 sps:$4 sm:$0xff]   ;;  %574 = vmatprep.mubr.bf16.mxu0 %v966_v32  ;;  %v964_v35 = vld [vmem:[%s1085_s8] ss:$12 sps:$4 sm:$0xff]   ;;  %v971_v38 = vld [vmem:[%s1085_s8 + $0x18] ss:$12 sps:$4 sm:$0xff]  }
  0x30   : > { %844 = vmatpush3.bf16.msra.mxu0 %v947_v16  ;;  %v962_v34 = vld [vmem:[%s1083_s7] sm:$0xff]   ;;  %893 = vmatprep.mubr.bf16.mxu1 %v967_v33  ;;  %v969_v36 = vld [vmem:[%s1085_s8 + $0x1c] ss:$12 sps:$4 sm:$0xff]  }
  0x31   : > { %845 = vmatprep.subr.bf16.mxu0 %v949_v18  ;;  %v968_v37 = vld [vmem:[%s1085_s8 + $0x20] ss:$12 sps:$4 sm:$0xff]  }
  0x32   : > { %882 = vmatpush3.bf16.msra.mxu1 %v948_v17  ;;  %v307_v52 = vld [vmem:[#allocation2] sm:$0xff]  ;;  %v309_v0 = vld [vmem:[#allocation2 + $0x8] sm:$0xff] }
  0x33   : > { %883 = vmatprep.subr.bf16.mxu1 %v951_v20 }
  0x34   : > { %846 = vmatpush3.bf16.msra.mxu0 %v950_v19 }
  0x35   : > { %847 = vmatprep.subr.bf16.mxu0 %v952_v21 }
  0x36   : > { %884 = vmatpush3.bf16.msra.mxu1 %v951_v20 }
  0x37   : > { %885 = vmatprep.subr.bf16.mxu1 %v954_v22 }
  0x38   : > { %848 = vmatpush3.bf16.msra.mxu0 %v953_v23 }
  0x39   : > { %849 = vmatprep.subr.bf16.mxu0 %v955_v24 }
  0x3a   : > { %886 = vmatpush3.bf16.msra.mxu1 %v954_v22 }
  0x3b   : > { %887 = vmatprep.subr.bf16.mxu1 %v957_v25 }
  0x3c   : > { %850 = vmatpush3.bf16.msra.mxu0 %v956_v26 }
  0x3d   : > { %851 = vmatprep.subr.bf16.mxu0 %v958_v27 }
  0x3e   : > { %888 = vmatpush3.bf16.msra.mxu1 %v957_v25 }
  0x3f   : > { %889 = vmatprep.subr.bf16.mxu1 %v960_v29 }
  0x40   : > { %852 = vmatpush3.bf16.msra.mxu0 %v959_v28 }
  0x41   : > { %853 = vmatprep.subr.bf16.mxu0 %v961_v30 }
  0x42   : > { %890 = vmatpush3.bf16.msra.mxu1 %v960_v29 }
  0x43   : > { %891 = vmatprep.subr.bf16.mxu1 %v963_v31 }
  0x44   : > { %854 = vmatpush3.bf16.msra.mxu0 %v962_v34 }
  0x46   : > { %892 = vmatpush3.bf16.msra.mxu1 %v963_v31 }
  0x47   : > { %575 = vmatmul.mubr.bf16.vlgmr.msra.gmra.mxu0 %v964_v35 }
  0x48   : > { %582 = vmatprep.mubr.bf16.mxu0 %v969_v36 }
  0x49   : > { %894 = vmatmul.mubr.bf16.vlgmr.msra.gmra.mxu1 %v968_v37 }
  0x4f   : > { %583 = vmatmul.mubr.bf16.gmra.mxu0 %v971_v38 }
 0x107   : > { %v855_v39 = vpop.f32.mrf.mxu0 }
 0x109   : > { %v856_v40 = vpop.f32.mrf.mxu0  ;;  %v895_v41 = vpop.f32.mrf.mxu1 }
 0x10a   : > { %v857_v42 = vadd.f32 %v856_v40, %v855_v39 }
 0x10b   : > { %v858_v43 = vpop.f32.mrf.mxu0  ;;  %v625_v45 = vpop.f32.mrf.mxu1 }
 0x10c   : > { %v626_v46 = vadd.f32 %v857_v42, %v625_v45 }
 0x10d   : > { %v859_v47 = vpop.f32.mrf.mxu0  ;;  %v896_v48 = vpop.f32.mrf.mxu1 }
 0x10e   : > { %v640_v49 = vadd.f32 %v626_v46, %v306_v44  ;;  %v860_v50 = vadd.f32 %v859_v47, %v858_v43 }
 0x10f   : > { %v861_v51 = vpop.f32.mrf.mxu0  ;;  %v628_v53 = vpop.f32.mrf.mxu1 }
 0x110   : > { %644 = vst [vmem:[#allocation2 + $0x10] sm:$0xff] %v640_v49  ;;  %v629_v54 = vadd.f32 %v860_v50, %v628_v53 }
 0x111   : > { %v862_v55 = vpop.f32.mrf.mxu0 }
 0x112   : > { %v641_v56 = vadd.f32 %v629_v54, %v307_v52  ;;  %v863_v57 = vadd.f32 %v862_v55, %v861_v51 }
 0x113   : > { %v864_v59 = vpop.f32.mrf.mxu0 }
 0x114   : > { %645 = vst [vmem:[#allocation2] sm:$0xff] %v641_v56  ;;  %v634_v60 = vadd.f32 %v895_v41, %v863_v57 }
 0x115   : > { %v865_v61 = vpop.f32.mrf.mxu0 }
 0x116   : > { %v642_v62 = vadd.f32 %v634_v60, %v308_v58  ;;  %v866_v63 = vadd.f32 %v865_v61, %v864_v59 }
 0x118   : > { %646 = vst [vmem:[#allocation2 + $0x18] sm:$0xff] %v642_v62  ;;  %v637_v1 = vadd.f32 %v896_v48, %v866_v63  ;;  %651 = sbr.rel (%p832_p11) target bundleno = 295 (0x127), region = 66 }
 0x11a   : > { %v643_v2 = vadd.f32 %v637_v1, %v309_v0 }
 0x11c   : > { %647 = vst [vmem:[#allocation2 + $0x8] sm:$0xff] %v643_v2 }
 0x11d   : > { %v652_v3 = vld [vmem:[#allocation2 + $0x10] sm:$0xff]  ;;  %v833_v4 = vld [vmem:[%s1151_s2] ss:$0 sm:$0xff] }
 0x11e   : > { %v653_v5 = vld [vmem:[#allocation2] sm:$0xff]  ;;  %v663_v6 = vadd.f32 %v833_v4, %v652_v3 }
 0x11f   : > { %v664_v7 = vadd.f32 %v833_v4, %v653_v5  ;;  %v654_v8 = vld [vmem:[#allocation2 + $0x18] sm:$0xff] }
 0x120   : > { %v665_v10 = vadd.f32 %v833_v4, %v654_v8  ;;  %667 = vst [vmem:[%s1152_s3] sm:$0xff] %v663_v6 }
 0x121   : > { %668 = vst [vmem:[%s1152_s3 + $0x8] sm:$0xff] %v664_v7 }
 0x122   : > { %669 = vst [vmem:[%s1152_s3 + $0x10] sm:$0xff] %v665_v10 }
 0x123   : > { %v655_v9 = vld [vmem:[#allocation2 + $0x8] sm:$0xff] }
 0x124   : > { %v666_v11 = vadd.f32 %v833_v4, %v655_v9 }
 0x126   : > { %670 = vst [vmem:[%s1152_s3 + $0x18] sm:$0xff] %v666_v11 }
 0x127 PF: > { %s13_s16 = sadd.s32 1, %s1010_s16   ;;  %s1153_s12 = smov %s998_s13 }
 0x128   : > { %p10_p12 = scmp.ge.s32.totalorder %s13_s16, 5   ;;  %s1154_s13 = smov %s1068_s20 }
 0x129   : > { %s1155_s14 = smov %s1006_s15  ;;  %s1156_s15 = smov %s1158_s17 }
 0x12a   :  { %12 = sbr.rel (!%p10_p12) target bundleno = 3 (0x3), region = 113 }

// kernel: spade_generator_forward.44
= control target key start
LH: loop header
LB: loop body
LE: loop exit
PB: predicated region body
PF: predicated region fallthrough
CT: control target
= control target key end

     0   :  { %s1233_s18 = smov 0   ;;  %s1235_s19 = smov 0   ;;  %s1373_s0 = inlined_call_operand.vmem [shape: bf16[32,1152], index: 0, kind: input, shape index: {}]   ;;  %s1374_s1 = inlined_call_operand.vmem [shape: bf16[1152,128], index: 1, kind: input, shape index: {}]   ;;  %s1375_s2 = inlined_call_operand.vmem [shape: f32[1,128], index: 2, kind: input, shape index: {}]   ;;  %s1376_s3 = inlined_call_operand.vmem [shape: f32[32,128], index: 3, kind: input, shape index: {}]   ;;  %s1377_s4 = inlined_call_operand.vmem [shape: f32[32,128], index: 4, kind: input, shape index: {}]   ;;  %s1378_s5 = inlined_call_operand.vmem [shape: f32[32,128], index: 5, kind: output, shape index: {}]  }
   0x1   :  { %s1237_s20 = smov 0   ;;  %s1239_s21 = smov 0  }
   0x2   :  { %s1241_s22 = smov 0  }
   0x3 LB: > { %s27_s23 = sadd.s32 1, %s1196_s21  ;;  %p50_p1 = scmp.ne.s32.totalorder %s1188_s19, %s1184_s18  ;;  %s1200_s22 = sphi %s1241_s22, %s15_s22   ;;  %s1196_s21 = sphi %s1239_s21, %s1382_s21   ;;  %s1192_s20 = sphi %s1237_s20, %s1381_s20   ;;  %s1188_s19 = sphi %s1235_s19, %s1380_s19   ;;  %s1184_s18 = sphi %s1233_s18, %s1379_s18  }
   0x4   : > { %p28_p0 = scmp.ge.s32.totalorder %s27_s23, 3  ;;  %p51_p2 = scmp.eq.s32.totalorder %s1200_s22, 0 }
   0x5   : > { %s43_s25 = sadd.s32 1, %s1188_s19  ;;  %p979_p5 = scmp.ge.s32.totalorder %s1200_s22, 3 }
   0x6   : > { %s1384_s23 = smov (%p28_p0, %s27_s23), 0  ;;  %p52_p3 = por %p51_p2, %p50_p1 }
   0x7   : > { %s39_s24 = ssub.s32 %s1196_s21, %s1384_s23  ;;  %244 = sbr.rel (%p979_p5) target bundleno = 21 (0x15), region = 28 }
   0x8   : > { %p41_p4 = scmp.eq.s32.totalorder %s39_s24, 0 }
   0xa   : > { %s1268_s26 = scalar_select %p41_p4, %s1188_s19, %s43_s25  }
   0xc   : > { %247 = sbr.rel (!%p52_p3) target bundleno = 21 (0x15), region = 32  ;;  %s249_s27 = sand.u32 (%p52_p3), 1, %s1188_s19  }
   0xd   : > { %s1028_s28 = smul.u32 (%p52_p3), 12, %s1196_s21 }
   0xe   : > { %s1087_s29 = smul.u32 (%p52_p3), 48, %s249_s27 }
   0xf   : > { %s257_s7 = scalar_lea.vmem (%p52_p3), %s1373_s0, %s1028_s28 }
  0x10   : > { %v272_v0 = vld [vmem:[%s257_s7] sm:$0xff] (%p52_p3)  ;;  %v276_v2 = vld [vmem:[%s257_s7 + $0x48] sm:$0xff] (%p52_p3)  ;;  %s251_s8 = scalar_lea.vmem (%p52_p3), [#allocation3], %s1087_s29  ;;  %v985_v6 = vld [vmem:[%s257_s7 + $0x50] sm:$0xf] (%p52_p3) }
  0x11   : > { %v274_v1 = vld [vmem:[%s257_s7 + $0x24] sm:$0xff]  ;;  %273 = vst [vmem:[%s251_s8] sm:$0xff] %v272_v0  ;;  %277 = vst [vmem:[%s251_s8 + $0x18] sm:$0xff] %v276_v2  ;;  %v278_v3 = vld [vmem:[%s257_s7 + $0x6c] sm:$0xff] }
  0x12   : > { %275 = vst [vmem:[%s251_s8 + $0xc] sm:$0xff] %v274_v1  ;;  %v981_v4 = vld [vmem:[%s257_s7 + $0x8] sm:$0xf]  ;;  %v983_v5 = vld [vmem:[%s257_s7 + $0x2c] sm:$0xf]  ;;  %279 = vst [vmem:[%s251_s8 + $0x24] sm:$0xff] %v278_v3 }
  0x13   : > { %982 = vst [vmem:[%s251_s8 + $0x8] sm:$0xf] %v981_v4  ;;  %984 = vst [vmem:[%s251_s8 + $0x14] sm:$0xf] %v983_v5  ;;  %v987_v7 = vld [vmem:[%s257_s7 + $0x74] sm:$0xf] }
  0x14   : > { %986 = vst [vmem:[%s251_s8 + $0x20] sm:$0xf] %v985_v6  ;;  %988 = vst [vmem:[%s251_s8 + $0x2c] sm:$0xf] %v987_v7 }
  0x15 PF: > { %p989_p6 = scmp.ge.s32.totalorder %s1200_s22, 1  ;;  %p312_p7 = scmp.lt.s32.totalorder %s1200_s22, 4 }
  0x17   : > { %p313_p8 = pnand %p989_p6, %p312_p7 }
  0x18   : > { %s319_s9 = sand.u32 (!%p313_p8), 1, %s1184_s18   ;;  %s378_s10 = smul.u32 (!%p313_p8), 48, %s1192_s20 }
  0x19   : > { %316 = sbr.rel (%p313_p8) target bundleno = 300 (0x12c), region = 62  ;;  %p991_p10 = scmp.ne.s32.totalorder (!%p313_p8), %s1192_s20, 0 }
  0x1a   : > { %s1088_s11 = smul.u32 (!%p313_p8), 48, %s319_s9  ;;  %p379_p9 = scmp.lt.s32.totalorder (!%p313_p8), %s378_s10, 143 }
  0x1c   : > { %s1285_s16 = scalar_lea.vmem (!%p313_p8), [#allocation3], %s1088_s11 }
  0x1e   : > { %s1386_s10 = smov (!%p379_p9, %s378_s10), 143  ;;  %421 = sbr.rel (%p991_p10) target bundleno = 38 (0x26), region = 70 }
  0x1f   : > { %s990_s12 = sshll.u32 %s1386_s10, 2 }
  0x20   : > { %s1283_s15 = scalar_lea.vmem %s1374_s1, %s990_s12 }
  0x23   : > { %v1202_v8 = vmov 0.0  }
  0x24   : > { %422 = vst [vmem:[#allocation2 + $0x10] sm:$0xff] %v1202_v8  ;;  %423 = vst [vmem:[#allocation2] sm:$0xff] %v1202_v8 }
  0x25   : > { %424 = vst [vmem:[#allocation2 + $0x18] sm:$0xff] %v1202_v8  ;;  %425 = vst [vmem:[#allocation2 + $0x8] sm:$0xff] %v1202_v8 }
  0x26 PF: > { %v1130_v9 = vld [vmem:[%s1283_s15 + $0x78] sm:$0xff]   ;;  %v1133_v12 = vld [vmem:[%s1283_s15 + $0x70] sm:$0xff]   ;;  %v1136_v15 = vld [vmem:[%s1283_s15 + $0x68] sm:$0xff]   ;;  %p1022_p11 = scmp.ne.s32.totalorder %s1192_s20, 2 }
  0x27   : > { %v1131_v10 = vld [vmem:[%s1283_s15 + $0x38] sm:$0xff]   ;;  %1029 = vmatprep.subr.bf16.mxu0 %v1130_v9  ;;  %v1134_v13 = vld [vmem:[%s1283_s15 + $0x30] sm:$0xff]   ;;  %v1137_v16 = vld [vmem:[%s1283_s15 + $0x28] sm:$0xff]  }
  0x28   : > { %v1132_v11 = vld [vmem:[%s1283_s15 + $0xb8] sm:$0xff]   ;;  %1030 = vmatpush3.bf16.msra.mxu0 %v1131_v10  ;;  %v1135_v14 = vld [vmem:[%s1283_s15 + $0xb0] sm:$0xff]   ;;  %v1138_v17 = vld [vmem:[%s1283_s15 + $0xa8] sm:$0xff]  }
  0x29   : > { %1067 = vmatprep.subr.bf16.mxu1 %v1132_v11  ;;  %1031 = vmatprep.subr.bf16.mxu0 %v1133_v12  ;;  %v1139_v18 = vld [vmem:[%s1283_s15 + $0x60] sm:$0xff]   ;;  %v1142_v21 = vld [vmem:[%s1283_s15 + $0x58] sm:$0xff]   ;;  %v1145_v24 = vld [vmem:[%s1283_s15 + $0x50] sm:$0xff]  }
  0x2a   : > { %1068 = vmatpush3.bf16.msra.mxu1 %v1132_v11  ;;  %v1140_v19 = vld [vmem:[%s1283_s15 + $0x20] sm:$0xff]   ;;  %v1144_v22 = vld [vmem:[%s1283_s15 + $0x98] sm:$0xff]   ;;  %v1147_v25 = vld [vmem:[%s1283_s15 + $0x90] sm:$0xff]  }
  0x2b   : > { %1069 = vmatprep.subr.bf16.mxu1 %v1135_v14  ;;  %v1141_v20 = vld [vmem:[%s1283_s15 + $0xa0] sm:$0xff]   ;;  %v1143_v23 = vld [vmem:[%s1283_s15 + $0x18] sm:$0xff]   ;;  %v1146_v26 = vld [vmem:[%s1283_s15 + $0x10] sm:$0xff]  }
  0x2c   : > { %1032 = vmatpush3.bf16.msra.mxu0 %v1134_v13  ;;  %v1148_v27 = vld [vmem:[%s1283_s15 + $0x48] sm:$0xff]   ;;  %v1151_v30 = vld [vmem:[%s1283_s15 + $0x40] sm:$0xff]   ;;  %v426_v44 = vld [vmem:[#allocation2 + $0x10] sm:$0xff] }
  0x2d   : > { %1033 = vmatprep.subr.bf16.mxu0 %v1136_v15  ;;  %v1149_v28 = vld [vmem:[%s1283_s15 + $0x8] sm:$0xff]   ;;  %v1153_v31 = vld [vmem:[%s1283_s15 + $0x80] sm:$0xff]   ;;  %v428_v58 = vld [vmem:[#allocation2 + $0x18] sm:$0xff] }
  0x2e   : > { %1070 = vmatpush3.bf16.msra.mxu1 %v1135_v14  ;;  %v1150_v29 = vld [vmem:[%s1283_s15 + $0x88] sm:$0xff]   ;;  %v1156_v32 = vld [vmem:[%s1285_s16 + $0x4] ss:$12 sps:$4 sm:$0xff]  }
  0x2f   : > { %1071 = vmatprep.subr.bf16.mxu1 %v1138_v17  ;;  %v1157_v33 = vld [vmem:[%s1285_s16 + $0x8] ss:$12 sps:$4 sm:$0xff]   ;;  %694 = vmatprep.mubr.bf16.mxu0 %v1156_v32  ;;  %v1154_v35 = vld [vmem:[%s1285_s16] ss:$12 sps:$4 sm:$0xff]   ;;  %v1161_v38 = vld [vmem:[%s1285_s16 + $0x18] ss:$12 sps:$4 sm:$0xff]  }
  0x30   : > { %1034 = vmatpush3.bf16.msra.mxu0 %v1137_v16  ;;  %v1152_v34 = vld [vmem:[%s1283_s15] sm:$0xff]   ;;  %1083 = vmatprep.mubr.bf16.mxu1 %v1157_v33  ;;  %v1159_v36 = vld [vmem:[%s1285_s16 + $0x1c] ss:$12 sps:$4 sm:$0xff]  }
  0x31   : > { %1035 = vmatprep.subr.bf16.mxu0 %v1139_v18  ;;  %v1158_v37 = vld [vmem:[%s1285_s16 + $0x20] ss:$12 sps:$4 sm:$0xff]  }
  0x32   : > { %1072 = vmatpush3.bf16.msra.mxu1 %v1138_v17  ;;  %v427_v52 = vld [vmem:[#allocation2] sm:$0xff]  ;;  %v429_v0 = vld [vmem:[#allocation2 + $0x8] sm:$0xff] }
  0x33   : > { %1073 = vmatprep.subr.bf16.mxu1 %v1141_v20 }
  0x34   : > { %1036 = vmatpush3.bf16.msra.mxu0 %v1140_v19 }
  0x35   : > { %1037 = vmatprep.subr.bf16.mxu0 %v1142_v21 }
  0x36   : > { %1074 = vmatpush3.bf16.msra.mxu1 %v1141_v20 }
  0x37   : > { %1075 = vmatprep.subr.bf16.mxu1 %v1144_v22 }
  0x38   : > { %1038 = vmatpush3.bf16.msra.mxu0 %v1143_v23 }
  0x39   : > { %1039 = vmatprep.subr.bf16.mxu0 %v1145_v24 }
  0x3a   : > { %1076 = vmatpush3.bf16.msra.mxu1 %v1144_v22 }
  0x3b   : > { %1077 = vmatprep.subr.bf16.mxu1 %v1147_v25 }
  0x3c   : > { %1040 = vmatpush3.bf16.msra.mxu0 %v1146_v26 }
  0x3d   : > { %1041 = vmatprep.subr.bf16.mxu0 %v1148_v27 }
  0x3e   : > { %1078 = vmatpush3.bf16.msra.mxu1 %v1147_v25 }
  0x3f   : > { %1079 = vmatprep.subr.bf16.mxu1 %v1150_v29 }
  0x40   : > { %1042 = vmatpush3.bf16.msra.mxu0 %v1149_v28 }
  0x41   : > { %1043 = vmatprep.subr.bf16.mxu0 %v1151_v30 }
  0x42   : > { %1080 = vmatpush3.bf16.msra.mxu1 %v1150_v29 }
  0x43   : > { %1081 = vmatprep.subr.bf16.mxu1 %v1153_v31 }
  0x44   : > { %1044 = vmatpush3.bf16.msra.mxu0 %v1152_v34 }
  0x46   : > { %1082 = vmatpush3.bf16.msra.mxu1 %v1153_v31 }
  0x47   : > { %695 = vmatmul.mubr.bf16.vlgmr.msra.gmra.mxu0 %v1154_v35 }
  0x48   : > { %702 = vmatprep.mubr.bf16.mxu0 %v1159_v36 }
  0x49   : > { %1084 = vmatmul.mubr.bf16.vlgmr.msra.gmra.mxu1 %v1158_v37 }
  0x4f   : > { %703 = vmatmul.mubr.bf16.gmra.mxu0 %v1161_v38 }
 0x107   : > { %v1045_v39 = vpop.f32.mrf.mxu0 }
 0x109   : > { %v1046_v40 = vpop.f32.mrf.mxu0  ;;  %v1085_v41 = vpop.f32.mrf.mxu1 }
 0x10a   : > { %v1047_v42 = vadd.f32 %v1046_v40, %v1045_v39 }
 0x10b   : > { %v1048_v43 = vpop.f32.mrf.mxu0  ;;  %v745_v45 = vpop.f32.mrf.mxu1 }
 0x10c   : > { %v746_v46 = vadd.f32 %v1047_v42, %v745_v45 }
 0x10d   : > { %v1049_v47 = vpop.f32.mrf.mxu0  ;;  %v1086_v48 = vpop.f32.mrf.mxu1 }
 0x10e   : > { %v760_v49 = vadd.f32 %v746_v46, %v426_v44  ;;  %v1050_v50 = vadd.f32 %v1049_v47, %v1048_v43 }
 0x10f   : > { %v1051_v51 = vpop.f32.mrf.mxu0  ;;  %v748_v53 = vpop.f32.mrf.mxu1 }
 0x110   : > { %764 = vst [vmem:[#allocation2 + $0x10] sm:$0xff] %v760_v49  ;;  %v749_v54 = vadd.f32 %v1050_v50, %v748_v53 }
 0x111   : > { %v1052_v55 = vpop.f32.mrf.mxu0 }
 0x112   : > { %v761_v56 = vadd.f32 %v749_v54, %v427_v52  ;;  %v1053_v57 = vadd.f32 %v1052_v55, %v1051_v51 }
 0x113   : > { %v1054_v59 = vpop.f32.mrf.mxu0 }
 0x114   : > { %765 = vst [vmem:[#allocation2] sm:$0xff] %v761_v56  ;;  %v754_v60 = vadd.f32 %v1085_v41, %v1053_v57 }
 0x115   : > { %v1055_v61 = vpop.f32.mrf.mxu0 }
 0x116   : > { %v762_v62 = vadd.f32 %v754_v60, %v428_v58  ;;  %v1056_v63 = vadd.f32 %v1055_v61, %v1054_v59 }
 0x118   : > { %766 = vst [vmem:[#allocation2 + $0x18] sm:$0xff] %v762_v62  ;;  %v757_v1 = vadd.f32 %v1086_v48, %v1056_v63  ;;  %771 = sbr.rel (%p1022_p11) target bundleno = 300 (0x12c), region = 74 }
 0x11a   : > { %v763_v2 = vadd.f32 %v757_v1, %v429_v0 }
 0x11c   : > { %767 = vst [vmem:[#allocation2 + $0x8] sm:$0xff] %v763_v2 }
 0x11d   : > { %v772_v3 = vld [vmem:[#allocation2 + $0x10] sm:$0xff]  ;;  %v1023_v4 = vld [vmem:[%s1375_s2] ss:$0 sm:$0xff]  ;;  %v788_v10 = vld [vmem:[%s1376_s3 + $0x8] sm:$0xff] }
 0x11e   : > { %v787_v5 = vld [vmem:[%s1376_s3] sm:$0xff]  ;;  %v783_v8 = vadd.f32 %v1023_v4, %v772_v3  ;;  %v792_v11 = vld [vmem:[%s1377_s4 + $0x8] sm:$0xff]  ;;  %v789_v15 = vld [vmem:[%s1376_s3 + $0x10] sm:$0xff] }
 0x11f   : > { %v791_v6 = vld [vmem:[%s1377_s4] sm:$0xff]  ;;  %v774_v12 = vld [vmem:[#allocation2 + $0x18] sm:$0xff]  ;;  %v796_v14 = vadd.f32 1.0, %v792_v11  ;;  %v793_v16 = vld [vmem:[%s1377_s4 + $0x10] sm:$0xff] }
 0x120   : > { %v773_v7 = vld [vmem:[#allocation2] sm:$0xff]  ;;  %v795_v9 = vadd.f32 1.0, %v791_v6  ;;  %v785_v19 = vadd.f32 %v1023_v4, %v774_v12  ;;  %v797_v20 = vadd.f32 1.0, %v793_v16  ;;  %v790_v21 = vld [vmem:[%s1376_s3 + $0x18] sm:$0xff] }
 0x121   : > { %v784_v13 = vadd.f32 %v1023_v4, %v773_v7  ;;  %v794_v22 = vld [vmem:[%s1377_s4 + $0x18] sm:$0xff]  ;;  %v800_v23 = vmul.f32 %v796_v14, %v788_v10 }
 0x122   : > { %v799_v18 = vmul.f32 %v795_v9, %v787_v5  ;;  %v798_v25 = vadd.f32 1.0, %v794_v22  ;;  %v801_v27 = vmul.f32 %v797_v20, %v789_v15 }
 0x123   : > { %v775_v17 = vld [vmem:[#allocation2 + $0x8] sm:$0xff]  ;;  %v804_v28 = vadd.f32 %v800_v23, %v784_v13 }
 0x124   : > { %v786_v24 = vadd.f32 %v1023_v4, %v775_v17  ;;  %v803_v26 = vadd.f32 %v799_v18, %v783_v8  ;;  %v802_v29 = vmul.f32 %v798_v25, %v790_v21  ;;  %v805_v31 = vadd.f32 %v801_v27, %v785_v19 }
 0x125   : > { %vm808_vm1 = vcmp.gt.f32.partialorder %v804_v28, 0.0  ;;  %v812_v32 = vmul.f32 0.2, %v804_v28 }
 0x126   : > { %vm807_vm0 = vcmp.gt.f32.partialorder %v803_v26, 0.0  ;;  %v811_v30 = vmul.f32 0.2, %v803_v26  ;;  %v806_v33 = vadd.f32 %v802_v29, %v786_v24  ;;  %vm809_vm2 = vcmp.gt.f32.partialorder %v805_v31, 0.0 }
 0x127   : > { %v813_v35 = vmul.f32 0.2, %v805_v31  ;;  %v816_v36 = vsel %vm808_vm1, %v804_v28, %v812_v32 }
 0x128   : > { %v815_v34 = vsel %vm807_vm0, %v803_v26, %v811_v30  ;;  %vm810_vm3 = vcmp.gt.f32.partialorder %v806_v33, 0.0  ;;  %v814_v37 = vmul.f32 0.2, %v806_v33  ;;  %820 = vst [vmem:[%s1378_s5 + $0x8] sm:$0xff] %v816_v36 }
 0x129   : > { %819 = vst [vmem:[%s1378_s5] sm:$0xff] %v815_v34  ;;  %v817_v38 = vsel %vm809_vm2, %v805_v31, %v813_v35 }
 0x12a   : > { %821 = vst [vmem:[%s1378_s5 + $0x10] sm:$0xff] %v817_v38  ;;  %v818_v39 = vsel %vm810_vm3, %v806_v33, %v814_v37 }
 0x12b   : > { %822 = vst [vmem:[%s1378_s5 + $0x18] sm:$0xff] %v818_v39 }
 0x12c PF: > { %s15_s22 = sadd.s32 1, %s1200_s22   ;;  %s1379_s18 = smov %s1188_s19 }
 0x12d   : > { %p12_p12 = scmp.ge.s32.totalorder %s15_s22, 5   ;;  %s1380_s19 = smov %s1268_s26 }
 0x12e   : > { %s1381_s20 = smov %s1196_s21  ;;  %s1382_s21 = smov %s1384_s23 }
 0x12f   :  { %14 = sbr.rel (!%p12_p12) target bundleno = 3 (0x3), region = 127 }

// kernel: spade_generator_forward.45
= control target key start
LH: loop header
LB: loop body
LE: loop exit
PB: predicated region body
PF: predicated region fallthrough
CT: control target
= control target key end

     0   :  { %vm209_vm0 = vcmask 261120   ;;  %s548_s1 = inlined_call_operand.vmem [shape: bf16[288,128], index: 1, kind: input, shape index: {}]   ;;  %s549_s0 = inlined_call_operand.vmem [shape: bf16[32,288], index: 0, kind: input, shape index: {}]   ;;  %s550_s2 = inlined_call_operand.vmem [shape: f32[1,128], index: 2, kind: input, shape index: {}]   ;;  %s551_s3 = inlined_call_operand.vmem [shape: f32[32,128], index: 3, kind: output, shape index: {}]  }
   0x1   :  { %v415_v0 = vld [vmem:[%s548_s1 + $0x78] sm:$0xff]   ;;  %v417_v2 = vld [vmem:[%s548_s1 + $0x70] sm:$0xff]   ;;  %v419_v4 = vld [vmem:[%s548_s1 + $0x68] sm:$0xff]  }
   0x2   :  { %v416_v1 = vld [vmem:[%s548_s1 + $0x38] sm:$0xff]   ;;  %375 = vmatprep.subr.bf16.mxu0 %v415_v0  ;;  %v418_v3 = vld [vmem:[%s548_s1 + $0x30] sm:$0xff]   ;;  %v420_v5 = vld [vmem:[%s548_s1 + $0x28] sm:$0xff]  }
   0x3   :  { %376 = vmatpush3.bf16.msra.mxu0 %v416_v1  ;;  %v421_v6 = vld [vmem:[%s548_s1 + $0x60] sm:$0xff]   ;;  %v423_v8 = vld [vmem:[%s548_s1 + $0x58] sm:$0xff]   ;;  %v429_v9 = vld [vmem:[%s548_s1 + $0x88] sm:$0xff]  }
   0x4   :  { %377 = vmatprep.subr.bf16.mxu0 %v417_v2  ;;  %v422_v7 = vld [vmem:[%s548_s1 + $0x20] sm:$0xff]   ;;  %v424_v10 = vld [vmem:[%s548_s1 + $0x18] sm:$0xff]   ;;  %v425_v11 = vld [vmem:[%s548_s1 + $0x50] sm:$0xff]   ;;  %407 = vmatprep.subr.bf16.mxu1 %v429_v9 }
   0x5   :  { %v426_v12 = vld [vmem:[%s548_s1 + $0x10] sm:$0xff]   ;;  %408 = vmatpush3.bf16.msra.mxu1 %v429_v9  ;;  %v432_v13 = vld [vmem:[%s548_s1 + $0x80] sm:$0xff]   ;;  %v427_v14 = vld [vmem:[%s548_s1 + $0x48] sm:$0xff]  }
   0x6   :  { %409 = vmatprep.subr.bf16.mxu1 %v432_v13  ;;  %v435_v15 = vld [vmem:[%s549_s0 + $0x4] ss:$12 sps:$4 sm:$0xff]   ;;  %v436_v16 = vld [vmem:[%s549_s0 + $0x8] ss:$12 sps:$4 sm:$0xff]   ;;  %v437_v17 = vld [vmem:[%s549_s0 + $0x20] ss:$12 sps:$4 sm:$0xff]  }
   0x7   :  { %378 = vmatpush3.bf16.msra.mxu0 %v418_v3  ;;  %248 = vmatprep.mubr.bf16.mxu0 %v435_v15  ;;  %v428_v18 = vld [vmem:[%s548_s1 + $0x8] sm:$0xff]   ;;  %v430_v19 = vld [vmem:[%s548_s1 + $0x40] sm:$0xff]  }
   0x8   :  { %379 = vmatprep.subr.bf16.mxu0 %v419_v4  ;;  %411 = vmatprep.mubr.msk.bf16.mxu1 %vm209_vm0, %v436_v16  ;;  %v431_v20 = vld [vmem:[%s548_s1] sm:$0xff]   ;;  %v438_v22 = vld [vmem:[%s549_s0 + $0x1c] ss:$12 sps:$4 sm:$0xff]  }
   0x9   :  { %410 = vmatpush3.bf16.msra.mxu1 %v432_v13  ;;  %v433_v21 = vld [vmem:[%s549_s0] ss:$12 sps:$4 sm:$0xff]   ;;  %v440_v23 = vld [vmem:[%s549_s0 + $0x18] ss:$12 sps:$4 sm:$0xff]  }
   0xa   :  { %v374_v31 = vld [vmem:[%s550_s2] ss:$0 sm:$0xff] }
   0xb   :  { %380 = vmatpush3.bf16.msra.mxu0 %v420_v5 }
   0xc   :  { %381 = vmatprep.subr.bf16.mxu0 %v421_v6  ;;  %412 = vmatmul.mubr.msk.bf16.vlgmr.msra.gmra.mxu1 %vm209_vm0, %v437_v17 }
   0xf   :  { %382 = vmatpush3.bf16.msra.mxu0 %v422_v7 }
  0x10   :  { %383 = vmatprep.subr.bf16.mxu0 %v423_v8 }
  0x13   :  { %384 = vmatpush3.bf16.msra.mxu0 %v424_v10 }
  0x14   :  { %385 = vmatprep.subr.bf16.mxu0 %v425_v11 }
  0x17   :  { %386 = vmatpush3.bf16.msra.mxu0 %v426_v12 }
  0x18   :  { %387 = vmatprep.subr.bf16.mxu0 %v427_v14 }
  0x1b   :  { %388 = vmatpush3.bf16.msra.mxu0 %v428_v18 }
  0x1c   :  { %389 = vmatprep.subr.bf16.mxu0 %v430_v19 }
  0x1f   :  { %390 = vmatpush3.bf16.msra.mxu0 %v431_v20 }
  0x22   :  { %249 = vmatmul.mubr.bf16.vlgmr.msra.gmra.mxu0 %v433_v21 }
  0x23   :  { %256 = vmatprep.mubr.bf16.mxu0 %v438_v22 }
  0x2a   :  { %257 = vmatmul.mubr.bf16.gmra.mxu0 %v440_v23 }
  0xcc   :  { %v413_v24 = vpop.f32.mrf.mxu1 }
  0xce   :  { %v299_v25 = vpop.f32.mrf.mxu1 }
  0xd0   :  { %v414_v28 = vpop.f32.mrf.mxu1 }
  0xd2   :  { %v302_v34 = vpop.f32.mrf.mxu1 }
  0xe2   :  { %v391_v26 = vpop.f32.mrf.mxu0 }
  0xe4   :  { %v392_v27 = vpop.f32.mrf.mxu0 }
  0xe5   :  { %v393_v29 = vadd.f32 %v392_v27, %v391_v26 }
  0xe6   :  { %v394_v30 = vpop.f32.mrf.mxu0 }
  0xe7   :  { %v300_v32 = vadd.f32 %v393_v29, %v299_v25 }
  0xe8   :  { %v395_v33 = vpop.f32.mrf.mxu0 }
  0xe9   :  { %v336_v35 = vadd.f32 %v374_v31, %v300_v32  ;;  %v396_v36 = vadd.f32 %v395_v33, %v394_v30 }
  0xea   :  { %v397_v37 = vpop.f32.mrf.mxu0 }
  0xeb   :  { %340 = vst [vmem:[%s551_s3] sm:$0xff] %v336_v35  ;;  %v303_v38 = vadd.f32 %v396_v36, %v302_v34 }
  0xec   :  { %v398_v39 = vpop.f32.mrf.mxu0 }
  0xed   :  { %v337_v40 = vadd.f32 %v374_v31, %v303_v38  ;;  %v399_v41 = vadd.f32 %v398_v39, %v397_v37 }
  0xee   :  { %v400_v42 = vpop.f32.mrf.mxu0 }
  0xef   :  { %341 = vst [vmem:[%s551_s3 + $0x8] sm:$0xff] %v337_v40  ;;  %v308_v43 = vadd.f32 %v413_v24, %v399_v41 }
  0xf0   :  { %v401_v44 = vpop.f32.mrf.mxu0 }
  0xf1   :  { %v338_v45 = vadd.f32 %v374_v31, %v308_v43  ;;  %v402_v46 = vadd.f32 %v401_v44, %v400_v42 }
  0xf3   :  { %342 = vst [vmem:[%s551_s3 + $0x10] sm:$0xff] %v338_v45  ;;  %v311_v47 = vadd.f32 %v414_v28, %v402_v46 }
  0xf5   :  { %v339_v48 = vadd.f32 %v374_v31, %v311_v47 }
  0xf7   :  { %343 = vst [vmem:[%s551_s3 + $0x18] sm:$0xff] %v339_v48 }

// kernel: spade_generator_forward.50
= control target key start
LH: loop header
LB: loop body
LE: loop exit
PB: predicated region body
PF: predicated region fallthrough
CT: control target
= control target key end

     0   :  { %vm212_vm0 = vcmask 261120   ;;  %s576_s1 = inlined_call_operand.vmem [shape: bf16[288,128], index: 1, kind: input, shape index: {}]   ;;  %s577_s0 = inlined_call_operand.vmem [shape: bf16[32,288], index: 0, kind: input, shape index: {}]   ;;  %s578_s2 = inlined_call_operand.vmem [shape: f32[1,128], index: 2, kind: input, shape index: {}]   ;;  %s579_s3 = inlined_call_operand.vmem [shape: f32[32,128], index: 3, kind: input, shape index: {}]   ;;  %s580_s4 = inlined_call_operand.vmem [shape: f32[32,128], index: 4, kind: output, shape index: {}]  }
   0x1   :  { %v426_v0 = vld [vmem:[%s576_s1 + $0x78] sm:$0xff]   ;;  %v428_v2 = vld [vmem:[%s576_s1 + $0x70] sm:$0xff]   ;;  %v430_v4 = vld [vmem:[%s576_s1 + $0x68] sm:$0xff]  }
   0x2   :  { %v427_v1 = vld [vmem:[%s576_s1 + $0x38] sm:$0xff]   ;;  %386 = vmatprep.subr.bf16.mxu0 %v426_v0  ;;  %v429_v3 = vld [vmem:[%s576_s1 + $0x30] sm:$0xff]   ;;  %v431_v5 = vld [vmem:[%s576_s1 + $0x28] sm:$0xff]  }
   0x3   :  { %387 = vmatpush3.bf16.msra.mxu0 %v427_v1  ;;  %v432_v6 = vld [vmem:[%s576_s1 + $0x60] sm:$0xff]   ;;  %v434_v8 = vld [vmem:[%s576_s1 + $0x58] sm:$0xff]   ;;  %v440_v9 = vld [vmem:[%s576_s1 + $0x88] sm:$0xff]  }
   0x4   :  { %388 = vmatprep.subr.bf16.mxu0 %v428_v2  ;;  %v433_v7 = vld [vmem:[%s576_s1 + $0x20] sm:$0xff]   ;;  %v435_v10 = vld [vmem:[%s576_s1 + $0x18] sm:$0xff]   ;;  %v436_v11 = vld [vmem:[%s576_s1 + $0x50] sm:$0xff]   ;;  %418 = vmatprep.subr.bf16.mxu1 %v440_v9 }
   0x5   :  { %v437_v12 = vld [vmem:[%s576_s1 + $0x10] sm:$0xff]   ;;  %419 = vmatpush3.bf16.msra.mxu1 %v440_v9  ;;  %v443_v13 = vld [vmem:[%s576_s1 + $0x80] sm:$0xff]   ;;  %v438_v14 = vld [vmem:[%s576_s1 + $0x48] sm:$0xff]  }
   0x6   :  { %420 = vmatprep.subr.bf16.mxu1 %v443_v13  ;;  %v446_v15 = vld [vmem:[%s577_s0 + $0x4] ss:$12 sps:$4 sm:$0xff]   ;;  %v447_v16 = vld [vmem:[%s577_s0 + $0x8] ss:$12 sps:$4 sm:$0xff]   ;;  %v448_v17 = vld [vmem:[%s577_s0 + $0x20] ss:$12 sps:$4 sm:$0xff]  }
   0x7   :  { %389 = vmatpush3.bf16.msra.mxu0 %v429_v3  ;;  %251 = vmatprep.mubr.bf16.mxu0 %v446_v15  ;;  %v439_v18 = vld [vmem:[%s576_s1 + $0x8] sm:$0xff]   ;;  %v441_v19 = vld [vmem:[%s576_s1 + $0x40] sm:$0xff]   ;;  %v345_v48 = vld [vmem:[%s579_s3 + $0x10] sm:$0xff] }
   0x8   :  { %390 = vmatprep.subr.bf16.mxu0 %v430_v4  ;;  %422 = vmatprep.mubr.msk.bf16.mxu1 %vm212_vm0, %v447_v16  ;;  %v442_v20 = vld [vmem:[%s576_s1] sm:$0xff]   ;;  %v449_v22 = vld [vmem:[%s577_s0 + $0x1c] ss:$12 sps:$4 sm:$0xff]  }
   0x9   :  { %421 = vmatpush3.bf16.msra.mxu1 %v443_v13  ;;  %v444_v21 = vld [vmem:[%s577_s0] ss:$12 sps:$4 sm:$0xff]   ;;  %v451_v23 = vld [vmem:[%s577_s0 + $0x18] ss:$12 sps:$4 sm:$0xff]  }
   0xa   :  { %v385_v31 = vld [vmem:[%s578_s2] ss:$0 sm:$0xff]  ;;  %v344_v41 = vld [vmem:[%s579_s3 + $0x8] sm:$0xff]  ;;  %v346_v54 = vld [vmem:[%s579_s3 + $0x18] sm:$0xff] }
   0xb   :  { %391 = vmatpush3.bf16.msra.mxu0 %v431_v5  ;;  %v343_v33 = vld [vmem:[%s579_s3] sm:$0xff] }
   0xc   :  { %392 = vmatprep.subr.bf16.mxu0 %v432_v6  ;;  %423 = vmatmul.mubr.msk.bf16.vlgmr.msra.gmra.mxu1 %vm212_vm0, %v448_v17 }
   0xf   :  { %393 = vmatpush3.bf16.msra.mxu0 %v433_v7 }
  0x10   :  { %394 = vmatprep.subr.bf16.mxu0 %v434_v8 }
  0x13   :  { %395 = vmatpush3.bf16.msra.mxu0 %v435_v10 }
  0x14   :  { %396 = vmatprep.subr.bf16.mxu0 %v436_v11 }
  0x17   :  { %397 = vmatpush3.bf16.msra.mxu0 %v437_v12 }
  0x18   :  { %398 = vmatprep.subr.bf16.mxu0 %v438_v14 }
  0x1b   :  { %399 = vmatpush3.bf16.msra.mxu0 %v439_v18 }
  0x1c   :  { %400 = vmatprep.subr.bf16.mxu0 %v441_v19 }
  0x1f   :  { %401 = vmatpush3.bf16.msra.mxu0 %v442_v20 }
  0x22   :  { %252 = vmatmul.mubr.bf16.vlgmr.msra.gmra.mxu0 %v444_v21 }
  0x23   :  { %259 = vmatprep.mubr.bf16.mxu0 %v449_v22 }
  0x2a   :  { %260 = vmatmul.mubr.bf16.gmra.mxu0 %v451_v23 }
  0xcc   :  { %v424_v24 = vpop.f32.mrf.mxu1 }
  0xce   :  { %v302_v25 = vpop.f32.mrf.mxu1 }
  0xd0   :  { %v425_v28 = vpop.f32.mrf.mxu1 }
  0xd2   :  { %v305_v35 = vpop.f32.mrf.mxu1 }
  0xe2   :  { %v402_v26 = vpop.f32.mrf.mxu0 }
  0xe4   :  { %v403_v27 = vpop.f32.mrf.mxu0 }
  0xe5   :  { %v404_v29 = vadd.f32 %v403_v27, %v402_v26 }
  0xe6   :  { %v405_v30 = vpop.f32.mrf.mxu0 }
  0xe7   :  { %v303_v32 = vadd.f32 %v404_v29, %v302_v25 }
  0xe8   :  { %v406_v34 = vpop.f32.mrf.mxu0 }
  0xe9   :  { %v339_v36 = vadd.f32 %v385_v31, %v303_v32  ;;  %v407_v37 = vadd.f32 %v406_v34, %v405_v30 }
  0xea   :  { %v408_v38 = vpop.f32.mrf.mxu0 }
  0xeb   :  { %v347_v39 = vadd.f32 %v343_v33, %v339_v36  ;;  %v306_v40 = vadd.f32 %v407_v37, %v305_v35 }
  0xec   :  { %v409_v42 = vpop.f32.mrf.mxu0 }
  0xed   :  { %351 = vst [vmem:[%s580_s4] sm:$0xff] %v347_v39  ;;  %v340_v43 = vadd.f32 %v385_v31, %v306_v40  ;;  %v410_v44 = vadd.f32 %v409_v42, %v408_v38 }
  0xee   :  { %v411_v45 = vpop.f32.mrf.mxu0 }
  0xef   :  { %v348_v46 = vadd.f32 %v344_v41, %v340_v43  ;;  %v311_v47 = vadd.f32 %v424_v24, %v410_v44 }
  0xf0   :  { %v412_v49 = vpop.f32.mrf.mxu0 }
  0xf1   :  { %352 = vst [vmem:[%s580_s4 + $0x8] sm:$0xff] %v348_v46  ;;  %v341_v50 = vadd.f32 %v385_v31, %v311_v47  ;;  %v413_v51 = vadd.f32 %v412_v49, %v411_v45 }
  0xf3   :  { %v349_v52 = vadd.f32 %v345_v48, %v341_v50  ;;  %v314_v53 = vadd.f32 %v425_v28, %v413_v51 }
  0xf5   :  { %353 = vst [vmem:[%s580_s4 + $0x10] sm:$0xff] %v349_v52  ;;  %v342_v55 = vadd.f32 %v385_v31, %v314_v53 }
  0xf7   :  { %v350_v56 = vadd.f32 %v346_v54, %v342_v55 }
  0xf9   :  { %354 = vst [vmem:[%s580_s4 + $0x18] sm:$0xff] %v350_v56 }

// kernel: tile.13
= control target key start
LH: loop header
LB: loop body
LE: loop exit
PB: predicated region body
PF: predicated region fallthrough
CT: control target
= control target key end

     0   :  { %s22_s0 = inlined_call_operand.vmem [shape: f32[16], index: 0, kind: input, shape index: {}]   ;;  %s23_s1 = inlined_call_operand.vmem [shape: f32[4,16], index: 1, kind: output, shape index: {}]  }
   0x1   :  { %v4_v0 = vld [vmem:[%s22_s0] ss:$0 sm:$0xff] }
   0x2   :  { %5 = vst [vmem:[%s23_s1] sm:$0xf] %v4_v0 }

// kernel: tile.14
= control target key start
LH: loop header
LB: loop body
LE: loop exit
PB: predicated region body
PF: predicated region fallthrough
CT: control target
= control target key end

     0   :  { %vm8_vm0 = vcmask 130048   ;;  %s40_s8 = smov 16   ;;  %s41_s9 = smov 32   ;;  %vm14_vm1 = vcmask 523648   ;;  %vm20_vm2 = vcmask 392448   ;;  %vm26_vm3 = vcmask 261248   ;;  %s58_s0 = inlined_call_operand.vmem [shape: f32[4,16], index: 0, kind: input, shape index: {}]   ;;  %s59_s1 = inlined_call_operand.vmem [shape: f32[64], index: 1, kind: output, shape index: {}]  }
   0x1   :  { %v5_v0 = vld [vmem:[%s58_s0] sm:$0xf]  ;;  %s39_s0 = smov 48  }
   0x2   :  { %6 = vst [vmem:[#allocation1] sm:$0xf] %v5_v0 }
   0x9   :  { %v11_v1 = vld [vmem:[#allocation1 + $0x3] sm:$0x1]   ;;  %v23_v2 = vld [vmem:[#allocation1 + $0x1] sm:$0x1]   ;;  %v7_v3 = vld [vmem:[#allocation1] sm:$0x1]  }
   0xa   :  { %12 = vrot.lane.b32.xlu0 %v11_v1, %s39_s0  ;;  %24 = vrot.lane.b32.xlu1 %v23_v2, %s40_s8  ;;  %v17_v4 = vld [vmem:[#allocation1 + $0x2] sm:$0x1]   ;;  %9 = vst.msk [vmem:[#allocation0] sm:$0x1] %vm8_vm0, %v7_v3  }
   0xe   :  { %18 = vrot.lane.b32.xlu0 %v17_v4, %s41_s9 }
  0x7c   :  { %v13_v5 = vpop.permute.xlu0 %12   ;;  %v25_v6 = vpop.permute.xlu1 %24  }
  0x7d   :  { %15 = vst.msk [vmem:[#allocation0] sm:$0x1] %vm14_vm1, %v13_v5  }
  0x80   :  { %v19_v7 = vpop.permute.xlu0 %18  }
  0x81   :  { %21 = vst.msk [vmem:[#allocation0] sm:$0x1] %vm20_vm2, %v19_v7  }
  0x82   :  { %27 = vst.msk [vmem:[#allocation0] sm:$0x1] %vm26_vm3, %v25_v6  }
  0x89   :  { %v32_v8 = vld [vmem:[#allocation0] sm:$0x1] }
  0x8a   :  { %35 = vst [vmem:[%s59_s1] sm:$0x1] %v32_v8 }

// kernel: tile.18
= control target key start
LH: loop header
LB: loop body
LE: loop exit
PB: predicated region body
PF: predicated region fallthrough
CT: control target
= control target key end

     0   :  { %s22_s0 = inlined_call_operand.vmem [shape: f32[8], index: 0, kind: input, shape index: {}]   ;;  %s23_s1 = inlined_call_operand.vmem [shape: f32[4,8], index: 1, kind: output, shape index: {}]  }
   0x1   :  { %v4_v0 = vld [vmem:[%s22_s0] ss:$0 sm:$0xff] }
   0x2   :  { %5 = vst [vmem:[%s23_s1] sm:$0xf] %v4_v0 }

// kernel: tile.19
= control target key start
LH: loop header
LB: loop body
LE: loop exit
PB: predicated region body
PF: predicated region fallthrough
CT: control target
= control target key end

     0   :  { %vm8_vm0 = vcmask 64512   ;;  %s40_s8 = smov 8   ;;  %s41_s9 = smov 16   ;;  %vm14_vm1 = vcmask 261312   ;;  %vm20_vm2 = vcmask 195712   ;;  %vm26_vm3 = vcmask 130112   ;;  %s58_s0 = inlined_call_operand.vmem [shape: f32[4,8], index: 0, kind: input, shape index: {}]   ;;  %s59_s1 = inlined_call_operand.vmem [shape: f32[32], index: 1, kind: output, shape index: {}]  }
   0x1   :  { %v5_v0 = vld [vmem:[%s58_s0] sm:$0xf]  ;;  %s39_s0 = smov 24  }
   0x2   :  { %6 = vst [vmem:[#allocation1] sm:$0xf] %v5_v0 }
   0x9   :  { %v11_v1 = vld [vmem:[#allocation1 + $0x3] sm:$0x1]   ;;  %v23_v2 = vld [vmem:[#allocation1 + $0x1] sm:$0x1]   ;;  %v7_v3 = vld [vmem:[#allocation1] sm:$0x1]  }
   0xa   :  { %12 = vrot.lane.b32.xlu0 %v11_v1, %s39_s0  ;;  %24 = vrot.lane.b32.xlu1 %v23_v2, %s40_s8  ;;  %v17_v4 = vld [vmem:[#allocation1 + $0x2] sm:$0x1]   ;;  %9 = vst.msk [vmem:[#allocation0] sm:$0x1] %vm8_vm0, %v7_v3  }
   0xe   :  { %18 = vrot.lane.b32.xlu0 %v17_v4, %s41_s9 }
  0x7c   :  { %v13_v5 = vpop.permute.xlu0 %12   ;;  %v25_v6 = vpop.permute.xlu1 %24  }
  0x7d   :  { %15 = vst.msk [vmem:[#allocation0] sm:$0x1] %vm14_vm1, %v13_v5  }
  0x80   :  { %v19_v7 = vpop.permute.xlu0 %18  }
  0x81   :  { %21 = vst.msk [vmem:[#allocation0] sm:$0x1] %vm20_vm2, %v19_v7  }
  0x82   :  { %27 = vst.msk [vmem:[#allocation0] sm:$0x1] %vm26_vm3, %v25_v6  }
  0x89   :  { %v32_v8 = vld [vmem:[#allocation0] sm:$0x1] }
  0x8a   :  { %35 = vst [vmem:[%s59_s1] sm:$0x1] %v32_v8 }

// kernel: spade_generator_forward.61
= control target key start
LH: loop header
LB: loop body
LE: loop exit
PB: predicated region body
PF: predicated region fallthrough
CT: control target
= control target key end

     0   :  { %s306_s1 = inlined_call_operand.vmem [shape: bf16[128,128], index: 1, kind: input, shape index: {}]   ;;  %s307_s0 = inlined_call_operand.vmem [shape: bf16[32,128], index: 0, kind: input, shape index: {}]   ;;  %s308_s2 = inlined_call_operand.vmem [shape: f32[1,128], index: 2, kind: input, shape index: {}]   ;;  %s309_s3 = inlined_call_operand.vmem [shape: f32[32,128], index: 3, kind: output, shape index: {}]  }
   0x1   :  { %v231_v0 = vld [vmem:[%s306_s1 + $0x38] sm:$0xff]   ;;  %v232_v1 = vld [vmem:[%s306_s1 + $0x30] sm:$0xff]   ;;  %v233_v2 = vld [vmem:[%s306_s1 + $0x28] sm:$0xff]  }
   0x2   :  { %211 = vmatprep.subr.bf16.mxu0 %v231_v0  ;;  %v234_v3 = vld [vmem:[%s306_s1 + $0x20] sm:$0xff]   ;;  %v235_v5 = vld [vmem:[%s306_s1 + $0x18] sm:$0xff]   ;;  %v236_v6 = vld [vmem:[%s306_s1 + $0x10] sm:$0xff]  }
   0x3   :  { %212 = vmatpush3.bf16.msra.mxu0 %v231_v0  ;;  %v239_v4 = vld [vmem:[%s307_s0] sm:$0xff]   ;;  %v237_v7 = vld [vmem:[%s306_s1 + $0x8] sm:$0xff]  }
   0x4   :  { %213 = vmatprep.subr.bf16.mxu0 %v232_v1  ;;  %227 = vmatprep.mubr.bf16.mxu0 %v239_v4  ;;  %v238_v8 = vld [vmem:[%s306_s1] sm:$0xff]   ;;  %v240_v9 = vld [vmem:[%s307_s0 + $0x8] sm:$0xff]  }
   0x5   :  { %v200_v10 = vld [vmem:[%s308_s2] ss:$0 sm:$0xff] }
   0x7   :  { %214 = vmatpush3.bf16.msra.mxu0 %v232_v1 }
   0x8   :  { %215 = vmatprep.subr.bf16.mxu0 %v233_v2 }
   0xb   :  { %216 = vmatpush3.bf16.msra.mxu0 %v233_v2 }
   0xc   :  { %217 = vmatprep.subr.bf16.mxu0 %v234_v3 }
   0xf   :  { %218 = vmatpush3.bf16.msra.mxu0 %v234_v3 }
  0x10   :  { %219 = vmatprep.subr.bf16.mxu0 %v235_v5 }
  0x13   :  { %220 = vmatpush3.bf16.msra.mxu0 %v235_v5 }
  0x14   :  { %221 = vmatprep.subr.bf16.mxu0 %v236_v6 }
  0x17   :  { %222 = vmatpush3.bf16.msra.mxu0 %v236_v6 }
  0x18   :  { %223 = vmatprep.subr.bf16.mxu0 %v237_v7 }
  0x1b   :  { %224 = vmatpush3.bf16.msra.mxu0 %v237_v7 }
  0x1c   :  { %225 = vmatprep.subr.bf16.mxu0 %v238_v8 }
  0x1f   :  { %226 = vmatpush3.bf16.msra.mxu0 %v238_v8 }
  0x22   :  { %228 = vmatmul.mubr.bf16.vlgmr.msra.gmra.mxu0 %v240_v9 }
  0xe2   :  { %v229_v11 = vpop.f32.mrf.mxu0 }
  0xe3   :  { %v180_v12 = vadd.f32 %v229_v11, %v200_v10 }
  0xe4   :  { %v141_v13 = vpop.f32.mrf.mxu0 }
  0xe5   :  { %184 = vst [vmem:[%s309_s3 + $0x10] sm:$0xff] %v180_v12  ;;  %v178_v14 = vadd.f32 %v200_v10, %v141_v13 }
  0xe6   :  { %v230_v15 = vpop.f32.mrf.mxu0 }
  0xe7   :  { %182 = vst [vmem:[%s309_s3] sm:$0xff] %v178_v14  ;;  %v181_v16 = vadd.f32 %v230_v15, %v200_v10 }
  0xe8   :  { %v144_v17 = vpop.f32.mrf.mxu0 }
  0xe9   :  { %185 = vst [vmem:[%s309_s3 + $0x18] sm:$0xff] %v181_v16  ;;  %v179_v18 = vadd.f32 %v200_v10, %v144_v17 }
  0xeb   :  { %183 = vst [vmem:[%s309_s3 + $0x8] sm:$0xff] %v179_v18 }

// kernel: spade_generator_forward.63
= control target key start
LH: loop header
LB: loop body
LE: loop exit
PB: predicated region body
PF: predicated region fallthrough
CT: control target
= control target key end

     0   :  { %vm139_vm0 = vcmask 523264   ;;  %s547_s1 = inlined_call_operand.vmem [shape: bf16[64,128], index: 1, kind: input, shape index: {}]   ;;  %s548_s0 = inlined_call_operand.vmem [shape: bf16[128,64], index: 0, kind: input, shape index: {}]   ;;  %s549_s2 = inlined_call_operand.vmem [shape: f32[1,128], index: 2, kind: input, shape index: {}]   ;;  %s550_s3 = inlined_call_operand.vmem [shape: f32[128,128], index: 3, kind: output, shape index: {}]  }
   0x1   :  { %v420_v0 = vld [vmem:[%s547_s1 + $0x18] sm:$0xff]   ;;  %v421_v1 = vld [vmem:[%s547_s1 + $0x10] sm:$0xff]   ;;  %v422_v2 = vld [vmem:[%s547_s1 + $0x8] sm:$0xff]  }
   0x2   :  { %388 = vmatprep.subr.bf16.mxu0 %v420_v0  ;;  %412 = vmatprep.subr.bf16.mxu1 %v420_v0  ;;  %v424_v3 = vld [vmem:[%s548_s0] sm:$0xff]   ;;  %v426_v6 = vld [vmem:[%s548_s0 + $0x8] sm:$0xff]   ;;  %v428_v8 = vld [vmem:[%s548_s0 + $0x10] sm:$0xff]  }
   0x3   :  { %389 = vmatpush3.bf16.msra.mxu0 %v420_v0  ;;  %416 = vmatpush3.bf16.msra.mxu1 %v420_v0  ;;  %v425_v4 = vld [vmem:[%s548_s0 + $0x20] sm:$0xff]   ;;  %v427_v7 = vld [vmem:[%s548_s0 + $0x28] sm:$0xff]   ;;  %v429_v9 = vld [vmem:[%s548_s0 + $0x30] sm:$0xff]  }
   0x4   :  { %390 = vmatprep.subr.bf16.mxu0 %v421_v1  ;;  %413 = vmatprep.subr.bf16.mxu1 %v421_v1  ;;  %v423_v5 = vld [vmem:[%s547_s1] sm:$0xff]   ;;  %v430_v10 = vld [vmem:[%s548_s0 + $0x18] sm:$0xff]  }
   0x5   :  { %396 = vmatprep.mubr.msk.bf16.mxu0 %vm139_vm0, %v424_v3  ;;  %404 = vmatprep.mubr.msk.bf16.mxu1 %vm139_vm0, %v425_v4  ;;  %v431_v11 = vld [vmem:[%s548_s0 + $0x38] sm:$0xff]   ;;  %v375_v12 = vld [vmem:[%s549_s2] ss:$0 sm:$0xff] }
   0x7   :  { %391 = vmatpush3.bf16.msra.mxu0 %v421_v1  ;;  %417 = vmatpush3.bf16.msra.mxu1 %v421_v1 }
   0x8   :  { %392 = vmatprep.subr.bf16.mxu0 %v422_v2  ;;  %414 = vmatprep.subr.bf16.mxu1 %v422_v2 }
   0xb   :  { %393 = vmatpush3.bf16.msra.mxu0 %v422_v2  ;;  %418 = vmatpush3.bf16.msra.mxu1 %v422_v2 }
   0xc   :  { %394 = vmatprep.subr.bf16.mxu0 %v423_v5  ;;  %415 = vmatprep.subr.bf16.mxu1 %v423_v5 }
   0xf   :  { %395 = vmatpush3.bf16.msra.mxu0 %v423_v5  ;;  %419 = vmatpush3.bf16.msra.mxu1 %v423_v5 }
  0x12   :  { %397 = vmatmul.mubr.msk.bf16.vlgmr.msra.gmra.mxu0 %vm139_vm0, %v426_v6  ;;  %405 = vmatmul.mubr.msk.bf16.vlgmr.msra.gmra.mxu1 %vm139_vm0, %v427_v7 }
  0x13   :  { %400 = vmatprep.mubr.msk.bf16.mxu0 %vm139_vm0, %v428_v8  ;;  %408 = vmatprep.mubr.msk.bf16.mxu1 %vm139_vm0, %v429_v9 }
  0x1a   :  { %401 = vmatmul.mubr.msk.bf16.gmra.mxu0 %vm139_vm0, %v430_v10  ;;  %409 = vmatmul.mubr.msk.bf16.gmra.mxu1 %vm139_vm0, %v431_v11 }
  0xd2   :  { %v398_v13 = vpop.f32.mrf.mxu0  ;;  %v406_v14 = vpop.f32.mrf.mxu1 }
  0xd3   :  { %v321_v15 = vadd.f32 %v398_v13, %v375_v12  ;;  %v329_v16 = vadd.f32 %v406_v14, %v375_v12 }
  0xd4   :  { %v198_v17 = vpop.f32.mrf.mxu0  ;;  %v230_v18 = vpop.f32.mrf.mxu1 }
  0xd5   :  { %337 = vst [vmem:[%s550_s3 + $0x10] sm:$0xff] %v321_v15  ;;  %345 = vst [vmem:[%s550_s3 + $0x50] sm:$0xff] %v329_v16  ;;  %v319_v19 = vadd.f32 %v375_v12, %v198_v17  ;;  %v327_v20 = vadd.f32 %v375_v12, %v230_v18 }
  0xd6   :  { %v399_v21 = vpop.f32.mrf.mxu0  ;;  %v407_v22 = vpop.f32.mrf.mxu1 }
  0xd7   :  { %335 = vst [vmem:[%s550_s3] sm:$0xff] %v319_v19  ;;  %343 = vst [vmem:[%s550_s3 + $0x40] sm:$0xff] %v327_v20  ;;  %v322_v23 = vadd.f32 %v399_v21, %v375_v12  ;;  %v330_v24 = vadd.f32 %v407_v22, %v375_v12 }
  0xd8   :  { %v201_v25 = vpop.f32.mrf.mxu0  ;;  %v233_v26 = vpop.f32.mrf.mxu1 }
  0xd9   :  { %338 = vst [vmem:[%s550_s3 + $0x18] sm:$0xff] %v322_v23  ;;  %346 = vst [vmem:[%s550_s3 + $0x58] sm:$0xff] %v330_v24  ;;  %v320_v27 = vadd.f32 %v375_v12, %v201_v25  ;;  %v328_v28 = vadd.f32 %v375_v12, %v233_v26 }
  0xda   :  { %v402_v29 = vpop.f32.mrf.mxu0  ;;  %v410_v30 = vpop.f32.mrf.mxu1 }
  0xdb   :  { %336 = vst [vmem:[%s550_s3 + $0x8] sm:$0xff] %v320_v27  ;;  %344 = vst [vmem:[%s550_s3 + $0x48] sm:$0xff] %v328_v28  ;;  %v325_v31 = vadd.f32 %v402_v29, %v375_v12  ;;  %v333_v32 = vadd.f32 %v410_v30, %v375_v12 }
  0xdc   :  { %v214_v33 = vpop.f32.mrf.mxu0  ;;  %v246_v34 = vpop.f32.mrf.mxu1 }
  0xdd   :  { %341 = vst [vmem:[%s550_s3 + $0x30] sm:$0xff] %v325_v31  ;;  %349 = vst [vmem:[%s550_s3 + $0x70] sm:$0xff] %v333_v32  ;;  %v323_v35 = vadd.f32 %v375_v12, %v214_v33  ;;  %v331_v36 = vadd.f32 %v375_v12, %v246_v34 }
  0xde   :  { %v403_v37 = vpop.f32.mrf.mxu0  ;;  %v411_v38 = vpop.f32.mrf.mxu1 }
  0xdf   :  { %339 = vst [vmem:[%s550_s3 + $0x20] sm:$0xff] %v323_v35  ;;  %347 = vst [vmem:[%s550_s3 + $0x60] sm:$0xff] %v331_v36  ;;  %v326_v39 = vadd.f32 %v403_v37, %v375_v12  ;;  %v334_v40 = vadd.f32 %v411_v38, %v375_v12 }
  0xe0   :  { %v217_v41 = vpop.f32.mrf.mxu0  ;;  %v249_v42 = vpop.f32.mrf.mxu1 }
  0xe1   :  { %342 = vst [vmem:[%s550_s3 + $0x38] sm:$0xff] %v326_v39  ;;  %350 = vst [vmem:[%s550_s3 + $0x78] sm:$0xff] %v334_v40  ;;  %v324_v43 = vadd.f32 %v375_v12, %v217_v41  ;;  %v332_v44 = vadd.f32 %v375_v12, %v249_v42 }
  0xe3   :  { %340 = vst [vmem:[%s550_s3 + $0x28] sm:$0xff] %v324_v43  ;;  %348 = vst [vmem:[%s550_s3 + $0x68] sm:$0xff] %v332_v44 }

// kernel: spade_generator_forward.65
= control target key start
LH: loop header
LB: loop body
LE: loop exit
PB: predicated region body
PF: predicated region fallthrough
CT: control target
= control target key end

     0   :  { %s2335_s12 = smov 0   ;;  %s2337_s13 = smov 0   ;;  %s2612_s0 = inlined_call_operand.vmem [shape: bf16[512,392], index: 0, kind: input, shape index: {}]   ;;  %s2613_s1 = inlined_call_operand.vmem [shape: bf16[392,128], index: 1, kind: input, shape index: {}]   ;;  %s2614_s2 = inlined_call_operand.vmem [shape: f32[1,128], index: 2, kind: input, shape index: {}]   ;;  %s2615_s3 = inlined_call_operand.vmem [shape: f32[512,128], index: 3, kind: output, shape index: {}]  }
   0x1   :  { %s2339_s14 = smov 0  }
   0x2 LB: > { %s32_s15 = sadd.s32 1, %s2308_s13  ;;  %p1757_p0 = scmp.ge.s32.totalorder %s2312_s14, 1  ;;  %s2312_s14 = sphi %s2339_s14, %s13_s14   ;;  %s2308_s13 = sphi %s2337_s13, %s2617_s13   ;;  %s2304_s12 = sphi %s2335_s12, %s2616_s12  }
   0x3   : > { %p34_p1 = scmp.ge.s32.totalorder %s32_s15, 2  ;;  %p191_p2 = scmp.lt.s32.totalorder %s2312_s14, 3 }
   0x5   : > { %s2619_s15 = smov (%p34_p1, %s32_s15), 0  ;;  %p192_p3 = pnand %p1757_p0, %p191_p2 }
   0x6   : > { %s1758_s7 = sshll.u32 (!%p192_p3), %s2304_s12, 5 }
   0x7   : > { %195 = sbr.rel (%p192_p3) target bundleno = 405 (0x195), region = 32  ;;  %p236_p4 = scmp.lt.s32.totalorder (!%p192_p3), %s1758_s7, 63 }
   0xc   : > { %v2041_v0 = vld [vmem:[%s2613_s1 + $0x78] sm:$0xff]   ;;  %v2314_v1 = vmov 0   ;;  %v2044_v4 = vld [vmem:[%s2613_s1 + $0x70] sm:$0xff]   ;;  %v2047_v7 = vld [vmem:[%s2613_s1 + $0x68] sm:$0xff]   ;;  %s2621_s7 = smov (!%p236_p4, %s1758_s7), 63  ;;  %vm900_vm0 = vcmask 64512  }
   0xd   : > { %1114 = vmatprep.subr.bf16.mxu1 %v2314_v1  ;;  %v2042_v2 = vld [vmem:[%s2613_s1 + $0xb8] sm:$0xff]   ;;  %1904 = vmatprep.subr.bf16.mxu0 %v2041_v0  ;;  %v2045_v5 = vld [vmem:[%s2613_s1 + $0xb0] sm:$0xff]   ;;  %v2048_v8 = vld [vmem:[%s2613_s1 + $0xa8] sm:$0xff]   ;;  %s1903_s27 = sshll.u32 %s2621_s7, 4  ;;  %vm949_vm1 = vcmask 1043456   ;;  %s1762_s26 = sshll.u32 %s2621_s7, 3 }
   0xe   : > { %v2043_v3 = vld [vmem:[%s2613_s1 + $0x38] sm:$0xff]   ;;  %1115 = vmatpush1.bf16.msra.mxu1 %v2042_v2  ;;  %v2046_v6 = vld [vmem:[%s2613_s1 + $0x30] sm:$0xff]   ;;  %v2049_v9 = vld [vmem:[%s2613_s1 + $0x28] sm:$0xff]   ;;  %s2425_s8 = scalar_lea.vmem %s2612_s0, %s1903_s27  ;;  %s2545_s29 = scalar_lea.vmem %s2615_s3, %s1762_s26 }
   0xf   : > { %1905 = vmatpush3.bf16.msra.mxu0 %v2043_v3  ;;  %1116 = vmatprep.subr.bf16.mxu1 %v2314_v1  ;;  %v2050_v10 = vld [vmem:[%s2613_s1 + $0x60] sm:$0xff]   ;;  %v2053_v13 = vld [vmem:[%s2613_s1 + $0x58] sm:$0xff]   ;;  %v2056_v16 = vld [vmem:[%s2613_s1 + $0x50] sm:$0xff]  }
  0x10   : > { %1906 = vmatprep.subr.bf16.mxu0 %v2044_v4  ;;  %v2051_v11 = vld [vmem:[%s2613_s1 + $0xa0] sm:$0xff]   ;;  %v2054_v14 = vld [vmem:[%s2613_s1 + $0x98] sm:$0xff]   ;;  %v2057_v17 = vld [vmem:[%s2613_s1 + $0x90] sm:$0xff]  }
  0x11   : > { %v2052_v12 = vld [vmem:[%s2613_s1 + $0x20] sm:$0xff]   ;;  %v2055_v15 = vld [vmem:[%s2613_s1 + $0x18] sm:$0xff]   ;;  %v2058_v18 = vld [vmem:[%s2613_s1 + $0x10] sm:$0xff]  }
  0x12   : > { %1117 = vmatpush1.bf16.msra.mxu1 %v2045_v5  ;;  %v2059_v19 = vld [vmem:[%s2613_s1 + $0x48] sm:$0xff]   ;;  %v2062_v22 = vld [vmem:[%s2613_s1 + $0x40] sm:$0xff]  }
  0x13   : > { %1907 = vmatpush3.bf16.msra.mxu0 %v2046_v6  ;;  %1118 = vmatprep.subr.bf16.mxu1 %v2314_v1  ;;  %v2060_v20 = vld [vmem:[%s2613_s1 + $0x88] sm:$0xff]   ;;  %v2067_v23 = vld [vmem:[%s2425_s8 + $0x4] ss:$16 sps:$4 sm:$0xff]   ;;  %v2068_v27 = vld [vmem:[%s2613_s1 + $0xc0] ss:$0 sps:$4 sm:$0xff]  }
  0x14   : > { %1908 = vmatprep.subr.bf16.mxu0 %v2047_v7  ;;  %v2061_v21 = vld [vmem:[%s2613_s1 + $0x8] sm:$0xff]   ;;  %v2063_v24 = vld [vmem:[%s2613_s1 + $0x80] sm:$0xff]   ;;  %985 = vmatprep.mubr.bf16.mxu0 %v2067_v23  ;;  %v951_v29 = vsel %vm949_vm1, %v2068_v27, 0 }
  0x15   : > { %v2071_v25 = vld [vmem:[%s2425_s8 + $0xc] ss:$16 sps:$4 sm:$0xff]   ;;  %v2064_v26 = vld [vmem:[%s2613_s1] sm:$0xff]   ;;  %v2069_v31 = vld [vmem:[%s2425_s8 + $0x8] ss:$16 sps:$4 sm:$0xff]  }
  0x16   : > { %1119 = vmatpush1.bf16.msra.mxu1 %v2048_v8  ;;  %1852 = vmatprep.mubr.msk.bf16.mxu1 %vm900_vm0, %v2071_v25  ;;  %v2065_v28 = vld [vmem:[%s2425_s8] ss:$16 sps:$4 sm:$0xff]   ;;  %v2072_v30 = vld [vmem:[%s2425_s8 + $0x24] ss:$16 sps:$4 sm:$0xff]   ;;  %v2075_v32 = vld [vmem:[%s2425_s8 + $0x2c] ss:$16 sps:$4 sm:$0xff]  }
  0x17   : > { %1909 = vmatpush3.bf16.msra.mxu0 %v2049_v9  ;;  %1120 = vmatprep.subr.bf16.mxu1 %v2314_v1  ;;  %v2074_v33 = vld [vmem:[%s2425_s8 + $0x20] ss:$16 sps:$4 sm:$0xff]   ;;  %v2078_v34 = vld [vmem:[%s2425_s8 + $0x44] ss:$16 sps:$4 sm:$0xff]   ;;  %v2077_v35 = vld [vmem:[%s2425_s8 + $0x28] ss:$16 sps:$4 sm:$0xff]  }
  0x18   : > { %1910 = vmatprep.subr.bf16.mxu0 %v2050_v10  ;;  %v2081_v36 = vld [vmem:[%s2425_s8 + $0x4c] ss:$16 sps:$4 sm:$0xff]   ;;  %v2080_v37 = vld [vmem:[%s2425_s8 + $0x40] ss:$16 sps:$4 sm:$0xff]   ;;  %v2084_v38 = vld [vmem:[%s2425_s8 + $0x64] ss:$16 sps:$4 sm:$0xff]  }
  0x19   : > { %v2083_v39 = vld [vmem:[%s2425_s8 + $0x48] ss:$16 sps:$4 sm:$0xff]   ;;  %v2087_v40 = vld [vmem:[%s2425_s8 + $0x6c] ss:$16 sps:$4 sm:$0xff]   ;;  %v2086_v41 = vld [vmem:[%s2425_s8 + $0x60] ss:$16 sps:$4 sm:$0xff]  }
  0x1a   : > { %1121 = vmatpush1.bf16.msra.mxu1 %v2051_v11  ;;  %v2090_v42 = vld [vmem:[%s2425_s8 + $0x84] ss:$16 sps:$4 sm:$0xff]   ;;  %v2089_v43 = vld [vmem:[%s2425_s8 + $0x68] ss:$16 sps:$4 sm:$0xff]   ;;  %v2093_v44 = vld [vmem:[%s2425_s8 + $0x8c] ss:$16 sps:$4 sm:$0xff]  }
  0x1b   : > { %1911 = vmatpush3.bf16.msra.mxu0 %v2052_v12  ;;  %1122 = vmatprep.subr.bf16.mxu1 %v2314_v1  ;;  %v2092_v45 = vld [vmem:[%s2425_s8 + $0x80] ss:$16 sps:$4 sm:$0xff]   ;;  %v2096_v46 = vld [vmem:[%s2425_s8 + $0xa4] ss:$16 sps:$4 sm:$0xff]   ;;  %v2095_v47 = vld [vmem:[%s2425_s8 + $0x88] ss:$16 sps:$4 sm:$0xff]  }
  0x1c   : > { %1912 = vmatprep.subr.bf16.mxu0 %v2053_v13  ;;  %v2099_v48 = vld [vmem:[%s2425_s8 + $0xac] ss:$16 sps:$4 sm:$0xff]   ;;  %v2098_v49 = vld [vmem:[%s2425_s8 + $0xa0] ss:$16 sps:$4 sm:$0xff]   ;;  %v2102_v50 = vld [vmem:[%s2425_s8 + $0xc4] ss:$16 sps:$4 sm:$0xff]  }
  0x1d   : > { %v2101_v51 = vld [vmem:[%s2425_s8 + $0xa8] ss:$16 sps:$4 sm:$0xff]   ;;  %v2105_v52 = vld [vmem:[%s2425_s8 + $0xcc] ss:$16 sps:$4 sm:$0xff]   ;;  %v2104_v53 = vld [vmem:[%s2425_s8 + $0xc0] ss:$16 sps:$4 sm:$0xff]  }
  0x1e   : > { %1123 = vmatpush1.bf16.msra.mxu1 %v2054_v14  ;;  %v2108_v54 = vld [vmem:[%s2425_s8 + $0xe4] ss:$16 sps:$4 sm:$0xff]   ;;  %v2107_v55 = vld [vmem:[%s2425_s8 + $0xc8] ss:$16 sps:$4 sm:$0xff]   ;;  %v2111_v56 = vld [vmem:[%s2425_s8 + $0xec] ss:$16 sps:$4 sm:$0xff]  }
  0x1f   : > { %1913 = vmatpush3.bf16.msra.mxu0 %v2055_v15  ;;  %1124 = vmatprep.subr.bf16.mxu1 %v2314_v1  ;;  %v2110_v57 = vld [vmem:[%s2425_s8 + $0xe0] ss:$16 sps:$4 sm:$0xff]   ;;  %v2114_v58 = vld [vmem:[%s2425_s8 + $0x104] ss:$16 sps:$4 sm:$0xff]   ;;  %v2113_v59 = vld [vmem:[%s2425_s8 + $0xe8] ss:$16 sps:$4 sm:$0xff]  }
  0x20   : > { %1914 = vmatprep.subr.bf16.mxu0 %v2056_v16  ;;  %v2117_v60 = vld [vmem:[%s2425_s8 + $0x10c] ss:$16 sps:$4 sm:$0xff]   ;;  %v2116_v61 = vld [vmem:[%s2425_s8 + $0x100] ss:$16 sps:$4 sm:$0xff]   ;;  %v2120_v62 = vld [vmem:[%s2425_s8 + $0x124] ss:$16 sps:$4 sm:$0xff]  }
  0x21   : > { %v2119_v63 = vld [vmem:[%s2425_s8 + $0x108] ss:$16 sps:$4 sm:$0xff]   ;;  %v2123_v0 = vld [vmem:[%s2425_s8 + $0x12c] ss:$16 sps:$4 sm:$0xff]   ;;  %v2126_v2 = vld [vmem:[%s2425_s8 + $0x144] ss:$16 sps:$4 sm:$0xff]  }
  0x22   : > { %1125 = vmatpush1.bf16.msra.mxu1 %v2057_v17  ;;  %v2125_v3 = vld [vmem:[%s2425_s8 + $0x128] ss:$16 sps:$4 sm:$0xff]   ;;  %v2129_v4 = vld [vmem:[%s2425_s8 + $0x14c] ss:$16 sps:$4 sm:$0xff]   ;;  %v2128_v5 = vld [vmem:[%s2425_s8 + $0x140] ss:$16 sps:$4 sm:$0xff]  }
  0x23   : > { %1915 = vmatpush3.bf16.msra.mxu0 %v2058_v18  ;;  %1126 = vmatprep.subr.bf16.mxu1 %v2314_v1  ;;  %v2132_v6 = vld [vmem:[%s2425_s8 + $0x164] ss:$16 sps:$4 sm:$0xff]   ;;  %v2131_v7 = vld [vmem:[%s2425_s8 + $0x148] ss:$16 sps:$4 sm:$0xff]   ;;  %v2135_v8 = vld [vmem:[%s2425_s8 + $0x16c] ss:$16 sps:$4 sm:$0xff]  }
  0x24   : > { %1916 = vmatprep.subr.bf16.mxu0 %v2059_v19  ;;  %v2134_v9 = vld [vmem:[%s2425_s8 + $0x160] ss:$16 sps:$4 sm:$0xff]   ;;  %v2138_v10 = vld [vmem:[%s2425_s8 + $0x184] ss:$16 sps:$4 sm:$0xff]   ;;  %v2137_v11 = vld [vmem:[%s2425_s8 + $0x168] ss:$16 sps:$4 sm:$0xff]  }
  0x25   : > { %v2141_v12 = vld [vmem:[%s2425_s8 + $0x18c] ss:$16 sps:$4 sm:$0xff]   ;;  %v2140_v13 = vld [vmem:[%s2425_s8 + $0x180] ss:$16 sps:$4 sm:$0xff]   ;;  %v2144_v14 = vld [vmem:[%s2425_s8 + $0x1a4] ss:$16 sps:$4 sm:$0xff]  }
  0x26   : > { %1127 = vmatpush1.bf16.msra.mxu1 %v2060_v20  ;;  %v2143_v15 = vld [vmem:[%s2425_s8 + $0x188] ss:$16 sps:$4 sm:$0xff]   ;;  %v2147_v16 = vld [vmem:[%s2425_s8 + $0x1ac] ss:$16 sps:$4 sm:$0xff]   ;;  %v2146_v17 = vld [vmem:[%s2425_s8 + $0x1a0] ss:$16 sps:$4 sm:$0xff]  }
  0x27   : > { %1917 = vmatpush3.bf16.msra.mxu0 %v2061_v21  ;;  %1128 = vmatprep.subr.bf16.mxu1 %v2314_v1  ;;  %v2150_v18 = vld [vmem:[%s2425_s8 + $0x1c4] ss:$16 sps:$4 sm:$0xff]   ;;  %v2149_v19 = vld [vmem:[%s2425_s8 + $0x1a8] ss:$16 sps:$4 sm:$0xff]   ;;  %v2153_v20 = vld [vmem:[%s2425_s8 + $0x1cc] ss:$16 sps:$4 sm:$0xff]  }
  0x28   : > { %1918 = vmatprep.subr.bf16.mxu0 %v2062_v22  ;;  %v2152_v21 = vld [vmem:[%s2425_s8 + $0x1c0] ss:$16 sps:$4 sm:$0xff]   ;;  %v2156_v22 = vld [vmem:[%s2425_s8 + $0x1e4] ss:$16 sps:$4 sm:$0xff]   ;;  %v2155_v23 = vld [vmem:[%s2425_s8 + $0x1c8] ss:$16 sps:$4 sm:$0xff]  }
  0x29   : > { %v2158_v25 = vld [vmem:[%s2425_s8 + $0x1e0] ss:$16 sps:$4 sm:$0xff]  }
  0x2a   : > { %1129 = vmatpush1.bf16.msra.mxu1 %v2063_v24  ;;  %v2159_v24 = vld [vmem:[%s2425_s8 + $0x1ec] ss:$16 sps:$4 sm:$0xff]  }
  0x2b   : > { %1919 = vmatpush3.bf16.msra.mxu0 %v2064_v26  ;;  %1144 = vmatprep.subr.bf16.mxu1 %v2314_v1  ;;  %v2122_v1 = vld [vmem:[%s2425_s8 + $0x120] ss:$16 sps:$4 sm:$0xff]   ;;  %v2161_v26 = vld [vmem:[%s2425_s8 + $0x1e8] ss:$16 sps:$4 sm:$0xff]  }
  0x2e   : > { %986 = vmatmul.mubr.bf16.vlgmr.msra.gmra.mxu0 %v2065_v28  ;;  %1145 = vmatpush2.bf16.msra.mxu1 %v951_v29 }
  0x2f   : > { %993 = vmatprep.mubr.bf16.mxu0 %v2072_v30 }
  0x31   : > { %1147 = vmatmul.mubr.bf16.vlgmr.msra.gmra.mxu1 %v2069_v31  ;;  %v2531_v31 = vld [vmem:[%s2614_s2] ss:$0 sm:$0xff] }
  0x32   : > { %1853 = vmatprep.mubr.msk.bf16.mxu1 %vm900_vm0, %v2075_v32 }
  0x36   : > { %994 = vmatmul.mubr.bf16.gmra.mxu0 %v2074_v33 }
  0x37   : > { %1001 = vmatprep.mubr.bf16.mxu0 %v2078_v34 }
  0x39   : > { %1155 = vmatmul.mubr.bf16.gmra.mxu1 %v2077_v35 }
  0x3a   : > { %1854 = vmatprep.mubr.msk.bf16.mxu1 %vm900_vm0, %v2081_v36 }
  0x3e   : > { %1002 = vmatmul.mubr.bf16.gmra.mxu0 %v2080_v37 }
  0x3f   : > { %1009 = vmatprep.mubr.bf16.mxu0 %v2084_v38 }
  0x41   : > { %1163 = vmatmul.mubr.bf16.gmra.mxu1 %v2083_v39 }
  0x42   : > { %1855 = vmatprep.mubr.msk.bf16.mxu1 %vm900_vm0, %v2087_v40 }
  0x46   : > { %1010 = vmatmul.mubr.bf16.gmra.mxu0 %v2086_v41 }
  0x47   : > { %1017 = vmatprep.mubr.bf16.mxu0 %v2090_v42 }
  0x49   : > { %1171 = vmatmul.mubr.bf16.gmra.mxu1 %v2089_v43 }
  0x4a   : > { %1856 = vmatprep.mubr.msk.bf16.mxu1 %vm900_vm0, %v2093_v44 }
  0x4e   : > { %1018 = vmatmul.mubr.bf16.gmra.mxu0 %v2092_v45 }
  0x4f   : > { %1025 = vmatprep.mubr.bf16.mxu0 %v2096_v46 }
  0x51   : > { %1179 = vmatmul.mubr.bf16.gmra.mxu1 %v2095_v47 }
  0x52   : > { %1857 = vmatprep.mubr.msk.bf16.mxu1 %vm900_vm0, %v2099_v48 }
  0x56   : > { %1026 = vmatmul.mubr.bf16.gmra.mxu0 %v2098_v49 }
  0x57   : > { %1033 = vmatprep.mubr.bf16.mxu0 %v2102_v50 }
  0x59   : > { %1187 = vmatmul.mubr.bf16.gmra.mxu1 %v2101_v51 }
  0x5a   : > { %1858 = vmatprep.mubr.msk.bf16.mxu1 %vm900_vm0, %v2105_v52 }
  0x5e   : > { %1034 = vmatmul.mubr.bf16.gmra.mxu0 %v2104_v53 }
  0x5f   : > { %1041 = vmatprep.mubr.bf16.mxu0 %v2108_v54 }
  0x61   : > { %1195 = vmatmul.mubr.bf16.gmra.mxu1 %v2107_v55 }
  0x62   : > { %1859 = vmatprep.mubr.msk.bf16.mxu1 %vm900_vm0, %v2111_v56 }
  0x66   : > { %1042 = vmatmul.mubr.bf16.gmra.mxu0 %v2110_v57 }
  0x67   : > { %1049 = vmatprep.mubr.bf16.mxu0 %v2114_v58 }
  0x69   : > { %1203 = vmatmul.mubr.bf16.gmra.mxu1 %v2113_v59 }
  0x6a   : > { %1860 = vmatprep.mubr.msk.bf16.mxu1 %vm900_vm0, %v2117_v60 }
  0x6e   : > { %1050 = vmatmul.mubr.bf16.gmra.mxu0 %v2116_v61 }
  0x6f   : > { %1057 = vmatprep.mubr.bf16.mxu0 %v2120_v62 }
  0x71   : > { %1211 = vmatmul.mubr.bf16.gmra.mxu1 %v2119_v63 }
  0x72   : > { %1861 = vmatprep.mubr.msk.bf16.mxu1 %vm900_vm0, %v2123_v0 }
  0x76   : > { %1058 = vmatmul.mubr.bf16.gmra.mxu0 %v2122_v1 }
  0x77   : > { %1065 = vmatprep.mubr.bf16.mxu0 %v2126_v2 }
  0x79   : > { %1219 = vmatmul.mubr.bf16.gmra.mxu1 %v2125_v3 }
  0x7a   : > { %1862 = vmatprep.mubr.msk.bf16.mxu1 %vm900_vm0, %v2129_v4 }
  0x7e   : > { %1066 = vmatmul.mubr.bf16.gmra.mxu0 %v2128_v5 }
  0x7f   : > { %1073 = vmatprep.mubr.bf16.mxu0 %v2132_v6 }
  0x81   : > { %1227 = vmatmul.mubr.bf16.gmra.mxu1 %v2131_v7 }
  0x82   : > { %1863 = vmatprep.mubr.msk.bf16.mxu1 %vm900_vm0, %v2135_v8 }
  0x86   : > { %1074 = vmatmul.mubr.bf16.gmra.mxu0 %v2134_v9 }
  0x87   : > { %1081 = vmatprep.mubr.bf16.mxu0 %v2138_v10 }
  0x89   : > { %1235 = vmatmul.mubr.bf16.gmra.mxu1 %v2137_v11 }
  0x8a   : > { %1864 = vmatprep.mubr.msk.bf16.mxu1 %vm900_vm0, %v2141_v12 }
  0x8e   : > { %1082 = vmatmul.mubr.bf16.gmra.mxu0 %v2140_v13 }
  0x8f   : > { %1089 = vmatprep.mubr.bf16.mxu0 %v2144_v14 }
  0x91   : > { %1243 = vmatmul.mubr.bf16.gmra.mxu1 %v2143_v15 }
  0x92   : > { %1865 = vmatprep.mubr.msk.bf16.mxu1 %vm900_vm0, %v2147_v16 }
  0x96   : > { %1090 = vmatmul.mubr.bf16.gmra.mxu0 %v2146_v17 }
  0x97   : > { %1097 = vmatprep.mubr.bf16.mxu0 %v2150_v18 }
  0x99   : > { %1251 = vmatmul.mubr.bf16.gmra.mxu1 %v2149_v19 }
  0x9a   : > { %1866 = vmatprep.mubr.msk.bf16.mxu1 %vm900_vm0, %v2153_v20 }
  0x9e   : > { %1098 = vmatmul.mubr.bf16.gmra.mxu0 %v2152_v21 }
  0x9f   : > { %1105 = vmatprep.mubr.bf16.mxu0 %v2156_v22 }
  0xa1   : > { %1259 = vmatmul.mubr.bf16.gmra.mxu1 %v2155_v23 }
  0xa2   : > { %1867 = vmatprep.mubr.msk.bf16.mxu1 %vm900_vm0, %v2159_v24 }
  0xa6   : > { %1106 = vmatmul.mubr.bf16.gmra.mxu0 %v2158_v25 }
  0xa9   : > { %1267 = vmatmul.mubr.bf16.gmra.mxu1 %v2161_v26 }
  0xee   : > { %v1920_v27 = vpop.f32.mrf.mxu0 }
  0xf0   : > { %v1921_v28 = vpop.f32.mrf.mxu0 }
  0xf1   : > { %v1922_v29 = vadd.f32 %v1921_v28, %v1920_v27  ;;  %v1148_v30 = vpop.f32.mrf.mxu1 }
  0xf2   : > { %v1923_v32 = vpop.f32.mrf.mxu0 }
  0xf3   : > { %v1149_v33 = vadd.f32 %v1922_v29, %v1148_v30  ;;  %v1150_v34 = vpop.f32.mrf.mxu1 }
  0xf4   : > { %v1924_v35 = vpop.f32.mrf.mxu0 }
  0xf5   : > { %v1381_v36 = vadd.f32 %v2531_v31, %v1149_v33  ;;  %v1925_v37 = vadd.f32 %v1924_v35, %v1923_v32  ;;  %v1151_v38 = vpop.f32.mrf.mxu1 }
  0xf6   : > { %v1926_v39 = vpop.f32.mrf.mxu0 }
  0xf7   : > { %v1869_v40 = vmul.f32 -1.442695, %v1381_v36  ;;  %v1152_v41 = vadd.f32 %v1925_v37, %v1151_v38  ;;  %v1153_v42 = vpop.f32.mrf.mxu1 }
  0xf8   : > { %v1927_v43 = vpop.f32.mrf.mxu0 }
  0xf9   : > { %2162 = vpow2.f32 %v1869_v40  ;;  %v1382_v44 = vadd.f32 %v2531_v31, %v1152_v41  ;;  %v1928_v45 = vadd.f32 %v1927_v43, %v1926_v39  ;;  %v1156_v46 = vpop.f32.mrf.mxu1 }
  0xfa   : > { %v1929_v47 = vpop.f32.mrf.mxu0 }
  0xfb   : > { %v1870_v48 = vmul.f32 -1.442695, %v1382_v44  ;;  %v1157_v49 = vadd.f32 %v1928_v45, %v1156_v46  ;;  %v1158_v50 = vpop.f32.mrf.mxu1 }
  0xfc   : > { %v1930_v51 = vpop.f32.mrf.mxu0 }
  0xfd   : > { %2164 = vpow2.f32 %v1870_v48  ;;  %v1383_v52 = vadd.f32 %v2531_v31, %v1157_v49  ;;  %v1931_v53 = vadd.f32 %v1930_v51, %v1929_v47  ;;  %v1159_v54 = vpop.f32.mrf.mxu1 }
  0xfe   : > { %v1932_v55 = vpop.f32.mrf.mxu0 }
  0xff   : > { %v1871_v56 = vmul.f32 -1.442695, %v1383_v52  ;;  %v1160_v57 = vadd.f32 %v1931_v53, %v1159_v54  ;;  %v1161_v58 = vpop.f32.mrf.mxu1 }
 0x100   : > { %v1933_v59 = vpop.f32.mrf.mxu0 }
 0x101   : > { %2166 = vpow2.f32 %v1871_v56  ;;  %v1384_v60 = vadd.f32 %v2531_v31, %v1160_v57  ;;  %v1934_v61 = vadd.f32 %v1933_v59, %v1932_v55  ;;  %v1164_v62 = vpop.f32.mrf.mxu1 }
 0x102   : > { %v1935_v63 = vpop.f32.mrf.mxu0 }
 0x103   : > { %v1872_v0 = vmul.f32 -1.442695, %v1384_v60  ;;  %v1165_v1 = vadd.f32 %v1934_v61, %v1164_v62  ;;  %v1166_v2 = vpop.f32.mrf.mxu1 }
 0x104   : > { %v1936_v3 = vpop.f32.mrf.mxu0 }
 0x105   : > { %2168 = vpow2.f32 %v1872_v0  ;;  %v1385_v4 = vadd.f32 %v2531_v31, %v1165_v1  ;;  %v1937_v5 = vadd.f32 %v1936_v3, %v1935_v63  ;;  %v1167_v6 = vpop.f32.mrf.mxu1 }
 0x106   : > { %v2163_v7 = vpop.eup %2162  ;;  %v1938_v8 = vpop.f32.mrf.mxu0 }
 0x107   : > { %v1509_v9 = vadd.f32 1.0, %v2163_v7  ;;  %v1873_v10 = vmul.f32 -1.442695, %v1385_v4  ;;  %v1168_v11 = vadd.f32 %v1937_v5, %v1167_v6  ;;  %v1169_v12 = vpop.f32.mrf.mxu1 }
 0x108   : > { %v1939_v13 = vpop.f32.mrf.mxu0 }
 0x109   : > { %2170 = vrcp.f32 %v1509_v9  ;;  %v1386_v14 = vadd.f32 %v2531_v31, %v1168_v11  ;;  %v1940_v15 = vadd.f32 %v1939_v13, %v1938_v8  ;;  %v1172_v16 = vpop.f32.mrf.mxu1 }
 0x10a   : > { %v2165_v17 = vpop.eup %2164  ;;  %2172 = vpow2.f32 %v1873_v10  ;;  %v1941_v18 = vpop.f32.mrf.mxu0 }
 0x10b   : > { %v1510_v19 = vadd.f32 1.0, %v2165_v17  ;;  %v1874_v20 = vmul.f32 -1.442695, %v1386_v14  ;;  %v1173_v21 = vadd.f32 %v1940_v15, %v1172_v16  ;;  %v1174_v22 = vpop.f32.mrf.mxu1 }
 0x10c   : > { %v1942_v23 = vpop.f32.mrf.mxu0 }
 0x10d   : > { %2174 = vrcp.f32 %v1510_v19  ;;  %v1387_v24 = vadd.f32 %v2531_v31, %v1173_v21  ;;  %v1943_v25 = vadd.f32 %v1942_v23, %v1941_v18  ;;  %v1175_v26 = vpop.f32.mrf.mxu1 }
 0x10e   : > { %v2167_v27 = vpop.eup %2166  ;;  %2176 = vpow2.f32 %v1874_v20  ;;  %v1944_v28 = vpop.f32.mrf.mxu0 }
 0x10f   : > { %v1511_v29 = vadd.f32 1.0, %v2167_v27  ;;  %v1875_v30 = vmul.f32 -1.442695, %v1387_v24  ;;  %v1176_v32 = vadd.f32 %v1943_v25, %v1175_v26  ;;  %v1177_v33 = vpop.f32.mrf.mxu1 }
 0x110   : > { %v1945_v34 = vpop.f32.mrf.mxu0 }
 0x111   : > { %2178 = vrcp.f32 %v1511_v29  ;;  %v1388_v35 = vadd.f32 %v2531_v31, %v1176_v32  ;;  %v1946_v36 = vadd.f32 %v1945_v34, %v1944_v28  ;;  %v1180_v37 = vpop.f32.mrf.mxu1 }
 0x112   : > { %v2169_v38 = vpop.eup %2168  ;;  %2180 = vpow2.f32 %v1875_v30  ;;  %v1947_v39 = vpop.f32.mrf.mxu0 }
 0x113   : > { %v1512_v40 = vadd.f32 1.0, %v2169_v38  ;;  %v1876_v41 = vmul.f32 -1.442695, %v1388_v35  ;;  %v1181_v42 = vadd.f32 %v1946_v36, %v1180_v37  ;;  %v1182_v43 = vpop.f32.mrf.mxu1 }
 0x114   : > { %v1948_v44 = vpop.f32.mrf.mxu0 }
 0x115   : > { %2182 = vrcp.f32 %v1512_v40  ;;  %v1389_v45 = vadd.f32 %v2531_v31, %v1181_v42  ;;  %v1949_v46 = vadd.f32 %v1948_v44, %v1947_v39  ;;  %v1183_v47 = vpop.f32.mrf.mxu1 }
 0x116   : > { %v2171_v48 = vpop.eup %2170  ;;  %2184 = vpow2.f32 %v1876_v41  ;;  %v1950_v49 = vpop.f32.mrf.mxu0 }
 0x117   : > { %v2173_v50 = vpop.eup %2172  ;;  %1605 = vst [vmem:[%s2545_s29] sm:$0xff] %v2171_v48  ;;  %v1877_v51 = vmul.f32 -1.442695, %v1389_v45  ;;  %v1184_v52 = vadd.f32 %v1949_v46, %v1183_v47  ;;  %v1185_v53 = vpop.f32.mrf.mxu1 }
 0x118   : > { %v1513_v54 = vadd.f32 1.0, %v2173_v50  ;;  %v1951_v55 = vpop.f32.mrf.mxu0 }
 0x119   : > { %2186 = vpow2.f32 %v1877_v51  ;;  %v1390_v56 = vadd.f32 %v2531_v31, %v1184_v52  ;;  %v1952_v57 = vadd.f32 %v1951_v55, %v1950_v49  ;;  %v1188_v58 = vpop.f32.mrf.mxu1 }
 0x11a   : > { %v2175_v59 = vpop.eup %2174  ;;  %2188 = vrcp.f32 %v1513_v54  ;;  %v1953_v60 = vpop.f32.mrf.mxu0 }
 0x11b   : > { %v2177_v61 = vpop.eup %2176  ;;  %1606 = vst [vmem:[%s2545_s29 + $0x8] sm:$0xff] %v2175_v59  ;;  %v1878_v62 = vmul.f32 -1.442695, %v1390_v56  ;;  %v1189_v63 = vadd.f32 %v1952_v57, %v1188_v58  ;;  %v1190_v0 = vpop.f32.mrf.mxu1 }
 0x11c   : > { %v1514_v1 = vadd.f32 1.0, %v2177_v61  ;;  %v1954_v2 = vpop.f32.mrf.mxu0 }
 0x11d   : > { %2190 = vpow2.f32 %v1878_v62  ;;  %v1391_v3 = vadd.f32 %v2531_v31, %v1189_v63  ;;  %v1955_v4 = vadd.f32 %v1954_v2, %v1953_v60  ;;  %v1191_v5 = vpop.f32.mrf.mxu1 }
 0x11e   : > { %v2179_v6 = vpop.eup %2178  ;;  %2192 = vrcp.f32 %v1514_v1  ;;  %v1956_v7 = vpop.f32.mrf.mxu0 }
 0x11f   : > { %v2181_v8 = vpop.eup %2180  ;;  %1607 = vst [vmem:[%s2545_s29 + $0x10] sm:$0xff] %v2179_v6  ;;  %v1879_v9 = vmul.f32 -1.442695, %v1391_v3  ;;  %v1192_v10 = vadd.f32 %v1955_v4, %v1191_v5  ;;  %v1193_v11 = vpop.f32.mrf.mxu1 }
 0x120   : > { %v1515_v12 = vadd.f32 1.0, %v2181_v8  ;;  %v1957_v13 = vpop.f32.mrf.mxu0 }
 0x121   : > { %2194 = vpow2.f32 %v1879_v9  ;;  %v1392_v14 = vadd.f32 %v2531_v31, %v1192_v10  ;;  %v1958_v15 = vadd.f32 %v1957_v13, %v1956_v7  ;;  %v1196_v16 = vpop.f32.mrf.mxu1 }
 0x122   : > { %v2183_v17 = vpop.eup %2182  ;;  %2196 = vrcp.f32 %v1515_v12  ;;  %v1959_v18 = vpop.f32.mrf.mxu0 }
 0x123   : > { %v2185_v19 = vpop.eup %2184  ;;  %1608 = vst [vmem:[%s2545_s29 + $0x18] sm:$0xff] %v2183_v17  ;;  %v1880_v20 = vmul.f32 -1.442695, %v1392_v14  ;;  %v1197_v21 = vadd.f32 %v1958_v15, %v1196_v16  ;;  %v1198_v22 = vpop.f32.mrf.mxu1 }
 0x124   : > { %v1516_v23 = vadd.f32 1.0, %v2185_v19  ;;  %v1960_v24 = vpop.f32.mrf.mxu0 }
 0x125   : > { %2198 = vpow2.f32 %v1880_v20  ;;  %v1393_v25 = vadd.f32 %v2531_v31, %v1197_v21  ;;  %v1961_v26 = vadd.f32 %v1960_v24, %v1959_v18  ;;  %v1199_v27 = vpop.f32.mrf.mxu1 }
 0x126   : > { %v2187_v28 = vpop.eup %2186  ;;  %2200 = vrcp.f32 %v1516_v23  ;;  %v1962_v29 = vpop.f32.mrf.mxu0 }
 0x127   : > { %v2189_v30 = vpop.eup %2188  ;;  %v1517_v32 = vadd.f32 1.0, %v2187_v28  ;;  %v1881_v33 = vmul.f32 -1.442695, %v1393_v25  ;;  %v1200_v34 = vadd.f32 %v1961_v26, %v1199_v27  ;;  %v1201_v35 = vpop.f32.mrf.mxu1 }
 0x128   : > { %1609 = vst [vmem:[%s2545_s29 + $0x20] sm:$0xff] %v2189_v30  ;;  %v1963_v36 = vpop.f32.mrf.mxu0 }
 0x129   : > { %2202 = vrcp.f32 %v1517_v32  ;;  %v1394_v37 = vadd.f32 %v2531_v31, %v1200_v34  ;;  %v1964_v38 = vadd.f32 %v1963_v36, %v1962_v29  ;;  %v1204_v39 = vpop.f32.mrf.mxu1 }
 0x12a   : > { %v2191_v40 = vpop.eup %2190  ;;  %2204 = vpow2.f32 %v1881_v33  ;;  %v1965_v41 = vpop.f32.mrf.mxu0 }
 0x12b   : > { %v2193_v42 = vpop.eup %2192  ;;  %v1518_v43 = vadd.f32 1.0, %v2191_v40  ;;  %v1882_v44 = vmul.f32 -1.442695, %v1394_v37  ;;  %v1205_v45 = vadd.f32 %v1964_v38, %v1204_v39  ;;  %v1206_v46 = vpop.f32.mrf.mxu1 }
 0x12c   : > { %1610 = vst [vmem:[%s2545_s29 + $0x28] sm:$0xff] %v2193_v42  ;;  %v1966_v47 = vpop.f32.mrf.mxu0 }
 0x12d   : > { %2206 = vrcp.f32 %v1518_v43  ;;  %v1395_v48 = vadd.f32 %v2531_v31, %v1205_v45  ;;  %v1967_v49 = vadd.f32 %v1966_v47, %v1965_v41  ;;  %v1207_v50 = vpop.f32.mrf.mxu1 }
 0x12e   : > { %v2195_v51 = vpop.eup %2194  ;;  %2208 = vpow2.f32 %v1882_v44  ;;  %v1968_v52 = vpop.f32.mrf.mxu0 }
 0x12f   : > { %v2197_v53 = vpop.eup %2196  ;;  %v1519_v54 = vadd.f32 1.0, %v2195_v51  ;;  %v1883_v55 = vmul.f32 -1.442695, %v1395_v48  ;;  %v1208_v56 = vadd.f32 %v1967_v49, %v1207_v50  ;;  %v1209_v57 = vpop.f32.mrf.mxu1 }
 0x130   : > { %1611 = vst [vmem:[%s2545_s29 + $0x30] sm:$0xff] %v2197_v53  ;;  %v1969_v58 = vpop.f32.mrf.mxu0 }
 0x131   : > { %2210 = vrcp.f32 %v1519_v54  ;;  %v1396_v59 = vadd.f32 %v2531_v31, %v1208_v56  ;;  %v1970_v60 = vadd.f32 %v1969_v58, %v1968_v52  ;;  %v1212_v61 = vpop.f32.mrf.mxu1 }
 0x132   : > { %v2199_v62 = vpop.eup %2198  ;;  %2212 = vpow2.f32 %v1883_v55  ;;  %v1971_v63 = vpop.f32.mrf.mxu0 }
 0x133   : > { %v2201_v0 = vpop.eup %2200  ;;  %v1520_v1 = vadd.f32 1.0, %v2199_v62  ;;  %v1884_v2 = vmul.f32 -1.442695, %v1396_v59  ;;  %v1213_v3 = vadd.f32 %v1970_v60, %v1212_v61  ;;  %v1214_v4 = vpop.f32.mrf.mxu1 }
 0x134   : > { %1612 = vst [vmem:[%s2545_s29 + $0x38] sm:$0xff] %v2201_v0  ;;  %v1972_v5 = vpop.f32.mrf.mxu0 }
 0x135   : > { %2214 = vrcp.f32 %v1520_v1  ;;  %v1397_v6 = vadd.f32 %v2531_v31, %v1213_v3  ;;  %v1973_v7 = vadd.f32 %v1972_v5, %v1971_v63  ;;  %v1215_v8 = vpop.f32.mrf.mxu1 }
 0x136   : > { %v2203_v9 = vpop.eup %2202  ;;  %2216 = vpow2.f32 %v1884_v2  ;;  %v1974_v10 = vpop.f32.mrf.mxu0 }
 0x137   : > { %v2205_v11 = vpop.eup %2204  ;;  %1613 = vst [vmem:[%s2545_s29 + $0x40] sm:$0xff] %v2203_v9  ;;  %v1885_v12 = vmul.f32 -1.442695, %v1397_v6  ;;  %v1216_v13 = vadd.f32 %v1973_v7, %v1215_v8  ;;  %v1217_v14 = vpop.f32.mrf.mxu1 }
 0x138   : > { %v1521_v15 = vadd.f32 1.0, %v2205_v11  ;;  %v1975_v16 = vpop.f32.mrf.mxu0 }
 0x139   : > { %2218 = vpow2.f32 %v1885_v12  ;;  %v1398_v17 = vadd.f32 %v2531_v31, %v1216_v13  ;;  %v1976_v18 = vadd.f32 %v1975_v16, %v1974_v10  ;;  %v1220_v19 = vpop.f32.mrf.mxu1 }
 0x13a   : > { %v2207_v20 = vpop.eup %2206  ;;  %2220 = vrcp.f32 %v1521_v15  ;;  %v1977_v21 = vpop.f32.mrf.mxu0 }
 0x13b   : > { %v2209_v22 = vpop.eup %2208  ;;  %1614 = vst [vmem:[%s2545_s29 + $0x48] sm:$0xff] %v2207_v20  ;;  %v1886_v23 = vmul.f32 -1.442695, %v1398_v17  ;;  %v1221_v24 = vadd.f32 %v1976_v18, %v1220_v19  ;;  %v1222_v25 = vpop.f32.mrf.mxu1 }
 0x13c   : > { %v1522_v26 = vadd.f32 1.0, %v2209_v22  ;;  %v1978_v27 = vpop.f32.mrf.mxu0 }
 0x13d   : > { %2222 = vpow2.f32 %v1886_v23  ;;  %v1399_v28 = vadd.f32 %v2531_v31, %v1221_v24  ;;  %v1979_v29 = vadd.f32 %v1978_v27, %v1977_v21  ;;  %v1223_v30 = vpop.f32.mrf.mxu1 }
 0x13e   : > { %v2211_v32 = vpop.eup %2210  ;;  %2224 = vrcp.f32 %v1522_v26  ;;  %v1980_v33 = vpop.f32.mrf.mxu0 }
 0x13f   : > { %v2213_v34 = vpop.eup %2212  ;;  %1615 = vst [vmem:[%s2545_s29 + $0x50] sm:$0xff] %v2211_v32  ;;  %v1887_v35 = vmul.f32 -1.442695, %v1399_v28  ;;  %v1224_v36 = vadd.f32 %v1979_v29, %v1223_v30  ;;  %v1225_v37 = vpop.f32.mrf.mxu1 }
 0x140   : > { %v1523_v38 = vadd.f32 1.0, %v2213_v34  ;;  %v1981_v39 = vpop.f32.mrf.mxu0 }
 0x141   : > { %2226 = vpow2.f32 %v1887_v35  ;;  %v1400_v40 = vadd.f32 %v2531_v31, %v1224_v36  ;;  %v1982_v41 = vadd.f32 %v1981_v39, %v1980_v33  ;;  %v1228_v42 = vpop.f32.mrf.mxu1 }
 0x142   : > { %v2215_v43 = vpop.eup %2214  ;;  %2228 = vrcp.f32 %v1523_v38  ;;  %v1983_v44 = vpop.f32.mrf.mxu0 }
 0x143   : > { %v2217_v45 = vpop.eup %2216  ;;  %1616 = vst [vmem:[%s2545_s29 + $0x58] sm:$0xff] %v2215_v43  ;;  %v1888_v46 = vmul.f32 -1.442695, %v1400_v40  ;;  %v1229_v47 = vadd.f32 %v1982_v41, %v1228_v42  ;;  %v1230_v48 = vpop.f32.mrf.mxu1 }
 0x144   : > { %v1524_v49 = vadd.f32 1.0, %v2217_v45  ;;  %v1984_v50 = vpop.f32.mrf.mxu0 }
 0x145   : > { %2230 = vpow2.f32 %v1888_v46  ;;  %v1401_v51 = vadd.f32 %v2531_v31, %v1229_v47  ;;  %v1985_v52 = vadd.f32 %v1984_v50, %v1983_v44  ;;  %v1231_v53 = vpop.f32.mrf.mxu1 }
 0x146   : > { %v2219_v54 = vpop.eup %2218  ;;  %2232 = vrcp.f32 %v1524_v49  ;;  %v1986_v55 = vpop.f32.mrf.mxu0 }
 0x147   : > { %v2221_v56 = vpop.eup %2220  ;;  %v1525_v57 = vadd.f32 1.0, %v2219_v54  ;;  %v1889_v58 = vmul.f32 -1.442695, %v1401_v51  ;;  %v1232_v59 = vadd.f32 %v1985_v52, %v1231_v53  ;;  %v1233_v60 = vpop.f32.mrf.mxu1 }
 0x148   : > { %1617 = vst [vmem:[%s2545_s29 + $0x60] sm:$0xff] %v2221_v56  ;;  %v1987_v61 = vpop.f32.mrf.mxu0 }
 0x149   : > { %2234 = vrcp.f32 %v1525_v57  ;;  %v1402_v62 = vadd.f32 %v2531_v31, %v1232_v59  ;;  %v1988_v63 = vadd.f32 %v1987_v61, %v1986_v55  ;;  %v1236_v0 = vpop.f32.mrf.mxu1 }
 0x14a   : > { %v2223_v1 = vpop.eup %2222  ;;  %2236 = vpow2.f32 %v1889_v58  ;;  %v1989_v2 = vpop.f32.mrf.mxu0 }
 0x14b   : > { %v2225_v3 = vpop.eup %2224  ;;  %v1526_v4 = vadd.f32 1.0, %v2223_v1  ;;  %v1890_v5 = vmul.f32 -1.442695, %v1402_v62  ;;  %v1237_v6 = vadd.f32 %v1988_v63, %v1236_v0  ;;  %v1238_v7 = vpop.f32.mrf.mxu1 }
 0x14c   : > { %1618 = vst [vmem:[%s2545_s29 + $0x68] sm:$0xff] %v2225_v3  ;;  %v1990_v8 = vpop.f32.mrf.mxu0 }
 0x14d   : > { %2238 = vrcp.f32 %v1526_v4  ;;  %v1403_v9 = vadd.f32 %v2531_v31, %v1237_v6  ;;  %v1991_v10 = vadd.f32 %v1990_v8, %v1989_v2  ;;  %v1239_v11 = vpop.f32.mrf.mxu1 }
 0x14e   : > { %v2227_v12 = vpop.eup %2226  ;;  %2240 = vpow2.f32 %v1890_v5  ;;  %v1992_v13 = vpop.f32.mrf.mxu0 }
 0x14f   : > { %v2229_v14 = vpop.eup %2228  ;;  %v1527_v15 = vadd.f32 1.0, %v2227_v12  ;;  %v1891_v16 = vmul.f32 -1.442695, %v1403_v9  ;;  %v1240_v17 = vadd.f32 %v1991_v10, %v1239_v11  ;;  %v1241_v18 = vpop.f32.mrf.mxu1 }
 0x150   : > { %1619 = vst [vmem:[%s2545_s29 + $0x70] sm:$0xff] %v2229_v14  ;;  %v1993_v19 = vpop.f32.mrf.mxu0 }
 0x151   : > { %2242 = vrcp.f32 %v1527_v15  ;;  %v1404_v20 = vadd.f32 %v2531_v31, %v1240_v17  ;;  %v1994_v21 = vadd.f32 %v1993_v19, %v1992_v13  ;;  %v1244_v22 = vpop.f32.mrf.mxu1 }
 0x152   : > { %v2231_v23 = vpop.eup %2230  ;;  %2244 = vpow2.f32 %v1891_v16  ;;  %v1995_v24 = vpop.f32.mrf.mxu0 }
 0x153   : > { %v2233_v25 = vpop.eup %2232  ;;  %v1528_v26 = vadd.f32 1.0, %v2231_v23  ;;  %v1892_v27 = vmul.f32 -1.442695, %v1404_v20  ;;  %v1245_v28 = vadd.f32 %v1994_v21, %v1244_v22  ;;  %v1246_v29 = vpop.f32.mrf.mxu1 }
 0x154   : > { %1620 = vst [vmem:[%s2545_s29 + $0x78] sm:$0xff] %v2233_v25  ;;  %v1996_v30 = vpop.f32.mrf.mxu0 }
 0x155   : > { %2246 = vrcp.f32 %v1528_v26  ;;  %v1405_v32 = vadd.f32 %v2531_v31, %v1245_v28  ;;  %v1997_v33 = vadd.f32 %v1996_v30, %v1995_v24  ;;  %v1247_v34 = vpop.f32.mrf.mxu1 }
 0x156   : > { %v2235_v35 = vpop.eup %2234  ;;  %2248 = vpow2.f32 %v1892_v27  ;;  %v1998_v36 = vpop.f32.mrf.mxu0 }
 0x157   : > { %v2237_v37 = vpop.eup %2236  ;;  %1621 = vst [vmem:[%s2545_s29 + $0x80] sm:$0xff] %v2235_v35  ;;  %v1893_v38 = vmul.f32 -1.442695, %v1405_v32  ;;  %v1248_v39 = vadd.f32 %v1997_v33, %v1247_v34  ;;  %v1249_v40 = vpop.f32.mrf.mxu1 }
 0x158   : > { %v1529_v41 = vadd.f32 1.0, %v2237_v37  ;;  %v1999_v42 = vpop.f32.mrf.mxu0 }
 0x159   : > { %2250 = vpow2.f32 %v1893_v38  ;;  %v1406_v43 = vadd.f32 %v2531_v31, %v1248_v39  ;;  %v2000_v44 = vadd.f32 %v1999_v42, %v1998_v36  ;;  %v1252_v45 = vpop.f32.mrf.mxu1 }
 0x15a   : > { %v2239_v46 = vpop.eup %2238  ;;  %2252 = vrcp.f32 %v1529_v41  ;;  %v2001_v47 = vpop.f32.mrf.mxu0 }
 0x15b   : > { %v2241_v48 = vpop.eup %2240  ;;  %1622 = vst [vmem:[%s2545_s29 + $0x88] sm:$0xff] %v2239_v46  ;;  %v1894_v49 = vmul.f32 -1.442695, %v1406_v43  ;;  %v1253_v50 = vadd.f32 %v2000_v44, %v1252_v45  ;;  %v1254_v51 = vpop.f32.mrf.mxu1 }
 0x15c   : > { %v1530_v52 = vadd.f32 1.0, %v2241_v48  ;;  %v2002_v53 = vpop.f32.mrf.mxu0 }
 0x15d   : > { %2254 = vpow2.f32 %v1894_v49  ;;  %v1407_v54 = vadd.f32 %v2531_v31, %v1253_v50  ;;  %v2003_v55 = vadd.f32 %v2002_v53, %v2001_v47  ;;  %v1255_v56 = vpop.f32.mrf.mxu1 }
 0x15e   : > { %v2243_v57 = vpop.eup %2242  ;;  %2256 = vrcp.f32 %v1530_v52  ;;  %v2004_v58 = vpop.f32.mrf.mxu0 }
 0x15f   : > { %v2245_v59 = vpop.eup %2244  ;;  %1623 = vst [vmem:[%s2545_s29 + $0x90] sm:$0xff] %v2243_v57  ;;  %v1895_v60 = vmul.f32 -1.442695, %v1407_v54  ;;  %v1256_v61 = vadd.f32 %v2003_v55, %v1255_v56  ;;  %v1257_v62 = vpop.f32.mrf.mxu1 }
 0x160   : > { %v1531_v63 = vadd.f32 1.0, %v2245_v59  ;;  %v2005_v0 = vpop.f32.mrf.mxu0 }
 0x161   : > { %2258 = vpow2.f32 %v1895_v60  ;;  %v1408_v1 = vadd.f32 %v2531_v31, %v1256_v61  ;;  %v2006_v2 = vadd.f32 %v2005_v0, %v2004_v58  ;;  %v1260_v3 = vpop.f32.mrf.mxu1 }
 0x162   : > { %v2247_v4 = vpop.eup %2246  ;;  %2260 = vrcp.f32 %v1531_v63  ;;  %v2007_v5 = vpop.f32.mrf.mxu0 }
 0x163   : > { %v2249_v6 = vpop.eup %2248  ;;  %1624 = vst [vmem:[%s2545_s29 + $0x98] sm:$0xff] %v2247_v4  ;;  %v1896_v7 = vmul.f32 -1.442695, %v1408_v1  ;;  %v1261_v8 = vadd.f32 %v2006_v2, %v1260_v3  ;;  %v1262_v9 = vpop.f32.mrf.mxu1 }
 0x164   : > { %v1532_v10 = vadd.f32 1.0, %v2249_v6  ;;  %v2008_v11 = vpop.f32.mrf.mxu0 }
 0x165   : > { %2262 = vpow2.f32 %v1896_v7  ;;  %v1409_v12 = vadd.f32 %v2531_v31, %v1261_v8  ;;  %v2009_v13 = vadd.f32 %v2008_v11, %v2007_v5  ;;  %v1263_v14 = vpop.f32.mrf.mxu1 }
 0x166   : > { %v2251_v15 = vpop.eup %2250  ;;  %2264 = vrcp.f32 %v1532_v10  ;;  %v2010_v16 = vpop.f32.mrf.mxu0 }
 0x167   : > { %v2253_v17 = vpop.eup %2252  ;;  %v1533_v18 = vadd.f32 1.0, %v2251_v15  ;;  %v1897_v19 = vmul.f32 -1.442695, %v1409_v12  ;;  %v1264_v20 = vadd.f32 %v2009_v13, %v1263_v14  ;;  %v1265_v21 = vpop.f32.mrf.mxu1 }
 0x168   : > { %1625 = vst [vmem:[%s2545_s29 + $0xa0] sm:$0xff] %v2253_v17  ;;  %v2011_v22 = vpop.f32.mrf.mxu0 }
 0x169   : > { %2266 = vrcp.f32 %v1533_v18  ;;  %v1410_v23 = vadd.f32 %v2531_v31, %v1264_v20  ;;  %v2012_v24 = vadd.f32 %v2011_v22, %v2010_v16  ;;  %v1268_v25 = vpop.f32.mrf.mxu1 }
 0x16a   : > { %v2255_v26 = vpop.eup %2254  ;;  %2268 = vpow2.f32 %v1897_v19  ;;  %v2013_v27 = vpop.f32.mrf.mxu0 }
 0x16b   : > { %v2257_v28 = vpop.eup %2256  ;;  %v1534_v29 = vadd.f32 1.0, %v2255_v26  ;;  %v1898_v30 = vmul.f32 -1.442695, %v1410_v23  ;;  %v1269_v32 = vadd.f32 %v2012_v24, %v1268_v25  ;;  %v1270_v33 = vpop.f32.mrf.mxu1 }
 0x16c   : > { %1626 = vst [vmem:[%s2545_s29 + $0xa8] sm:$0xff] %v2257_v28  ;;  %v2014_v34 = vpop.f32.mrf.mxu0 }
 0x16d   : > { %2270 = vrcp.f32 %v1534_v29  ;;  %v1411_v35 = vadd.f32 %v2531_v31, %v1269_v32  ;;  %v2015_v36 = vadd.f32 %v2014_v34, %v2013_v27  ;;  %v1271_v37 = vpop.f32.mrf.mxu1 }
 0x16e   : > { %v2259_v38 = vpop.eup %2258  ;;  %2272 = vpow2.f32 %v1898_v30 }
 0x16f   : > { %v2261_v39 = vpop.eup %2260  ;;  %v1535_v40 = vadd.f32 1.0, %v2259_v38  ;;  %v1899_v41 = vmul.f32 -1.442695, %v1411_v35  ;;  %v1272_v42 = vadd.f32 %v2015_v36, %v1271_v37  ;;  %v1273_v43 = vpop.f32.mrf.mxu1 }
 0x170   : > { %1627 = vst [vmem:[%s2545_s29 + $0xb0] sm:$0xff] %v2261_v39 }
 0x171   : > { %2274 = vrcp.f32 %v1535_v40  ;;  %v1412_v44 = vadd.f32 %v2531_v31, %v1272_v42 }
 0x172   : > { %v2263_v45 = vpop.eup %2262  ;;  %2276 = vpow2.f32 %v1899_v41 }
 0x173   : > { %v2265_v46 = vpop.eup %2264  ;;  %v1536_v47 = vadd.f32 1.0, %v2263_v45  ;;  %v1900_v48 = vmul.f32 -1.442695, %v1412_v44 }
 0x174   : > { %1628 = vst [vmem:[%s2545_s29 + $0xb8] sm:$0xff] %v2265_v46 }
 0x175   : > { %2278 = vrcp.f32 %v1536_v47 }
 0x176   : > { %v2267_v49 = vpop.eup %2266  ;;  %2280 = vpow2.f32 %v1900_v48 }
 0x177   : > { %v2269_v50 = vpop.eup %2268  ;;  %1629 = vst [vmem:[%s2545_s29 + $0xc0] sm:$0xff] %v2267_v49 }
 0x178   : > { %v1537_v51 = vadd.f32 1.0, %v2269_v50 }
 0x17a   : > { %v2271_v52 = vpop.eup %2270  ;;  %2282 = vrcp.f32 %v1537_v51 }
 0x17b   : > { %v2273_v53 = vpop.eup %2272  ;;  %1630 = vst [vmem:[%s2545_s29 + $0xc8] sm:$0xff] %v2271_v52 }
 0x17c   : > { %v1538_v31 = vadd.f32 1.0, %v2273_v53 }
 0x17e   : > { %v2275_v54 = vpop.eup %2274  ;;  %2284 = vrcp.f32 %v1538_v31 }
 0x17f   : > { %v2277_v55 = vpop.eup %2276  ;;  %1631 = vst [vmem:[%s2545_s29 + $0xd0] sm:$0xff] %v2275_v54 }
 0x180   : > { %v1539_v56 = vadd.f32 1.0, %v2277_v55 }
 0x182   : > { %v2279_v57 = vpop.eup %2278  ;;  %2286 = vrcp.f32 %v1539_v56 }
 0x183   : > { %v2281_v58 = vpop.eup %2280  ;;  %1632 = vst [vmem:[%s2545_s29 + $0xd8] sm:$0xff] %v2279_v57 }
 0x184   : > { %v1540_v59 = vadd.f32 1.0, %v2281_v58 }
 0x186   : > { %2288 = vrcp.f32 %v1540_v59 }
 0x187   : > { %v2283_v60 = vpop.eup %2282 }
 0x188   : > { %1633 = vst [vmem:[%s2545_s29 + $0xe0] sm:$0xff] %v2283_v60 }
 0x18b   : > { %v2285_v61 = vpop.eup %2284 }
 0x18c   : > { %1634 = vst [vmem:[%s2545_s29 + $0xe8] sm:$0xff] %v2285_v61 }
 0x18f   : > { %v2287_v62 = vpop.eup %2286 }
 0x190   : > { %1635 = vst [vmem:[%s2545_s29 + $0xf0] sm:$0xff] %v2287_v62 }
 0x193   : > { %v2289_v63 = vpop.eup %2288 }
 0x194   : > { %1636 = vst [vmem:[%s2545_s29 + $0xf8] sm:$0xff] %v2289_v63 }
 0x195 PF: > { %s13_s14 = sadd.s32 1, %s2312_s14   ;;  %s2616_s12 = smov %s2308_s13 }
 0x196   : > { %p10_p5 = scmp.ge.s32.totalorder %s13_s14, 4   ;;  %s2617_s13 = smov %s2619_s15 }
 0x198   :  { %12 = sbr.rel (!%p10_p5) target bundleno = 2 (0x2), region = 76 }

</bundles_post_ra>
